<compile_context>
chip_gen: v7x
topology: tpu7x:2x2x1
jax: 0.10.0
libtpu: 0.0.40
codegen_flags: <defaults>
</compile_context>

<pallas_src>
import jax
import jax.numpy as jnp
import numpy as np
from jax.experimental import pallas as pl
from jax.experimental.pallas import tpu as pltpu


# ---------------------------------------------------------------------------
# Pallas kernel: SENSE forward for a block of T_BLK time frames
# ---------------------------------------------------------------------------
def _sense_kernel(basis_ref,                      # SMEM (N_time, S) f32
                  xr_ref, xi_ref,                 # (MB, S, NYX)
                  per_ref, pei_ref,               # (MB, E, NYX)
                  cr_ref, ci_ref,                 # (MB, C, NYX)
                  psr_ref, psi_ref,               # (MB, NYX)
                  w_ref,                          # (T_BLK, E, NYX)
                  ftr_ref, fti_ref,               # (NYX, NYX) kron DFT^T
                  or_ref, oi_ref,                 # (T_BLK*E*C, NYX)
                  lhs_ref):                       # scratch (2*M, NYX)
    MB, S, NYX = xr_ref.shape
    E = per_ref.shape[1]
    C = cr_ref.shape[1]
    T_BLK = w_ref.shape[0]
    EC = E * C
    TEC = T_BLK * EC
    M = MB * TEC                                  # rows of the complex FFT lhs
    t0 = pl.program_id(0) * T_BLK                 # first frame of this block

    # ---- build lhs rows: row = (mb*T_BLK + t)*E*C + e*C + c ------------------
    #      a[row] = coils[c,mb] * phase_echo[e,mb] * (sum_s basis[t0+t,s] x[s,mb])
    #      real part in rows [0:M), imag part in rows [M:2M)  (no concatenate).
    for mb in range(MB):
        x_mb_r = xr_ref[mb]                       # (S, NYX)
        x_mb_i = xi_ref[mb]
        pe_mb_r = per_ref[mb]                     # (E, NYX)
        pe_mb_i = pei_ref[mb]
        c_mb_r = cr_ref[mb]                       # (C, NYX)
        c_mb_i = ci_ref[mb]
        for t in range(T_BLK):
            # basis projection (basis is real): SMEM scalar x vector multiplies
            b = basis_ref[t0 + t, 0]
            xp_r = b * x_mb_r[0]
            xp_i = b * x_mb_i[0]
            for s in range(1, S):
                b = basis_ref[t0 + t, s]
                xp_r = xp_r + b * x_mb_r[s]
                xp_i = xp_i + b * x_mb_i[s]
            # TODO(synk): baseline multiply (self.baseline) not implemented; this
            # kernel matches the module only for baseline=None.
            for e in range(E):
                ph_r = pe_mb_r[e] * xp_r - pe_mb_i[e] * xp_i
                ph_i = pe_mb_r[e] * xp_i + pe_mb_i[e] * xp_r
                row = (mb * T_BLK + t) * EC + e * C
                # coil multiply for all C coils at once (sublane broadcast of ph)
                lhs_ref[row:row + C, :] = (c_mb_r * ph_r[None, :]
                                           - c_mb_i * ph_i[None, :])
                lhs_ref[M + row:M + row + C, :] = (c_mb_r * ph_i[None, :]
                                                   + c_mb_i * ph_r[None, :])

    # ---- centered orthonormal 2-D FFT over (Ny, Nx), flattened ---------------
    #      two (2M, NYX) @ (NYX, NYX) f32 MXU dots against kron(Fy, Fx)^T
    lhs = lhs_ref[...]
    p = jnp.dot(lhs, ftr_ref[...], preferred_element_type=jnp.float32)
    q = jnp.dot(lhs, fti_ref[...], preferred_element_type=jnp.float32)
    k_r = p[:M] - q[M:]
    k_i = q[:M] + p[M:]

    # ---- slice-phase multiply + multi-band (DIM_Z) sum over mb row blocks ----
    s_r = None
    s_i = None
    for mb in range(MB):
        ps_r = psr_ref[mb, :]
        ps_i = psi_ref[mb, :]
        kr = k_r[mb * TEC:(mb + 1) * TEC]
        ki = k_i[mb * TEC:(mb + 1) * TEC]
        tr = ps_r[None, :] * kr - ps_i[None, :] * ki
        ti = ps_r[None, :] * ki + ps_i[None, :] * kr
        s_r = tr if s_r is None else s_r + tr
        s_i = ti if s_i is None else s_i + ti

    # ---- k-space sampling mask (real-valued 0/1) and store -------------------
    for t in range(T_BLK):
        for e in range(E):
            w = w_ref[t, e, :]                    # (NYX,)
            r0 = t * EC + e * C
            or_ref[r0:r0 + C, :] = w[None, :] * s_r[r0:r0 + C]
            oi_ref[r0:r0 + C, :] = w[None, :] * s_i[r0:r0 + C]


# ---------------------------------------------------------------------------
# Glue (plain JAX): compact layout plumbing + pallas_call
# ---------------------------------------------------------------------------
def centered_dft_matrix(n):
    """Matrix F such that F @ v == fftshift(fft(ifftshift(v), norm='ortho'))."""
    eye = jnp.eye(n, dtype=jnp.complex64)
    f = jnp.fft.fft(jnp.fft.ifftshift(eye, axes=0), axis=0, norm="ortho")
    return jnp.fft.fftshift(f, axes=0)


def sense_forward(x, coils, basis, phase_echo, phase_slice, weights,
                  t_block=None):
    """Pallas implementation of Sense.forward (Cartesian, tensor basis)."""
    f32 = jnp.float32
    x_time = x.shape[0]
    N_time = basis.shape[0]
    N_echo = phase_echo.shape[-5]
    N_coil = coils.shape[-4]
    MB, Ny, Nx = x.shape[-3], x.shape[-2], x.shape[-1]
    NYX = Ny * Nx
    EC = N_echo * N_coil

    # The dense kron(Fy, Fx) DFT operator scales as (Ny*Nx)^2 and only fits
    # VMEM for small images.
    if 2 * NYX * NYX * 4 > (16 << 20):
        # TODO(synk): separable Fy @ A @ Fx^T FFT path (lane-dense (rows, Ny, Nx)
        # layout) for Ny, Nx >= 128; the dense kron operator cannot fit VMEM there.
        raise NotImplementedError("Ny*Nx too large for the dense kron-DFT kernel")

    if t_block is None:
        # Keep >= 2 grid steps when possible: both v7x TensorCores get work and
        # per-step M = 2*MB*E*C*t_block already matches v5e's 128-tall MXU at
        # the test shape.  t_block = N_time (grid=(1,)) maximizes v6e MXU fill.
        t_block = N_time // 2 if (N_time % 2 == 0 and N_time >= 2) else N_time
    assert N_time % t_block == 0, "t_block must divide N_time"
    n_steps = N_time // t_block
    M = MB * t_block * EC

    def ri(a):
        return jnp.real(a).astype(f32), jnp.imag(a).astype(f32)

    # --- compact layouts (no echo/coil broadcasting here; done in-kernel) ----
    # mb is the leading axis of every mb-indexed constant; lanes = flat (Ny,Nx).
    xr, xi = ri(jnp.transpose(x.reshape(x_time, MB, NYX), (1, 0, 2)))
    cr, ci = ri(jnp.transpose(coils.reshape(N_coil, MB, NYX), (1, 0, 2)))
    per, pei = ri(jnp.transpose(phase_echo.reshape(N_echo, MB, NYX), (1, 0, 2)))
    psr, psi = ri(phase_slice.reshape(MB, NYX))
    # Assumptions inherited from the Sense module: `weights` is a real-valued
    # 0/1 sampling mask (rss(y) > 0) and `basis` is real-valued; imaginary
    # parts are dropped here by construction.
    w = jnp.real(weights).astype(f32).reshape(N_time, N_echo, NYX)
    basis_f = jnp.real(basis).astype(f32)

    # combined centered 2-D DFT operator (transposed), row-major (y, x) flatten
    f2dt = jnp.kron(centered_dft_matrix(Ny), centered_dft_matrix(Nx)).T
    ftr, fti = ri(f2dt)                                            # (NYX, NYX)

    def const(shape):
        # constant-index block: DMA'd once, VMEM-resident across the grid
        return pl.BlockSpec(shape, lambda g, n=len(shape): (0,) * n)

    in_specs = [
        pl.BlockSpec(memory_space=pltpu.MemorySpace.SMEM),         # basis scalars
        const((MB, x_time, NYX)), const((MB, x_time, NYX)),        # x r/i
        const((MB, N_echo, NYX)), const((MB, N_echo, NYX)),        # phase_echo r/i
        const((MB, N_coil, NYX)), const((MB, N_coil, NYX)),        # coils r/i
        const((MB, NYX)), const((MB, NYX)),                        # phase_slice r/i
        pl.BlockSpec((t_block, N_echo, NYX), lambda g: (g, 0, 0)), # weights
        const((NYX, NYX)), const((NYX, NYX)),                      # kron DFT^T r/i
    ]
    out_spec = pl.BlockSpec((t_block * EC, NYX), lambda g: (g, 0))
    out_shape = (jax.ShapeDtypeStruct((N_time * EC, NYX), f32),
                 jax.ShapeDtypeStruct((N_time * EC, NYX), f32))

    yr, yi = pl.pallas_call(
        _sense_kernel,
        grid=(n_steps,),
        in_specs=in_specs,
        out_specs=(out_spec, out_spec),
        out_shape=out_shape,
        scratch_shapes=[pltpu.VMEM((2 * M, NYX), f32)],            # FFT lhs
        compiler_params=pltpu.CompilerParams(
            dimension_semantics=("parallel",)),
    )(basis_f, xr, xi, per, pei, cr, ci, psr, psi, w, ftr, fti)

    return jax.lax.complex(yr, yi).reshape(N_time, N_echo, N_coil, 1, Ny, Nx)


# ---------------------------------------------------------------------------
# Pure-JAX reference (mirrors Sense.forward with Tensor basis, coord=None)
# ---------------------------------------------------------------------------
def _fftc(a, axes=(-2, -1)):
    return jnp.fft.fftshift(
        jnp.fft.fftn(jnp.fft.ifftshift(a, axes=axes), axes=axes, norm="ortho"),
        axes=axes)


def sense_forward_ref(x, coils, basis, phase_echo, phase_slice, weights):
    x2 = x.reshape(x.shape[0], -1)
    x1 = jnp.matmul(basis.astype(x.dtype), x2,
                    precision=jax.lax.Precision.HIGHEST)
    x_proj = x1.reshape((basis.shape[0],) + x.shape[1:])
    x_phase = phase_echo * x_proj
    x_coils = coils * x_phase
    x_kspace = _fftc(x_coils, axes=(-2, -1))
    x_kslice = jnp.sum(phase_slice * x_kspace, axis=-3, keepdims=True)
    return weights * x_kslice


# ---------------------------------------------------------------------------
if __name__ == "__main__":
    key = jax.random.PRNGKey(0)
    N_time, N_echo, N_coil, N_z = 8, 2, 4, 1
    MB, Ny, Nx = 2, 16, 16
    x_time = 4  # number of basis coefficients

    ks = jax.random.split(key, 8)

    def crandn(k, shape):
        k1, k2 = jax.random.split(k)
        return (jax.random.normal(k1, shape, jnp.float32)
                + 1j * jax.random.normal(k2, shape, jnp.float32)).astype(jnp.complex64)

    # sampled k-space data y: only its shape / sampling pattern matters here
    samp = (jax.random.uniform(ks[0], (N_time, N_echo, 1, N_z, Ny, Nx)) > 0.4)
    y_data = crandn(ks[1], (N_time, N_echo, N_coil, N_z, Ny, Nx)) * samp

    coils = crandn(ks[2], (1, 1, N_coil, MB, Ny, Nx))
    basis = jax.random.normal(ks[3], (N_time, x_time), jnp.float32)
    phase_echo = jnp.exp(
        1j * jax.random.uniform(ks[4], (1, N_echo, 1, MB, Ny, Nx),
                                jnp.float32, -jnp.pi, jnp.pi)).astype(jnp.complex64)
    phase_slice = jnp.exp(
        1j * jax.random.uniform(ks[5], (1, 1, 1, MB, Ny, Nx),
                                jnp.float32, -jnp.pi, jnp.pi)).astype(jnp.complex64)

    # weights = (rss(y, dim=DIM_COIL, keepdim=True) > 0).type(y.dtype)  [__init__]
    rss = jnp.sqrt(jnp.sum(jnp.abs(y_data) ** 2, axis=-4, keepdims=True))
    weights = (rss > 0).astype(jnp.complex64)

    # model input, shape == ishape == [x_time, 1, 1, MB, Ny, Nx]
    x = crandn(ks[6], (x_time, 1, 1, MB, Ny, Nx))

    y_out = sense_forward(x, coils, basis, phase_echo, phase_slice, weights)
    y_out = jax.block_until_ready(y_out)

    assert y_out.shape == y_data.shape, (y_out.shape, y_data.shape)

    y_ref = sense_forward_ref(x, coils, basis, phase_echo, phase_slice, weights)
    np.testing.assert_allclose(np.asarray(y_out), np.asarray(y_ref),
                               rtol=1e-3, atol=1e-3)
    print("KERNEL_OK")
</pallas_src>

<mosaic_0001>
module attributes {stable_mosaic.version = 11 : i64} {
  func.func @_sense_kernel(%arg0: i32, %arg1: memref<8x4xf32, #tpu.memory_space<smem>>, %arg2: memref<2x4x256xf32, #tpu.memory_space<vmem>>, %arg3: memref<2x4x256xf32, #tpu.memory_space<vmem>>, %arg4: memref<2x2x256xf32, #tpu.memory_space<vmem>>, %arg5: memref<2x2x256xf32, #tpu.memory_space<vmem>>, %arg6: memref<2x4x256xf32, #tpu.memory_space<vmem>>, %arg7: memref<2x4x256xf32, #tpu.memory_space<vmem>>, %arg8: memref<2x256xf32, #tpu.memory_space<vmem>>, %arg9: memref<2x256xf32, #tpu.memory_space<vmem>>, %arg10: memref<4x2x256xf32, #tpu.memory_space<vmem>>, %arg11: memref<256x256xf32, #tpu.memory_space<vmem>>, %arg12: memref<256x256xf32, #tpu.memory_space<vmem>>, %arg13: memref<32x256xf32, #tpu.memory_space<vmem>>, %arg14: memref<32x256xf32, #tpu.memory_space<vmem>>, %arg15: memref<128x256xf32, #tpu.memory_space<vmem>>) attributes {dimension_semantics = [#tpu.dimension_semantics<parallel>], iteration_bounds = array<i64: 2>, scalar_prefetch = 0 : i64, scratch_operands = 1 : i64, tpu.core_type = #tpu.core_type<tc>, window_params = [{transform_indices = @transform_0, window_bounds = array<i64: 8, 4>}, {pipeline_mode = #tpu.pipeline_mode<synchronous>, transform_indices = @transform_1, window_bounds = array<i64: 2, 4, 256>}, {pipeline_mode = #tpu.pipeline_mode<synchronous>, transform_indices = @transform_2, window_bounds = array<i64: 2, 4, 256>}, {pipeline_mode = #tpu.pipeline_mode<synchronous>, transform_indices = @transform_3, window_bounds = array<i64: 2, 2, 256>}, {pipeline_mode = #tpu.pipeline_mode<synchronous>, transform_indices = @transform_4, window_bounds = array<i64: 2, 2, 256>}, {pipeline_mode = #tpu.pipeline_mode<synchronous>, transform_indices = @transform_5, window_bounds = array<i64: 2, 4, 256>}, {pipeline_mode = #tpu.pipeline_mode<synchronous>, transform_indices = @transform_6, window_bounds = array<i64: 2, 4, 256>}, {pipeline_mode = #tpu.pipeline_mode<synchronous>, transform_indices = @transform_7, window_bounds = array<i64: 2, 256>}, {pipeline_mode = #tpu.pipeline_mode<synchronous>, transform_indices = @transform_8, window_bounds = array<i64: 2, 256>}, {transform_indices = @transform_9, window_bounds = array<i64: 4, 2, 256>}, {pipeline_mode = #tpu.pipeline_mode<synchronous>, transform_indices = @transform_10, window_bounds = array<i64: 256, 256>}, {pipeline_mode = #tpu.pipeline_mode<synchronous>, transform_indices = @transform_11, window_bounds = array<i64: 256, 256>}, {transform_indices = @transform_12, window_bounds = array<i64: 32, 256>}, {transform_indices = @transform_13, window_bounds = array<i64: 32, 256>}]} {
    %c4_i32 = arith.constant 4 : i32
    %0 = arith.muli %arg0, %c4_i32 : i32
    %c0 = arith.constant 0 : index
    %c0_0 = arith.constant 0 : index
    %c0_1 = arith.constant 0 : index
    %1 = vector.load %arg2[%c0, %c0_0, %c0_1] : memref<2x4x256xf32, #tpu.memory_space<vmem>>, vector<1x4x256xf32>
    %2 = vector.shape_cast %1 : vector<1x4x256xf32> to vector<4x256xf32>
    %c0_2 = arith.constant 0 : index
    %c0_3 = arith.constant 0 : index
    %c0_4 = arith.constant 0 : index
    %3 = vector.load %arg3[%c0_2, %c0_3, %c0_4] : memref<2x4x256xf32, #tpu.memory_space<vmem>>, vector<1x4x256xf32>
    %4 = vector.shape_cast %3 : vector<1x4x256xf32> to vector<4x256xf32>
    %c0_5 = arith.constant 0 : index
    %c0_6 = arith.constant 0 : index
    %c0_7 = arith.constant 0 : index
    %5 = vector.load %arg4[%c0_5, %c0_6, %c0_7] : memref<2x2x256xf32, #tpu.memory_space<vmem>>, vector<1x2x256xf32>
    %6 = vector.shape_cast %5 : vector<1x2x256xf32> to vector<2x256xf32>
    %c0_8 = arith.constant 0 : index
    %c0_9 = arith.constant 0 : index
    %c0_10 = arith.constant 0 : index
    %7 = vector.load %arg5[%c0_8, %c0_9, %c0_10] : memref<2x2x256xf32, #tpu.memory_space<vmem>>, vector<1x2x256xf32>
    %8 = vector.shape_cast %7 : vector<1x2x256xf32> to vector<2x256xf32>
    %c0_11 = arith.constant 0 : index
    %c0_12 = arith.constant 0 : index
    %c0_13 = arith.constant 0 : index
    %9 = vector.load %arg6[%c0_11, %c0_12, %c0_13] : memref<2x4x256xf32, #tpu.memory_space<vmem>>, vector<1x4x256xf32>
    %10 = vector.shape_cast %9 : vector<1x4x256xf32> to vector<4x256xf32>
    %c0_14 = arith.constant 0 : index
    %c0_15 = arith.constant 0 : index
    %c0_16 = arith.constant 0 : index
    %11 = vector.load %arg7[%c0_14, %c0_15, %c0_16] : memref<2x4x256xf32, #tpu.memory_space<vmem>>, vector<1x4x256xf32>
    %12 = vector.shape_cast %11 : vector<1x4x256xf32> to vector<4x256xf32>
    %c0_i32 = arith.constant 0 : i32
    %13 = arith.addi %0, %c0_i32 : i32
    %14 = arith.index_cast %13 : i32 to index
    %c0_17 = arith.constant 0 : index
    %15 = memref.load %arg1[%14, %c0_17] : memref<8x4xf32, #tpu.memory_space<smem>>
    %16 = vector.extract_strided_slice %2 {offsets = [0, 0], sizes = [1, 256], strides = [1, 1]} : vector<4x256xf32> to vector<1x256xf32>
    %17 = vector.shape_cast %16 : vector<1x256xf32> to vector<256xf32>
    %18 = vector.broadcast %15 : f32 to vector<256xf32>
    %19 = arith.mulf %18, %17 : vector<256xf32>
    %20 = vector.extract_strided_slice %4 {offsets = [0, 0], sizes = [1, 256], strides = [1, 1]} : vector<4x256xf32> to vector<1x256xf32>
    %21 = vector.shape_cast %20 : vector<1x256xf32> to vector<256xf32>
    %22 = vector.broadcast %15 : f32 to vector<256xf32>
    %23 = arith.mulf %22, %21 : vector<256xf32>
    %c0_i32_18 = arith.constant 0 : i32
    %24 = arith.addi %0, %c0_i32_18 : i32
    %25 = arith.index_cast %24 : i32 to index
    %c1 = arith.constant 1 : index
    %26 = memref.load %arg1[%25, %c1] : memref<8x4xf32, #tpu.memory_space<smem>>
    %27 = vector.extract_strided_slice %2 {offsets = [1, 0], sizes = [1, 256], strides = [1, 1]} : vector<4x256xf32> to vector<1x256xf32>
    %28 = vector.shape_cast %27 : vector<1x256xf32> to vector<256xf32>
    %29 = vector.broadcast %26 : f32 to vector<256xf32>
    %30 = arith.mulf %29, %28 : vector<256xf32>
    %31 = arith.addf %19, %30 : vector<256xf32>
    %32 = vector.extract_strided_slice %4 {offsets = [1, 0], sizes = [1, 256], strides = [1, 1]} : vector<4x256xf32> to vector<1x256xf32>
    %33 = vector.shape_cast %32 : vector<1x256xf32> to vector<256xf32>
    %34 = vector.broadcast %26 : f32 to vector<256xf32>
    %35 = arith.mulf %34, %33 : vector<256xf32>
    %36 = arith.addf %23, %35 : vector<256xf32>
    %c0_i32_19 = arith.constant 0 : i32
    %37 = arith.addi %0, %c0_i32_19 : i32
    %38 = arith.index_cast %37 : i32 to index
    %c2 = arith.constant 2 : index
    %39 = memref.load %arg1[%38, %c2] : memref<8x4xf32, #tpu.memory_space<smem>>
    %40 = vector.extract_strided_slice %2 {offsets = [2, 0], sizes = [1, 256], strides = [1, 1]} : vector<4x256xf32> to vector<1x256xf32>
    %41 = vector.shape_cast %40 : vector<1x256xf32> to vector<256xf32>
    %42 = vector.broadcast %39 : f32 to vector<256xf32>
    %43 = arith.mulf %42, %41 : vector<256xf32>
    %44 = arith.addf %31, %43 : vector<256xf32>
    %45 = vector.extract_strided_slice %4 {offsets = [2, 0], sizes = [1, 256], strides = [1, 1]} : vector<4x256xf32> to vector<1x256xf32>
    %46 = vector.shape_cast %45 : vector<1x256xf32> to vector<256xf32>
    %47 = vector.broadcast %39 : f32 to vector<256xf32>
    %48 = arith.mulf %47, %46 : vector<256xf32>
    %49 = arith.addf %36, %48 : vector<256xf32>
    %c0_i32_20 = arith.constant 0 : i32
    %50 = arith.addi %0, %c0_i32_20 : i32
    %51 = arith.index_cast %50 : i32 to index
    %c3 = arith.constant 3 : index
    %52 = memref.load %arg1[%51, %c3] : memref<8x4xf32, #tpu.memory_space<smem>>
    %53 = vector.extract_strided_slice %2 {offsets = [3, 0], sizes = [1, 256], strides = [1, 1]} : vector<4x256xf32> to vector<1x256xf32>
    %54 = vector.shape_cast %53 : vector<1x256xf32> to vector<256xf32>
    %55 = vector.broadcast %52 : f32 to vector<256xf32>
    %56 = arith.mulf %55, %54 : vector<256xf32>
    %57 = arith.addf %44, %56 : vector<256xf32>
    %58 = vector.extract_strided_slice %4 {offsets = [3, 0], sizes = [1, 256], strides = [1, 1]} : vector<4x256xf32> to vector<1x256xf32>
    %59 = vector.shape_cast %58 : vector<1x256xf32> to vector<256xf32>
    %60 = vector.broadcast %52 : f32 to vector<256xf32>
    %61 = arith.mulf %60, %59 : vector<256xf32>
    %62 = arith.addf %49, %61 : vector<256xf32>
    %63 = vector.extract_strided_slice %6 {offsets = [0, 0], sizes = [1, 256], strides = [1, 1]} : vector<2x256xf32> to vector<1x256xf32>
    %64 = vector.shape_cast %63 : vector<1x256xf32> to vector<256xf32>
    %65 = arith.mulf %64, %57 : vector<256xf32>
    %66 = vector.extract_strided_slice %8 {offsets = [0, 0], sizes = [1, 256], strides = [1, 1]} : vector<2x256xf32> to vector<1x256xf32>
    %67 = vector.shape_cast %66 : vector<1x256xf32> to vector<256xf32>
    %68 = arith.mulf %67, %62 : vector<256xf32>
    %69 = arith.subf %65, %68 : vector<256xf32>
    %70 = vector.extract_strided_slice %6 {offsets = [0, 0], sizes = [1, 256], strides = [1, 1]} : vector<2x256xf32> to vector<1x256xf32>
    %71 = vector.shape_cast %70 : vector<1x256xf32> to vector<256xf32>
    %72 = arith.mulf %71, %62 : vector<256xf32>
    %73 = vector.extract_strided_slice %8 {offsets = [0, 0], sizes = [1, 256], strides = [1, 1]} : vector<2x256xf32> to vector<1x256xf32>
    %74 = vector.shape_cast %73 : vector<1x256xf32> to vector<256xf32>
    %75 = arith.mulf %74, %57 : vector<256xf32>
    %76 = arith.addf %72, %75 : vector<256xf32>
    %77 = vector.shape_cast %69 : vector<256xf32> to vector<1x256xf32>
    %78 = vector.broadcast %77 : vector<1x256xf32> to vector<4x256xf32>
    %79 = arith.mulf %10, %78 : vector<4x256xf32>
    %80 = vector.shape_cast %76 : vector<256xf32> to vector<1x256xf32>
    %81 = vector.broadcast %80 : vector<1x256xf32> to vector<4x256xf32>
    %82 = arith.mulf %12, %81 : vector<4x256xf32>
    %83 = arith.subf %79, %82 : vector<4x256xf32>
    %c0_21 = arith.constant 0 : index
    %c0_22 = arith.constant 0 : index
    %84 = vector.load %arg15[%c0_21, %c0_22] : memref<128x256xf32, #tpu.memory_space<vmem>>, vector<4x256xf32>
    tpu.vector_store %arg15[%c0_21, %c0_22], %83 {strides = array<i32>} : memref<128x256xf32, #tpu.memory_space<vmem>>, vector<4x256xf32>,
    %85 = vector.shape_cast %76 : vector<256xf32> to vector<1x256xf32>
    %86 = vector.broadcast %85 : vector<1x256xf32> to vector<4x256xf32>
    %87 = arith.mulf %10, %86 : vector<4x256xf32>
    %88 = vector.shape_cast %69 : vector<256xf32> to vector<1x256xf32>
    %89 = vector.broadcast %88 : vector<1x256xf32> to vector<4x256xf32>
    %90 = arith.mulf %12, %89 : vector<4x256xf32>
    %91 = arith.addf %87, %90 : vector<4x256xf32>
    %c64 = arith.constant 64 : index
    %c0_23 = arith.constant 0 : index
    %92 = vector.load %arg15[%c64, %c0_23] : memref<128x256xf32, #tpu.memory_space<vmem>>, vector<4x256xf32>
    tpu.vector_store %arg15[%c64, %c0_23], %91 {strides = array<i32>} : memref<128x256xf32, #tpu.memory_space<vmem>>, vector<4x256xf32>,
    %93 = vector.extract_strided_slice %6 {offsets = [1, 0], sizes = [1, 256], strides = [1, 1]} : vector<2x256xf32> to vector<1x256xf32>
    %94 = vector.shape_cast %93 : vector<1x256xf32> to vector<256xf32>
    %95 = arith.mulf %94, %57 : vector<256xf32>
    %96 = vector.extract_strided_slice %8 {offsets = [1, 0], sizes = [1, 256], strides = [1, 1]} : vector<2x256xf32> to vector<1x256xf32>
    %97 = vector.shape_cast %96 : vector<1x256xf32> to vector<256xf32>
    %98 = arith.mulf %97, %62 : vector<256xf32>
    %99 = arith.subf %95, %98 : vector<256xf32>
    %100 = vector.extract_strided_slice %6 {offsets = [1, 0], sizes = [1, 256], strides = [1, 1]} : vector<2x256xf32> to vector<1x256xf32>
    %101 = vector.shape_cast %100 : vector<1x256xf32> to vector<256xf32>
    %102 = arith.mulf %101, %62 : vector<256xf32>
    %103 = vector.extract_strided_slice %8 {offsets = [1, 0], sizes = [1, 256], strides = [1, 1]} : vector<2x256xf32> to vector<1x256xf32>
    %104 = vector.shape_cast %103 : vector<1x256xf32> to vector<256xf32>
    %105 = arith.mulf %104, %57 : vector<256xf32>
    %106 = arith.addf %102, %105 : vector<256xf32>
    %107 = vector.shape_cast %99 : vector<256xf32> to vector<1x256xf32>
    %108 = vector.broadcast %107 : vector<1x256xf32> to vector<4x256xf32>
    %109 = arith.mulf %10, %108 : vector<4x256xf32>
    %110 = vector.shape_cast %106 : vector<256xf32> to vector<1x256xf32>
    %111 = vector.broadcast %110 : vector<1x256xf32> to vector<4x256xf32>
    %112 = arith.mulf %12, %111 : vector<4x256xf32>
    %113 = arith.subf %109, %112 : vector<4x256xf32>
    %c4 = arith.constant 4 : index
    %c0_24 = arith.constant 0 : index
    %114 = vector.load %arg15[%c4, %c0_24] : memref<128x256xf32, #tpu.memory_space<vmem>>, vector<4x256xf32>
    tpu.vector_store %arg15[%c4, %c0_24], %113 {strides = array<i32>} : memref<128x256xf32, #tpu.memory_space<vmem>>, vector<4x256xf32>,
    %115 = vector.shape_cast %106 : vector<256xf32> to vector<1x256xf32>
    %116 = vector.broadcast %115 : vector<1x256xf32> to vector<4x256xf32>
    %117 = arith.mulf %10, %116 : vector<4x256xf32>
    %118 = vector.shape_cast %99 : vector<256xf32> to vector<1x256xf32>
    %119 = vector.broadcast %118 : vector<1x256xf32> to vector<4x256xf32>
    %120 = arith.mulf %12, %119 : vector<4x256xf32>
    %121 = arith.addf %117, %120 : vector<4x256xf32>
    %c68 = arith.constant 68 : index
    %c0_25 = arith.constant 0 : index
    %122 = vector.load %arg15[%c68, %c0_25] : memref<128x256xf32, #tpu.memory_space<vmem>>, vector<4x256xf32>
    tpu.vector_store %arg15[%c68, %c0_25], %121 {strides = array<i32>} : memref<128x256xf32, #tpu.memory_space<vmem>>, vector<4x256xf32>,
    %c1_i32 = arith.constant 1 : i32
    %123 = arith.addi %0, %c1_i32 : i32
    %124 = arith.index_cast %123 : i32 to index
    %c0_26 = arith.constant 0 : index
    %125 = memref.load %arg1[%124, %c0_26] : memref<8x4xf32, #tpu.memory_space<smem>>
    %126 = vector.extract_strided_slice %2 {offsets = [0, 0], sizes = [1, 256], strides = [1, 1]} : vector<4x256xf32> to vector<1x256xf32>
    %127 = vector.shape_cast %126 : vector<1x256xf32> to vector<256xf32>
    %128 = vector.broadcast %125 : f32 to vector<256xf32>
    %129 = arith.mulf %128, %127 : vector<256xf32>
    %130 = vector.extract_strided_slice %4 {offsets = [0, 0], sizes = [1, 256], strides = [1, 1]} : vector<4x256xf32> to vector<1x256xf32>
    %131 = vector.shape_cast %130 : vector<1x256xf32> to vector<256xf32>
    %132 = vector.broadcast %125 : f32 to vector<256xf32>
    %133 = arith.mulf %132, %131 : vector<256xf32>
    %c1_i32_27 = arith.constant 1 : i32
    %134 = arith.addi %0, %c1_i32_27 : i32
    %135 = arith.index_cast %134 : i32 to index
    %c1_28 = arith.constant 1 : index
    %136 = memref.load %arg1[%135, %c1_28] : memref<8x4xf32, #tpu.memory_space<smem>>
    %137 = vector.extract_strided_slice %2 {offsets = [1, 0], sizes = [1, 256], strides = [1, 1]} : vector<4x256xf32> to vector<1x256xf32>
    %138 = vector.shape_cast %137 : vector<1x256xf32> to vector<256xf32>
    %139 = vector.broadcast %136 : f32 to vector<256xf32>
    %140 = arith.mulf %139, %138 : vector<256xf32>
    %141 = arith.addf %129, %140 : vector<256xf32>
    %142 = vector.extract_strided_slice %4 {offsets = [1, 0], sizes = [1, 256], strides = [1, 1]} : vector<4x256xf32> to vector<1x256xf32>
    %143 = vector.shape_cast %142 : vector<1x256xf32> to vector<256xf32>
    %144 = vector.broadcast %136 : f32 to vector<256xf32>
    %145 = arith.mulf %144, %143 : vector<256xf32>
    %146 = arith.addf %133, %145 : vector<256xf32>
    %c1_i32_29 = arith.constant 1 : i32
    %147 = arith.addi %0, %c1_i32_29 : i32
    %148 = arith.index_cast %147 : i32 to index
    %c2_30 = arith.constant 2 : index
    %149 = memref.load %arg1[%148, %c2_30] : memref<8x4xf32, #tpu.memory_space<smem>>
    %150 = vector.extract_strided_slice %2 {offsets = [2, 0], sizes = [1, 256], strides = [1, 1]} : vector<4x256xf32> to vector<1x256xf32>
    %151 = vector.shape_cast %150 : vector<1x256xf32> to vector<256xf32>
    %152 = vector.broadcast %149 : f32 to vector<256xf32>
    %153 = arith.mulf %152, %151 : vector<256xf32>
    %154 = arith.addf %141, %153 : vector<256xf32>
    %155 = vector.extract_strided_slice %4 {offsets = [2, 0], sizes = [1, 256], strides = [1, 1]} : vector<4x256xf32> to vector<1x256xf32>
    %156 = vector.shape_cast %155 : vector<1x256xf32> to vector<256xf32>
    %157 = vector.broadcast %149 : f32 to vector<256xf32>
    %158 = arith.mulf %157, %156 : vector<256xf32>
    %159 = arith.addf %146, %158 : vector<256xf32>
    %c1_i32_31 = arith.constant 1 : i32
    %160 = arith.addi %0, %c1_i32_31 : i32
    %161 = arith.index_cast %160 : i32 to index
    %c3_32 = arith.constant 3 : index
    %162 = memref.load %arg1[%161, %c3_32] : memref<8x4xf32, #tpu.memory_space<smem>>
    %163 = vector.extract_strided_slice %2 {offsets = [3, 0], sizes = [1, 256], strides = [1, 1]} : vector<4x256xf32> to vector<1x256xf32>
    %164 = vector.shape_cast %163 : vector<1x256xf32> to vector<256xf32>
    %165 = vector.broadcast %162 : f32 to vector<256xf32>
    %166 = arith.mulf %165, %164 : vector<256xf32>
    %167 = arith.addf %154, %166 : vector<256xf32>
    %168 = vector.extract_strided_slice %4 {offsets = [3, 0], sizes = [1, 256], strides = [1, 1]} : vector<4x256xf32> to vector<1x256xf32>
    %169 = vector.shape_cast %168 : vector<1x256xf32> to vector<256xf32>
    %170 = vector.broadcast %162 : f32 to vector<256xf32>
    %171 = arith.mulf %170, %169 : vector<256xf32>
    %172 = arith.addf %159, %171 : vector<256xf32>
    %173 = vector.extract_strided_slice %6 {offsets = [0, 0], sizes = [1, 256], strides = [1, 1]} : vector<2x256xf32> to vector<1x256xf32>
    %174 = vector.shape_cast %173 : vector<1x256xf32> to vector<256xf32>
    %175 = arith.mulf %174, %167 : vector<256xf32>
    %176 = vector.extract_strided_slice %8 {offsets = [0, 0], sizes = [1, 256], strides = [1, 1]} : vector<2x256xf32> to vector<1x256xf32>
    %177 = vector.shape_cast %176 : vector<1x256xf32> to vector<256xf32>
    %178 = arith.mulf %177, %172 : vector<256xf32>
    %179 = arith.subf %175, %178 : vector<256xf32>
    %180 = vector.extract_strided_slice %6 {offsets = [0, 0], sizes = [1, 256], strides = [1, 1]} : vector<2x256xf32> to vector<1x256xf32>
    %181 = vector.shape_cast %180 : vector<1x256xf32> to vector<256xf32>
    %182 = arith.mulf %181, %172 : vector<256xf32>
    %183 = vector.extract_strided_slice %8 {offsets = [0, 0], sizes = [1, 256], strides = [1, 1]} : vector<2x256xf32> to vector<1x256xf32>
    %184 = vector.shape_cast %183 : vector<1x256xf32> to vector<256xf32>
    %185 = arith.mulf %184, %167 : vector<256xf32>
    %186 = arith.addf %182, %185 : vector<256xf32>
    %187 = vector.shape_cast %179 : vector<256xf32> to vector<1x256xf32>
    %188 = vector.broadcast %187 : vector<1x256xf32> to vector<4x256xf32>
    %189 = arith.mulf %10, %188 : vector<4x256xf32>
    %190 = vector.shape_cast %186 : vector<256xf32> to vector<1x256xf32>
    %191 = vector.broadcast %190 : vector<1x256xf32> to vector<4x256xf32>
    %192 = arith.mulf %12, %191 : vector<4x256xf32>
    %193 = arith.subf %189, %192 : vector<4x256xf32>
    %c8 = arith.constant 8 : index
    %c0_33 = arith.constant 0 : index
    %194 = vector.load %arg15[%c8, %c0_33] : memref<128x256xf32, #tpu.memory_space<vmem>>, vector<4x256xf32>
    tpu.vector_store %arg15[%c8, %c0_33], %193 {strides = array<i32>} : memref<128x256xf32, #tpu.memory_space<vmem>>, vector<4x256xf32>,
    %195 = vector.shape_cast %186 : vector<256xf32> to vector<1x256xf32>
    %196 = vector.broadcast %195 : vector<1x256xf32> to vector<4x256xf32>
    %197 = arith.mulf %10, %196 : vector<4x256xf32>
    %198 = vector.shape_cast %179 : vector<256xf32> to vector<1x256xf32>
    %199 = vector.broadcast %198 : vector<1x256xf32> to vector<4x256xf32>
    %200 = arith.mulf %12, %199 : vector<4x256xf32>
    %201 = arith.addf %197, %200 : vector<4x256xf32>
    %c72 = arith.constant 72 : index
    %c0_34 = arith.constant 0 : index
    %202 = vector.load %arg15[%c72, %c0_34] : memref<128x256xf32, #tpu.memory_space<vmem>>, vector<4x256xf32>
    tpu.vector_store %arg15[%c72, %c0_34], %201 {strides = array<i32>} : memref<128x256xf32, #tpu.memory_space<vmem>>, vector<4x256xf32>,
    %203 = vector.extract_strided_slice %6 {offsets = [1, 0], sizes = [1, 256], strides = [1, 1]} : vector<2x256xf32> to vector<1x256xf32>
    %204 = vector.shape_cast %203 : vector<1x256xf32> to vector<256xf32>
    %205 = arith.mulf %204, %167 : vector<256xf32>
    %206 = vector.extract_strided_slice %8 {offsets = [1, 0], sizes = [1, 256], strides = [1, 1]} : vector<2x256xf32> to vector<1x256xf32>
    %207 = vector.shape_cast %206 : vector<1x256xf32> to vector<256xf32>
    %208 = arith.mulf %207, %172 : vector<256xf32>
    %209 = arith.subf %205, %208 : vector<256xf32>
    %210 = vector.extract_strided_slice %6 {offsets = [1, 0], sizes = [1, 256], strides = [1, 1]} : vector<2x256xf32> to vector<1x256xf32>
    %211 = vector.shape_cast %210 : vector<1x256xf32> to vector<256xf32>
    %212 = arith.mulf %211, %172 : vector<256xf32>
    %213 = vector.extract_strided_slice %8 {offsets = [1, 0], sizes = [1, 256], strides = [1, 1]} : vector<2x256xf32> to vector<1x256xf32>
    %214 = vector.shape_cast %213 : vector<1x256xf32> to vector<256xf32>
    %215 = arith.mulf %214, %167 : vector<256xf32>
    %216 = arith.addf %212, %215 : vector<256xf32>
    %217 = vector.shape_cast %209 : vector<256xf32> to vector<1x256xf32>
    %218 = vector.broadcast %217 : vector<1x256xf32> to vector<4x256xf32>
    %219 = arith.mulf %10, %218 : vector<4x256xf32>
    %220 = vector.shape_cast %216 : vector<256xf32> to vector<1x256xf32>
    %221 = vector.broadcast %220 : vector<1x256xf32> to vector<4x256xf32>
    %222 = arith.mulf %12, %221 : vector<4x256xf32>
    %223 = arith.subf %219, %222 : vector<4x256xf32>
    %c12 = arith.constant 12 : index
    %c0_35 = arith.constant 0 : index
    %224 = vector.load %arg15[%c12, %c0_35] : memref<128x256xf32, #tpu.memory_space<vmem>>, vector<4x256xf32>
    tpu.vector_store %arg15[%c12, %c0_35], %223 {strides = array<i32>} : memref<128x256xf32, #tpu.memory_space<vmem>>, vector<4x256xf32>,
    %225 = vector.shape_cast %216 : vector<256xf32> to vector<1x256xf32>
    %226 = vector.broadcast %225 : vector<1x256xf32> to vector<4x256xf32>
    %227 = arith.mulf %10, %226 : vector<4x256xf32>
    %228 = vector.shape_cast %209 : vector<256xf32> to vector<1x256xf32>
    %229 = vector.broadcast %228 : vector<1x256xf32> to vector<4x256xf32>
    %230 = arith.mulf %12, %229 : vector<4x256xf32>
    %231 = arith.addf %227, %230 : vector<4x256xf32>
    %c76 = arith.constant 76 : index
    %c0_36 = arith.constant 0 : index
    %232 = vector.load %arg15[%c76, %c0_36] : memref<128x256xf32, #tpu.memory_space<vmem>>, vector<4x256xf32>
    tpu.vector_store %arg15[%c76, %c0_36], %231 {strides = array<i32>} : memref<128x256xf32, #tpu.memory_space<vmem>>, vector<4x256xf32>,
    %c2_i32 = arith.constant 2 : i32
    %233 = arith.addi %0, %c2_i32 : i32
    %234 = arith.index_cast %233 : i32 to index
    %c0_37 = arith.constant 0 : index
    %235 = memref.load %arg1[%234, %c0_37] : memref<8x4xf32, #tpu.memory_space<smem>>
    %236 = vector.extract_strided_slice %2 {offsets = [0, 0], sizes = [1, 256], strides = [1, 1]} : vector<4x256xf32> to vector<1x256xf32>
    %237 = vector.shape_cast %236 : vector<1x256xf32> to vector<256xf32>
    %238 = vector.broadcast %235 : f32 to vector<256xf32>
    %239 = arith.mulf %238, %237 : vector<256xf32>
    %240 = vector.extract_strided_slice %4 {offsets = [0, 0], sizes = [1, 256], strides = [1, 1]} : vector<4x256xf32> to vector<1x256xf32>
    %241 = vector.shape_cast %240 : vector<1x256xf32> to vector<256xf32>
    %242 = vector.broadcast %235 : f32 to vector<256xf32>
    %243 = arith.mulf %242, %241 : vector<256xf32>
    %c2_i32_38 = arith.constant 2 : i32
    %244 = arith.addi %0, %c2_i32_38 : i32
    %245 = arith.index_cast %244 : i32 to index
    %c1_39 = arith.constant 1 : index
    %246 = memref.load %arg1[%245, %c1_39] : memref<8x4xf32, #tpu.memory_space<smem>>
    %247 = vector.extract_strided_slice %2 {offsets = [1, 0], sizes = [1, 256], strides = [1, 1]} : vector<4x256xf32> to vector<1x256xf32>
    %248 = vector.shape_cast %247 : vector<1x256xf32> to vector<256xf32>
    %249 = vector.broadcast %246 : f32 to vector<256xf32>
    %250 = arith.mulf %249, %248 : vector<256xf32>
    %251 = arith.addf %239, %250 : vector<256xf32>
    %252 = vector.extract_strided_slice %4 {offsets = [1, 0], sizes = [1, 256], strides = [1, 1]} : vector<4x256xf32> to vector<1x256xf32>
    %253 = vector.shape_cast %252 : vector<1x256xf32> to vector<256xf32>
    %254 = vector.broadcast %246 : f32 to vector<256xf32>
    %255 = arith.mulf %254, %253 : vector<256xf32>
    %256 = arith.addf %243, %255 : vector<256xf32>
    %c2_i32_40 = arith.constant 2 : i32
    %257 = arith.addi %0, %c2_i32_40 : i32
    %258 = arith.index_cast %257 : i32 to index
    %c2_41 = arith.constant 2 : index
    %259 = memref.load %arg1[%258, %c2_41] : memref<8x4xf32, #tpu.memory_space<smem>>
    %260 = vector.extract_strided_slice %2 {offsets = [2, 0], sizes = [1, 256], strides = [1, 1]} : vector<4x256xf32> to vector<1x256xf32>
    %261 = vector.shape_cast %260 : vector<1x256xf32> to vector<256xf32>
    %262 = vector.broadcast %259 : f32 to vector<256xf32>
    %263 = arith.mulf %262, %261 : vector<256xf32>
    %264 = arith.addf %251, %263 : vector<256xf32>
    %265 = vector.extract_strided_slice %4 {offsets = [2, 0], sizes = [1, 256], strides = [1, 1]} : vector<4x256xf32> to vector<1x256xf32>
    %266 = vector.shape_cast %265 : vector<1x256xf32> to vector<256xf32>
    %267 = vector.broadcast %259 : f32 to vector<256xf32>
    %268 = arith.mulf %267, %266 : vector<256xf32>
    %269 = arith.addf %256, %268 : vector<256xf32>
    %c2_i32_42 = arith.constant 2 : i32
    %270 = arith.addi %0, %c2_i32_42 : i32
    %271 = arith.index_cast %270 : i32 to index
    %c3_43 = arith.constant 3 : index
    %272 = memref.load %arg1[%271, %c3_43] : memref<8x4xf32, #tpu.memory_space<smem>>
    %273 = vector.extract_strided_slice %2 {offsets = [3, 0], sizes = [1, 256], strides = [1, 1]} : vector<4x256xf32> to vector<1x256xf32>
    %274 = vector.shape_cast %273 : vector<1x256xf32> to vector<256xf32>
    %275 = vector.broadcast %272 : f32 to vector<256xf32>
    %276 = arith.mulf %275, %274 : vector<256xf32>
    %277 = arith.addf %264, %276 : vector<256xf32>
    %278 = vector.extract_strided_slice %4 {offsets = [3, 0], sizes = [1, 256], strides = [1, 1]} : vector<4x256xf32> to vector<1x256xf32>
    %279 = vector.shape_cast %278 : vector<1x256xf32> to vector<256xf32>
    %280 = vector.broadcast %272 : f32 to vector<256xf32>
    %281 = arith.mulf %280, %279 : vector<256xf32>
    %282 = arith.addf %269, %281 : vector<256xf32>
    %283 = vector.extract_strided_slice %6 {offsets = [0, 0], sizes = [1, 256], strides = [1, 1]} : vector<2x256xf32> to vector<1x256xf32>
    %284 = vector.shape_cast %283 : vector<1x256xf32> to vector<256xf32>
    %285 = arith.mulf %284, %277 : vector<256xf32>
    %286 = vector.extract_strided_slice %8 {offsets = [0, 0], sizes = [1, 256], strides = [1, 1]} : vector<2x256xf32> to vector<1x256xf32>
    %287 = vector.shape_cast %286 : vector<1x256xf32> to vector<256xf32>
    %288 = arith.mulf %287, %282 : vector<256xf32>
    %289 = arith.subf %285, %288 : vector<256xf32>
    %290 = vector.extract_strided_slice %6 {offsets = [0, 0], sizes = [1, 256], strides = [1, 1]} : vector<2x256xf32> to vector<1x256xf32>
    %291 = vector.shape_cast %290 : vector<1x256xf32> to vector<256xf32>
    %292 = arith.mulf %291, %282 : vector<256xf32>
    %293 = vector.extract_strided_slice %8 {offsets = [0, 0], sizes = [1, 256], strides = [1, 1]} : vector<2x256xf32> to vector<1x256xf32>
    %294 = vector.shape_cast %293 : vector<1x256xf32> to vector<256xf32>
    %295 = arith.mulf %294, %277 : vector<256xf32>
    %296 = arith.addf %292, %295 : vector<256xf32>
    %297 = vector.shape_cast %289 : vector<256xf32> to vector<1x256xf32>
    %298 = vector.broadcast %297 : vector<1x256xf32> to vector<4x256xf32>
    %299 = arith.mulf %10, %298 : vector<4x256xf32>
    %300 = vector.shape_cast %296 : vector<256xf32> to vector<1x256xf32>
    %301 = vector.broadcast %300 : vector<1x256xf32> to vector<4x256xf32>
    %302 = arith.mulf %12, %301 : vector<4x256xf32>
    %303 = arith.subf %299, %302 : vector<4x256xf32>
    %c16 = arith.constant 16 : index
    %c0_44 = arith.constant 0 : index
    %304 = vector.load %arg15[%c16, %c0_44] : memref<128x256xf32, #tpu.memory_space<vmem>>, vector<4x256xf32>
    tpu.vector_store %arg15[%c16, %c0_44], %303 {strides = array<i32>} : memref<128x256xf32, #tpu.memory_space<vmem>>, vector<4x256xf32>,
    %305 = vector.shape_cast %296 : vector<256xf32> to vector<1x256xf32>
    %306 = vector.broadcast %305 : vector<1x256xf32> to vector<4x256xf32>
    %307 = arith.mulf %10, %306 : vector<4x256xf32>
    %308 = vector.shape_cast %289 : vector<256xf32> to vector<1x256xf32>
    %309 = vector.broadcast %308 : vector<1x256xf32> to vector<4x256xf32>
    %310 = arith.mulf %12, %309 : vector<4x256xf32>
    %311 = arith.addf %307, %310 : vector<4x256xf32>
    %c80 = arith.constant 80 : index
    %c0_45 = arith.constant 0 : index
    %312 = vector.load %arg15[%c80, %c0_45] : memref<128x256xf32, #tpu.memory_space<vmem>>, vector<4x256xf32>
    tpu.vector_store %arg15[%c80, %c0_45], %311 {strides = array<i32>} : memref<128x256xf32, #tpu.memory_space<vmem>>, vector<4x256xf32>,
    %313 = vector.extract_strided_slice %6 {offsets = [1, 0], sizes = [1, 256], strides = [1, 1]} : vector<2x256xf32> to vector<1x256xf32>
    %314 = vector.shape_cast %313 : vector<1x256xf32> to vector<256xf32>
    %315 = arith.mulf %314, %277 : vector<256xf32>
    %316 = vector.extract_strided_slice %8 {offsets = [1, 0], sizes = [1, 256], strides = [1, 1]} : vector<2x256xf32> to vector<1x256xf32>
    %317 = vector.shape_cast %316 : vector<1x256xf32> to vector<256xf32>
    %318 = arith.mulf %317, %282 : vector<256xf32>
    %319 = arith.subf %315, %318 : vector<256xf32>
    %320 = vector.extract_strided_slice %6 {offsets = [1, 0], sizes = [1, 256], strides = [1, 1]} : vector<2x256xf32> to vector<1x256xf32>
    %321 = vector.shape_cast %320 : vector<1x256xf32> to vector<256xf32>
    %322 = arith.mulf %321, %282 : vector<256xf32>
    %323 = vector.extract_strided_slice %8 {offsets = [1, 0], sizes = [1, 256], strides = [1, 1]} : vector<2x256xf32> to vector<1x256xf32>
    %324 = vector.shape_cast %323 : vector<1x256xf32> to vector<256xf32>
    %325 = arith.mulf %324, %277 : vector<256xf32>
    %326 = arith.addf %322, %325 : vector<256xf32>
    %327 = vector.shape_cast %319 : vector<256xf32> to vector<1x256xf32>
    %328 = vector.broadcast %327 : vector<1x256xf32> to vector<4x256xf32>
    %329 = arith.mulf %10, %328 : vector<4x256xf32>
    %330 = vector.shape_cast %326 : vector<256xf32> to vector<1x256xf32>
    %331 = vector.broadcast %330 : vector<1x256xf32> to vector<4x256xf32>
    %332 = arith.mulf %12, %331 : vector<4x256xf32>
    %333 = arith.subf %329, %332 : vector<4x256xf32>
    %c20 = arith.constant 20 : index
    %c0_46 = arith.constant 0 : index
    %334 = vector.load %arg15[%c20, %c0_46] : memref<128x256xf32, #tpu.memory_space<vmem>>, vector<4x256xf32>
    tpu.vector_store %arg15[%c20, %c0_46], %333 {strides = array<i32>} : memref<128x256xf32, #tpu.memory_space<vmem>>, vector<4x256xf32>,
    %335 = vector.shape_cast %326 : vector<256xf32> to vector<1x256xf32>
    %336 = vector.broadcast %335 : vector<1x256xf32> to vector<4x256xf32>
    %337 = arith.mulf %10, %336 : vector<4x256xf32>
    %338 = vector.shape_cast %319 : vector<256xf32> to vector<1x256xf32>
    %339 = vector.broadcast %338 : vector<1x256xf32> to vector<4x256xf32>
    %340 = arith.mulf %12, %339 : vector<4x256xf32>
    %341 = arith.addf %337, %340 : vector<4x256xf32>
    %c84 = arith.constant 84 : index
    %c0_47 = arith.constant 0 : index
    %342 = vector.load %arg15[%c84, %c0_47] : memref<128x256xf32, #tpu.memory_space<vmem>>, vector<4x256xf32>
    tpu.vector_store %arg15[%c84, %c0_47], %341 {strides = array<i32>} : memref<128x256xf32, #tpu.memory_space<vmem>>, vector<4x256xf32>,
    %c3_i32 = arith.constant 3 : i32
    %343 = arith.addi %0, %c3_i32 : i32
    %344 = arith.index_cast %343 : i32 to index
    %c0_48 = arith.constant 0 : index
    %345 = memref.load %arg1[%344, %c0_48] : memref<8x4xf32, #tpu.memory_space<smem>>
    %346 = vector.extract_strided_slice %2 {offsets = [0, 0], sizes = [1, 256], strides = [1, 1]} : vector<4x256xf32> to vector<1x256xf32>
    %347 = vector.shape_cast %346 : vector<1x256xf32> to vector<256xf32>
    %348 = vector.broadcast %345 : f32 to vector<256xf32>
    %349 = arith.mulf %348, %347 : vector<256xf32>
    %350 = vector.extract_strided_slice %4 {offsets = [0, 0], sizes = [1, 256], strides = [1, 1]} : vector<4x256xf32> to vector<1x256xf32>
    %351 = vector.shape_cast %350 : vector<1x256xf32> to vector<256xf32>
    %352 = vector.broadcast %345 : f32 to vector<256xf32>
    %353 = arith.mulf %352, %351 : vector<256xf32>
    %c3_i32_49 = arith.constant 3 : i32
    %354 = arith.addi %0, %c3_i32_49 : i32
    %355 = arith.index_cast %354 : i32 to index
    %c1_50 = arith.constant 1 : index
    %356 = memref.load %arg1[%355, %c1_50] : memref<8x4xf32, #tpu.memory_space<smem>>
    %357 = vector.extract_strided_slice %2 {offsets = [1, 0], sizes = [1, 256], strides = [1, 1]} : vector<4x256xf32> to vector<1x256xf32>
    %358 = vector.shape_cast %357 : vector<1x256xf32> to vector<256xf32>
    %359 = vector.broadcast %356 : f32 to vector<256xf32>
    %360 = arith.mulf %359, %358 : vector<256xf32>
    %361 = arith.addf %349, %360 : vector<256xf32>
    %362 = vector.extract_strided_slice %4 {offsets = [1, 0], sizes = [1, 256], strides = [1, 1]} : vector<4x256xf32> to vector<1x256xf32>
    %363 = vector.shape_cast %362 : vector<1x256xf32> to vector<256xf32>
    %364 = vector.broadcast %356 : f32 to vector<256xf32>
    %365 = arith.mulf %364, %363 : vector<256xf32>
    %366 = arith.addf %353, %365 : vector<256xf32>
    %c3_i32_51 = arith.constant 3 : i32
    %367 = arith.addi %0, %c3_i32_51 : i32
    %368 = arith.index_cast %367 : i32 to index
    %c2_52 = arith.constant 2 : index
    %369 = memref.load %arg1[%368, %c2_52] : memref<8x4xf32, #tpu.memory_space<smem>>
    %370 = vector.extract_strided_slice %2 {offsets = [2, 0], sizes = [1, 256], strides = [1, 1]} : vector<4x256xf32> to vector<1x256xf32>
    %371 = vector.shape_cast %370 : vector<1x256xf32> to vector<256xf32>
    %372 = vector.broadcast %369 : f32 to vector<256xf32>
    %373 = arith.mulf %372, %371 : vector<256xf32>
    %374 = arith.addf %361, %373 : vector<256xf32>
    %375 = vector.extract_strided_slice %4 {offsets = [2, 0], sizes = [1, 256], strides = [1, 1]} : vector<4x256xf32> to vector<1x256xf32>
    %376 = vector.shape_cast %375 : vector<1x256xf32> to vector<256xf32>
    %377 = vector.broadcast %369 : f32 to vector<256xf32>
    %378 = arith.mulf %377, %376 : vector<256xf32>
    %379 = arith.addf %366, %378 : vector<256xf32>
    %c3_i32_53 = arith.constant 3 : i32
    %380 = arith.addi %0, %c3_i32_53 : i32
    %381 = arith.index_cast %380 : i32 to index
    %c3_54 = arith.constant 3 : index
    %382 = memref.load %arg1[%381, %c3_54] : memref<8x4xf32, #tpu.memory_space<smem>>
    %383 = vector.extract_strided_slice %2 {offsets = [3, 0], sizes = [1, 256], strides = [1, 1]} : vector<4x256xf32> to vector<1x256xf32>
    %384 = vector.shape_cast %383 : vector<1x256xf32> to vector<256xf32>
    %385 = vector.broadcast %382 : f32 to vector<256xf32>
    %386 = arith.mulf %385, %384 : vector<256xf32>
    %387 = arith.addf %374, %386 : vector<256xf32>
    %388 = vector.extract_strided_slice %4 {offsets = [3, 0], sizes = [1, 256], strides = [1, 1]} : vector<4x256xf32> to vector<1x256xf32>
    %389 = vector.shape_cast %388 : vector<1x256xf32> to vector<256xf32>
    %390 = vector.broadcast %382 : f32 to vector<256xf32>
    %391 = arith.mulf %390, %389 : vector<256xf32>
    %392 = arith.addf %379, %391 : vector<256xf32>
    %393 = vector.extract_strided_slice %6 {offsets = [0, 0], sizes = [1, 256], strides = [1, 1]} : vector<2x256xf32> to vector<1x256xf32>
    %394 = vector.shape_cast %393 : vector<1x256xf32> to vector<256xf32>
    %395 = arith.mulf %394, %387 : vector<256xf32>
    %396 = vector.extract_strided_slice %8 {offsets = [0, 0], sizes = [1, 256], strides = [1, 1]} : vector<2x256xf32> to vector<1x256xf32>
    %397 = vector.shape_cast %396 : vector<1x256xf32> to vector<256xf32>
    %398 = arith.mulf %397, %392 : vector<256xf32>
    %399 = arith.subf %395, %398 : vector<256xf32>
    %400 = vector.extract_strided_slice %6 {offsets = [0, 0], sizes = [1, 256], strides = [1, 1]} : vector<2x256xf32> to vector<1x256xf32>
    %401 = vector.shape_cast %400 : vector<1x256xf32> to vector<256xf32>
    %402 = arith.mulf %401, %392 : vector<256xf32>
    %403 = vector.extract_strided_slice %8 {offsets = [0, 0], sizes = [1, 256], strides = [1, 1]} : vector<2x256xf32> to vector<1x256xf32>
    %404 = vector.shape_cast %403 : vector<1x256xf32> to vector<256xf32>
    %405 = arith.mulf %404, %387 : vector<256xf32>
    %406 = arith.addf %402, %405 : vector<256xf32>
    %407 = vector.shape_cast %399 : vector<256xf32> to vector<1x256xf32>
    %408 = vector.broadcast %407 : vector<1x256xf32> to vector<4x256xf32>
    %409 = arith.mulf %10, %408 : vector<4x256xf32>
    %410 = vector.shape_cast %406 : vector<256xf32> to vector<1x256xf32>
    %411 = vector.broadcast %410 : vector<1x256xf32> to vector<4x256xf32>
    %412 = arith.mulf %12, %411 : vector<4x256xf32>
    %413 = arith.subf %409, %412 : vector<4x256xf32>
    %c24 = arith.constant 24 : index
    %c0_55 = arith.constant 0 : index
    %414 = vector.load %arg15[%c24, %c0_55] : memref<128x256xf32, #tpu.memory_space<vmem>>, vector<4x256xf32>
    tpu.vector_store %arg15[%c24, %c0_55], %413 {strides = array<i32>} : memref<128x256xf32, #tpu.memory_space<vmem>>, vector<4x256xf32>,
    %415 = vector.shape_cast %406 : vector<256xf32> to vector<1x256xf32>
    %416 = vector.broadcast %415 : vector<1x256xf32> to vector<4x256xf32>
    %417 = arith.mulf %10, %416 : vector<4x256xf32>
    %418 = vector.shape_cast %399 : vector<256xf32> to vector<1x256xf32>
    %419 = vector.broadcast %418 : vector<1x256xf32> to vector<4x256xf32>
    %420 = arith.mulf %12, %419 : vector<4x256xf32>
    %421 = arith.addf %417, %420 : vector<4x256xf32>
    %c88 = arith.constant 88 : index
    %c0_56 = arith.constant 0 : index
    %422 = vector.load %arg15[%c88, %c0_56] : memref<128x256xf32, #tpu.memory_space<vmem>>, vector<4x256xf32>
    tpu.vector_store %arg15[%c88, %c0_56], %421 {strides = array<i32>} : memref<128x256xf32, #tpu.memory_space<vmem>>, vector<4x256xf32>,
    %423 = vector.extract_strided_slice %6 {offsets = [1, 0], sizes = [1, 256], strides = [1, 1]} : vector<2x256xf32> to vector<1x256xf32>
    %424 = vector.shape_cast %423 : vector<1x256xf32> to vector<256xf32>
    %425 = arith.mulf %424, %387 : vector<256xf32>
    %426 = vector.extract_strided_slice %8 {offsets = [1, 0], sizes = [1, 256], strides = [1, 1]} : vector<2x256xf32> to vector<1x256xf32>
    %427 = vector.shape_cast %426 : vector<1x256xf32> to vector<256xf32>
    %428 = arith.mulf %427, %392 : vector<256xf32>
    %429 = arith.subf %425, %428 : vector<256xf32>
    %430 = vector.extract_strided_slice %6 {offsets = [1, 0], sizes = [1, 256], strides = [1, 1]} : vector<2x256xf32> to vector<1x256xf32>
    %431 = vector.shape_cast %430 : vector<1x256xf32> to vector<256xf32>
    %432 = arith.mulf %431, %392 : vector<256xf32>
    %433 = vector.extract_strided_slice %8 {offsets = [1, 0], sizes = [1, 256], strides = [1, 1]} : vector<2x256xf32> to vector<1x256xf32>
    %434 = vector.shape_cast %433 : vector<1x256xf32> to vector<256xf32>
    %435 = arith.mulf %434, %387 : vector<256xf32>
    %436 = arith.addf %432, %435 : vector<256xf32>
    %437 = vector.shape_cast %429 : vector<256xf32> to vector<1x256xf32>
    %438 = vector.broadcast %437 : vector<1x256xf32> to vector<4x256xf32>
    %439 = arith.mulf %10, %438 : vector<4x256xf32>
    %440 = vector.shape_cast %436 : vector<256xf32> to vector<1x256xf32>
    %441 = vector.broadcast %440 : vector<1x256xf32> to vector<4x256xf32>
    %442 = arith.mulf %12, %441 : vector<4x256xf32>
    %443 = arith.subf %439, %442 : vector<4x256xf32>
    %c28 = arith.constant 28 : index
    %c0_57 = arith.constant 0 : index
    %444 = vector.load %arg15[%c28, %c0_57] : memref<128x256xf32, #tpu.memory_space<vmem>>, vector<4x256xf32>
    tpu.vector_store %arg15[%c28, %c0_57], %443 {strides = array<i32>} : memref<128x256xf32, #tpu.memory_space<vmem>>, vector<4x256xf32>,
    %445 = vector.shape_cast %436 : vector<256xf32> to vector<1x256xf32>
    %446 = vector.broadcast %445 : vector<1x256xf32> to vector<4x256xf32>
    %447 = arith.mulf %10, %446 : vector<4x256xf32>
    %448 = vector.shape_cast %429 : vector<256xf32> to vector<1x256xf32>
    %449 = vector.broadcast %448 : vector<1x256xf32> to vector<4x256xf32>
    %450 = arith.mulf %12, %449 : vector<4x256xf32>
    %451 = arith.addf %447, %450 : vector<4x256xf32>
    %c92 = arith.constant 92 : index
    %c0_58 = arith.constant 0 : index
    %452 = vector.load %arg15[%c92, %c0_58] : memref<128x256xf32, #tpu.memory_space<vmem>>, vector<4x256xf32>
    tpu.vector_store %arg15[%c92, %c0_58], %451 {strides = array<i32>} : memref<128x256xf32, #tpu.memory_space<vmem>>, vector<4x256xf32>,
    %c1_59 = arith.constant 1 : index
    %c0_60 = arith.constant 0 : index
    %c0_61 = arith.constant 0 : index
    %453 = vector.load %arg2[%c1_59, %c0_60, %c0_61] : memref<2x4x256xf32, #tpu.memory_space<vmem>>, vector<1x4x256xf32>
    %454 = vector.shape_cast %453 : vector<1x4x256xf32> to vector<4x256xf32>
    %c1_62 = arith.constant 1 : index
    %c0_63 = arith.constant 0 : index
    %c0_64 = arith.constant 0 : index
    %455 = vector.load %arg3[%c1_62, %c0_63, %c0_64] : memref<2x4x256xf32, #tpu.memory_space<vmem>>, vector<1x4x256xf32>
    %456 = vector.shape_cast %455 : vector<1x4x256xf32> to vector<4x256xf32>
    %c1_65 = arith.constant 1 : index
    %c0_66 = arith.constant 0 : index
    %c0_67 = arith.constant 0 : index
    %457 = vector.load %arg4[%c1_65, %c0_66, %c0_67] : memref<2x2x256xf32, #tpu.memory_space<vmem>>, vector<1x2x256xf32>
    %458 = vector.shape_cast %457 : vector<1x2x256xf32> to vector<2x256xf32>
    %c1_68 = arith.constant 1 : index
    %c0_69 = arith.constant 0 : index
    %c0_70 = arith.constant 0 : index
    %459 = vector.load %arg5[%c1_68, %c0_69, %c0_70] : memref<2x2x256xf32, #tpu.memory_space<vmem>>, vector<1x2x256xf32>
    %460 = vector.shape_cast %459 : vector<1x2x256xf32> to vector<2x256xf32>
    %c1_71 = arith.constant 1 : index
    %c0_72 = arith.constant 0 : index
    %c0_73 = arith.constant 0 : index
    %461 = vector.load %arg6[%c1_71, %c0_72, %c0_73] : memref<2x4x256xf32, #tpu.memory_space<vmem>>, vector<1x4x256xf32>
    %462 = vector.shape_cast %461 : vector<1x4x256xf32> to vector<4x256xf32>
    %c1_74 = arith.constant 1 : index
    %c0_75 = arith.constant 0 : index
    %c0_76 = arith.constant 0 : index
    %463 = vector.load %arg7[%c1_74, %c0_75, %c0_76] : memref<2x4x256xf32, #tpu.memory_space<vmem>>, vector<1x4x256xf32>
    %464 = vector.shape_cast %463 : vector<1x4x256xf32> to vector<4x256xf32>
    %c0_i32_77 = arith.constant 0 : i32
    %465 = arith.addi %0, %c0_i32_77 : i32
    %466 = arith.index_cast %465 : i32 to index
    %c0_78 = arith.constant 0 : index
    %467 = memref.load %arg1[%466, %c0_78] : memref<8x4xf32, #tpu.memory_space<smem>>
    %468 = vector.extract_strided_slice %454 {offsets = [0, 0], sizes = [1, 256], strides = [1, 1]} : vector<4x256xf32> to vector<1x256xf32>
    %469 = vector.shape_cast %468 : vector<1x256xf32> to vector<256xf32>
    %470 = vector.broadcast %467 : f32 to vector<256xf32>
    %471 = arith.mulf %470, %469 : vector<256xf32>
    %472 = vector.extract_strided_slice %456 {offsets = [0, 0], sizes = [1, 256], strides = [1, 1]} : vector<4x256xf32> to vector<1x256xf32>
    %473 = vector.shape_cast %472 : vector<1x256xf32> to vector<256xf32>
    %474 = vector.broadcast %467 : f32 to vector<256xf32>
    %475 = arith.mulf %474, %473 : vector<256xf32>
    %c0_i32_79 = arith.constant 0 : i32
    %476 = arith.addi %0, %c0_i32_79 : i32
    %477 = arith.index_cast %476 : i32 to index
    %c1_80 = arith.constant 1 : index
    %478 = memref.load %arg1[%477, %c1_80] : memref<8x4xf32, #tpu.memory_space<smem>>
    %479 = vector.extract_strided_slice %454 {offsets = [1, 0], sizes = [1, 256], strides = [1, 1]} : vector<4x256xf32> to vector<1x256xf32>
    %480 = vector.shape_cast %479 : vector<1x256xf32> to vector<256xf32>
    %481 = vector.broadcast %478 : f32 to vector<256xf32>
    %482 = arith.mulf %481, %480 : vector<256xf32>
    %483 = arith.addf %471, %482 : vector<256xf32>
    %484 = vector.extract_strided_slice %456 {offsets = [1, 0], sizes = [1, 256], strides = [1, 1]} : vector<4x256xf32> to vector<1x256xf32>
    %485 = vector.shape_cast %484 : vector<1x256xf32> to vector<256xf32>
    %486 = vector.broadcast %478 : f32 to vector<256xf32>
    %487 = arith.mulf %486, %485 : vector<256xf32>
    %488 = arith.addf %475, %487 : vector<256xf32>
    %c0_i32_81 = arith.constant 0 : i32
    %489 = arith.addi %0, %c0_i32_81 : i32
    %490 = arith.index_cast %489 : i32 to index
    %c2_82 = arith.constant 2 : index
    %491 = memref.load %arg1[%490, %c2_82] : memref<8x4xf32, #tpu.memory_space<smem>>
    %492 = vector.extract_strided_slice %454 {offsets = [2, 0], sizes = [1, 256], strides = [1, 1]} : vector<4x256xf32> to vector<1x256xf32>
    %493 = vector.shape_cast %492 : vector<1x256xf32> to vector<256xf32>
    %494 = vector.broadcast %491 : f32 to vector<256xf32>
    %495 = arith.mulf %494, %493 : vector<256xf32>
    %496 = arith.addf %483, %495 : vector<256xf32>
    %497 = vector.extract_strided_slice %456 {offsets = [2, 0], sizes = [1, 256], strides = [1, 1]} : vector<4x256xf32> to vector<1x256xf32>
    %498 = vector.shape_cast %497 : vector<1x256xf32> to vector<256xf32>
    %499 = vector.broadcast %491 : f32 to vector<256xf32>
    %500 = arith.mulf %499, %498 : vector<256xf32>
    %501 = arith.addf %488, %500 : vector<256xf32>
    %c0_i32_83 = arith.constant 0 : i32
    %502 = arith.addi %0, %c0_i32_83 : i32
    %503 = arith.index_cast %502 : i32 to index
    %c3_84 = arith.constant 3 : index
    %504 = memref.load %arg1[%503, %c3_84] : memref<8x4xf32, #tpu.memory_space<smem>>
    %505 = vector.extract_strided_slice %454 {offsets = [3, 0], sizes = [1, 256], strides = [1, 1]} : vector<4x256xf32> to vector<1x256xf32>
    %506 = vector.shape_cast %505 : vector<1x256xf32> to vector<256xf32>
    %507 = vector.broadcast %504 : f32 to vector<256xf32>
    %508 = arith.mulf %507, %506 : vector<256xf32>
    %509 = arith.addf %496, %508 : vector<256xf32>
    %510 = vector.extract_strided_slice %456 {offsets = [3, 0], sizes = [1, 256], strides = [1, 1]} : vector<4x256xf32> to vector<1x256xf32>
    %511 = vector.shape_cast %510 : vector<1x256xf32> to vector<256xf32>
    %512 = vector.broadcast %504 : f32 to vector<256xf32>
    %513 = arith.mulf %512, %511 : vector<256xf32>
    %514 = arith.addf %501, %513 : vector<256xf32>
    %515 = vector.extract_strided_slice %458 {offsets = [0, 0], sizes = [1, 256], strides = [1, 1]} : vector<2x256xf32> to vector<1x256xf32>
    %516 = vector.shape_cast %515 : vector<1x256xf32> to vector<256xf32>
    %517 = arith.mulf %516, %509 : vector<256xf32>
    %518 = vector.extract_strided_slice %460 {offsets = [0, 0], sizes = [1, 256], strides = [1, 1]} : vector<2x256xf32> to vector<1x256xf32>
    %519 = vector.shape_cast %518 : vector<1x256xf32> to vector<256xf32>
    %520 = arith.mulf %519, %514 : vector<256xf32>
    %521 = arith.subf %517, %520 : vector<256xf32>
    %522 = vector.extract_strided_slice %458 {offsets = [0, 0], sizes = [1, 256], strides = [1, 1]} : vector<2x256xf32> to vector<1x256xf32>
    %523 = vector.shape_cast %522 : vector<1x256xf32> to vector<256xf32>
    %524 = arith.mulf %523, %514 : vector<256xf32>
    %525 = vector.extract_strided_slice %460 {offsets = [0, 0], sizes = [1, 256], strides = [1, 1]} : vector<2x256xf32> to vector<1x256xf32>
    %526 = vector.shape_cast %525 : vector<1x256xf32> to vector<256xf32>
    %527 = arith.mulf %526, %509 : vector<256xf32>
    %528 = arith.addf %524, %527 : vector<256xf32>
    %529 = vector.shape_cast %521 : vector<256xf32> to vector<1x256xf32>
    %530 = vector.broadcast %529 : vector<1x256xf32> to vector<4x256xf32>
    %531 = arith.mulf %462, %530 : vector<4x256xf32>
    %532 = vector.shape_cast %528 : vector<256xf32> to vector<1x256xf32>
    %533 = vector.broadcast %532 : vector<1x256xf32> to vector<4x256xf32>
    %534 = arith.mulf %464, %533 : vector<4x256xf32>
    %535 = arith.subf %531, %534 : vector<4x256xf32>
    %c32 = arith.constant 32 : index
    %c0_85 = arith.constant 0 : index
    %536 = vector.load %arg15[%c32, %c0_85] : memref<128x256xf32, #tpu.memory_space<vmem>>, vector<4x256xf32>
    tpu.vector_store %arg15[%c32, %c0_85], %535 {strides = array<i32>} : memref<128x256xf32, #tpu.memory_space<vmem>>, vector<4x256xf32>,
    %537 = vector.shape_cast %528 : vector<256xf32> to vector<1x256xf32>
    %538 = vector.broadcast %537 : vector<1x256xf32> to vector<4x256xf32>
    %539 = arith.mulf %462, %538 : vector<4x256xf32>
    %540 = vector.shape_cast %521 : vector<256xf32> to vector<1x256xf32>
    %541 = vector.broadcast %540 : vector<1x256xf32> to vector<4x256xf32>
    %542 = arith.mulf %464, %541 : vector<4x256xf32>
    %543 = arith.addf %539, %542 : vector<4x256xf32>
    %c96 = arith.constant 96 : index
    %c0_86 = arith.constant 0 : index
    %544 = vector.load %arg15[%c96, %c0_86] : memref<128x256xf32, #tpu.memory_space<vmem>>, vector<4x256xf32>
    tpu.vector_store %arg15[%c96, %c0_86], %543 {strides = array<i32>} : memref<128x256xf32, #tpu.memory_space<vmem>>, vector<4x256xf32>,
    %545 = vector.extract_strided_slice %458 {offsets = [1, 0], sizes = [1, 256], strides = [1, 1]} : vector<2x256xf32> to vector<1x256xf32>
    %546 = vector.shape_cast %545 : vector<1x256xf32> to vector<256xf32>
    %547 = arith.mulf %546, %509 : vector<256xf32>
    %548 = vector.extract_strided_slice %460 {offsets = [1, 0], sizes = [1, 256], strides = [1, 1]} : vector<2x256xf32> to vector<1x256xf32>
    %549 = vector.shape_cast %548 : vector<1x256xf32> to vector<256xf32>
    %550 = arith.mulf %549, %514 : vector<256xf32>
    %551 = arith.subf %547, %550 : vector<256xf32>
    %552 = vector.extract_strided_slice %458 {offsets = [1, 0], sizes = [1, 256], strides = [1, 1]} : vector<2x256xf32> to vector<1x256xf32>
    %553 = vector.shape_cast %552 : vector<1x256xf32> to vector<256xf32>
    %554 = arith.mulf %553, %514 : vector<256xf32>
    %555 = vector.extract_strided_slice %460 {offsets = [1, 0], sizes = [1, 256], strides = [1, 1]} : vector<2x256xf32> to vector<1x256xf32>
    %556 = vector.shape_cast %555 : vector<1x256xf32> to vector<256xf32>
    %557 = arith.mulf %556, %509 : vector<256xf32>
    %558 = arith.addf %554, %557 : vector<256xf32>
    %559 = vector.shape_cast %551 : vector<256xf32> to vector<1x256xf32>
    %560 = vector.broadcast %559 : vector<1x256xf32> to vector<4x256xf32>
    %561 = arith.mulf %462, %560 : vector<4x256xf32>
    %562 = vector.shape_cast %558 : vector<256xf32> to vector<1x256xf32>
    %563 = vector.broadcast %562 : vector<1x256xf32> to vector<4x256xf32>
    %564 = arith.mulf %464, %563 : vector<4x256xf32>
    %565 = arith.subf %561, %564 : vector<4x256xf32>
    %c36 = arith.constant 36 : index
    %c0_87 = arith.constant 0 : index
    %566 = vector.load %arg15[%c36, %c0_87] : memref<128x256xf32, #tpu.memory_space<vmem>>, vector<4x256xf32>
    tpu.vector_store %arg15[%c36, %c0_87], %565 {strides = array<i32>} : memref<128x256xf32, #tpu.memory_space<vmem>>, vector<4x256xf32>,
    %567 = vector.shape_cast %558 : vector<256xf32> to vector<1x256xf32>
    %568 = vector.broadcast %567 : vector<1x256xf32> to vector<4x256xf32>
    %569 = arith.mulf %462, %568 : vector<4x256xf32>
    %570 = vector.shape_cast %551 : vector<256xf32> to vector<1x256xf32>
    %571 = vector.broadcast %570 : vector<1x256xf32> to vector<4x256xf32>
    %572 = arith.mulf %464, %571 : vector<4x256xf32>
    %573 = arith.addf %569, %572 : vector<4x256xf32>
    %c100 = arith.constant 100 : index
    %c0_88 = arith.constant 0 : index
    %574 = vector.load %arg15[%c100, %c0_88] : memref<128x256xf32, #tpu.memory_space<vmem>>, vector<4x256xf32>
    tpu.vector_store %arg15[%c100, %c0_88], %573 {strides = array<i32>} : memref<128x256xf32, #tpu.memory_space<vmem>>, vector<4x256xf32>,
    %c1_i32_89 = arith.constant 1 : i32
    %575 = arith.addi %0, %c1_i32_89 : i32
    %576 = arith.index_cast %575 : i32 to index
    %c0_90 = arith.constant 0 : index
    %577 = memref.load %arg1[%576, %c0_90] : memref<8x4xf32, #tpu.memory_space<smem>>
    %578 = vector.extract_strided_slice %454 {offsets = [0, 0], sizes = [1, 256], strides = [1, 1]} : vector<4x256xf32> to vector<1x256xf32>
    %579 = vector.shape_cast %578 : vector<1x256xf32> to vector<256xf32>
    %580 = vector.broadcast %577 : f32 to vector<256xf32>
    %581 = arith.mulf %580, %579 : vector<256xf32>
    %582 = vector.extract_strided_slice %456 {offsets = [0, 0], sizes = [1, 256], strides = [1, 1]} : vector<4x256xf32> to vector<1x256xf32>
    %583 = vector.shape_cast %582 : vector<1x256xf32> to vector<256xf32>
    %584 = vector.broadcast %577 : f32 to vector<256xf32>
    %585 = arith.mulf %584, %583 : vector<256xf32>
    %c1_i32_91 = arith.constant 1 : i32
    %586 = arith.addi %0, %c1_i32_91 : i32
    %587 = arith.index_cast %586 : i32 to index
    %c1_92 = arith.constant 1 : index
    %588 = memref.load %arg1[%587, %c1_92] : memref<8x4xf32, #tpu.memory_space<smem>>
    %589 = vector.extract_strided_slice %454 {offsets = [1, 0], sizes = [1, 256], strides = [1, 1]} : vector<4x256xf32> to vector<1x256xf32>
    %590 = vector.shape_cast %589 : vector<1x256xf32> to vector<256xf32>
    %591 = vector.broadcast %588 : f32 to vector<256xf32>
    %592 = arith.mulf %591, %590 : vector<256xf32>
    %593 = arith.addf %581, %592 : vector<256xf32>
    %594 = vector.extract_strided_slice %456 {offsets = [1, 0], sizes = [1, 256], strides = [1, 1]} : vector<4x256xf32> to vector<1x256xf32>
    %595 = vector.shape_cast %594 : vector<1x256xf32> to vector<256xf32>
    %596 = vector.broadcast %588 : f32 to vector<256xf32>
    %597 = arith.mulf %596, %595 : vector<256xf32>
    %598 = arith.addf %585, %597 : vector<256xf32>
    %c1_i32_93 = arith.constant 1 : i32
    %599 = arith.addi %0, %c1_i32_93 : i32
    %600 = arith.index_cast %599 : i32 to index
    %c2_94 = arith.constant 2 : index
    %601 = memref.load %arg1[%600, %c2_94] : memref<8x4xf32, #tpu.memory_space<smem>>
    %602 = vector.extract_strided_slice %454 {offsets = [2, 0], sizes = [1, 256], strides = [1, 1]} : vector<4x256xf32> to vector<1x256xf32>
    %603 = vector.shape_cast %602 : vector<1x256xf32> to vector<256xf32>
    %604 = vector.broadcast %601 : f32 to vector<256xf32>
    %605 = arith.mulf %604, %603 : vector<256xf32>
    %606 = arith.addf %593, %605 : vector<256xf32>
    %607 = vector.extract_strided_slice %456 {offsets = [2, 0], sizes = [1, 256], strides = [1, 1]} : vector<4x256xf32> to vector<1x256xf32>
    %608 = vector.shape_cast %607 : vector<1x256xf32> to vector<256xf32>
    %609 = vector.broadcast %601 : f32 to vector<256xf32>
    %610 = arith.mulf %609, %608 : vector<256xf32>
    %611 = arith.addf %598, %610 : vector<256xf32>
    %c1_i32_95 = arith.constant 1 : i32
    %612 = arith.addi %0, %c1_i32_95 : i32
    %613 = arith.index_cast %612 : i32 to index
    %c3_96 = arith.constant 3 : index
    %614 = memref.load %arg1[%613, %c3_96] : memref<8x4xf32, #tpu.memory_space<smem>>
    %615 = vector.extract_strided_slice %454 {offsets = [3, 0], sizes = [1, 256], strides = [1, 1]} : vector<4x256xf32> to vector<1x256xf32>
    %616 = vector.shape_cast %615 : vector<1x256xf32> to vector<256xf32>
    %617 = vector.broadcast %614 : f32 to vector<256xf32>
    %618 = arith.mulf %617, %616 : vector<256xf32>
    %619 = arith.addf %606, %618 : vector<256xf32>
    %620 = vector.extract_strided_slice %456 {offsets = [3, 0], sizes = [1, 256], strides = [1, 1]} : vector<4x256xf32> to vector<1x256xf32>
    %621 = vector.shape_cast %620 : vector<1x256xf32> to vector<256xf32>
    %622 = vector.broadcast %614 : f32 to vector<256xf32>
    %623 = arith.mulf %622, %621 : vector<256xf32>
    %624 = arith.addf %611, %623 : vector<256xf32>
    %625 = vector.extract_strided_slice %458 {offsets = [0, 0], sizes = [1, 256], strides = [1, 1]} : vector<2x256xf32> to vector<1x256xf32>
    %626 = vector.shape_cast %625 : vector<1x256xf32> to vector<256xf32>
    %627 = arith.mulf %626, %619 : vector<256xf32>
    %628 = vector.extract_strided_slice %460 {offsets = [0, 0], sizes = [1, 256], strides = [1, 1]} : vector<2x256xf32> to vector<1x256xf32>
    %629 = vector.shape_cast %628 : vector<1x256xf32> to vector<256xf32>
    %630 = arith.mulf %629, %624 : vector<256xf32>
    %631 = arith.subf %627, %630 : vector<256xf32>
    %632 = vector.extract_strided_slice %458 {offsets = [0, 0], sizes = [1, 256], strides = [1, 1]} : vector<2x256xf32> to vector<1x256xf32>
    %633 = vector.shape_cast %632 : vector<1x256xf32> to vector<256xf32>
    %634 = arith.mulf %633, %624 : vector<256xf32>
    %635 = vector.extract_strided_slice %460 {offsets = [0, 0], sizes = [1, 256], strides = [1, 1]} : vector<2x256xf32> to vector<1x256xf32>
    %636 = vector.shape_cast %635 : vector<1x256xf32> to vector<256xf32>
    %637 = arith.mulf %636, %619 : vector<256xf32>
    %638 = arith.addf %634, %637 : vector<256xf32>
    %639 = vector.shape_cast %631 : vector<256xf32> to vector<1x256xf32>
    %640 = vector.broadcast %639 : vector<1x256xf32> to vector<4x256xf32>
    %641 = arith.mulf %462, %640 : vector<4x256xf32>
    %642 = vector.shape_cast %638 : vector<256xf32> to vector<1x256xf32>
    %643 = vector.broadcast %642 : vector<1x256xf32> to vector<4x256xf32>
    %644 = arith.mulf %464, %643 : vector<4x256xf32>
    %645 = arith.subf %641, %644 : vector<4x256xf32>
    %c40 = arith.constant 40 : index
    %c0_97 = arith.constant 0 : index
    %646 = vector.load %arg15[%c40, %c0_97] : memref<128x256xf32, #tpu.memory_space<vmem>>, vector<4x256xf32>
    tpu.vector_store %arg15[%c40, %c0_97], %645 {strides = array<i32>} : memref<128x256xf32, #tpu.memory_space<vmem>>, vector<4x256xf32>,
    %647 = vector.shape_cast %638 : vector<256xf32> to vector<1x256xf32>
    %648 = vector.broadcast %647 : vector<1x256xf32> to vector<4x256xf32>
    %649 = arith.mulf %462, %648 : vector<4x256xf32>
    %650 = vector.shape_cast %631 : vector<256xf32> to vector<1x256xf32>
    %651 = vector.broadcast %650 : vector<1x256xf32> to vector<4x256xf32>
    %652 = arith.mulf %464, %651 : vector<4x256xf32>
    %653 = arith.addf %649, %652 : vector<4x256xf32>
    %c104 = arith.constant 104 : index
    %c0_98 = arith.constant 0 : index
    %654 = vector.load %arg15[%c104, %c0_98] : memref<128x256xf32, #tpu.memory_space<vmem>>, vector<4x256xf32>
    tpu.vector_store %arg15[%c104, %c0_98], %653 {strides = array<i32>} : memref<128x256xf32, #tpu.memory_space<vmem>>, vector<4x256xf32>,
    %655 = vector.extract_strided_slice %458 {offsets = [1, 0], sizes = [1, 256], strides = [1, 1]} : vector<2x256xf32> to vector<1x256xf32>
    %656 = vector.shape_cast %655 : vector<1x256xf32> to vector<256xf32>
    %657 = arith.mulf %656, %619 : vector<256xf32>
    %658 = vector.extract_strided_slice %460 {offsets = [1, 0], sizes = [1, 256], strides = [1, 1]} : vector<2x256xf32> to vector<1x256xf32>
    %659 = vector.shape_cast %658 : vector<1x256xf32> to vector<256xf32>
    %660 = arith.mulf %659, %624 : vector<256xf32>
    %661 = arith.subf %657, %660 : vector<256xf32>
    %662 = vector.extract_strided_slice %458 {offsets = [1, 0], sizes = [1, 256], strides = [1, 1]} : vector<2x256xf32> to vector<1x256xf32>
    %663 = vector.shape_cast %662 : vector<1x256xf32> to vector<256xf32>
    %664 = arith.mulf %663, %624 : vector<256xf32>
    %665 = vector.extract_strided_slice %460 {offsets = [1, 0], sizes = [1, 256], strides = [1, 1]} : vector<2x256xf32> to vector<1x256xf32>
    %666 = vector.shape_cast %665 : vector<1x256xf32> to vector<256xf32>
    %667 = arith.mulf %666, %619 : vector<256xf32>
    %668 = arith.addf %664, %667 : vector<256xf32>
    %669 = vector.shape_cast %661 : vector<256xf32> to vector<1x256xf32>
    %670 = vector.broadcast %669 : vector<1x256xf32> to vector<4x256xf32>
    %671 = arith.mulf %462, %670 : vector<4x256xf32>
    %672 = vector.shape_cast %668 : vector<256xf32> to vector<1x256xf32>
    %673 = vector.broadcast %672 : vector<1x256xf32> to vector<4x256xf32>
    %674 = arith.mulf %464, %673 : vector<4x256xf32>
    %675 = arith.subf %671, %674 : vector<4x256xf32>
    %c44 = arith.constant 44 : index
    %c0_99 = arith.constant 0 : index
    %676 = vector.load %arg15[%c44, %c0_99] : memref<128x256xf32, #tpu.memory_space<vmem>>, vector<4x256xf32>
    tpu.vector_store %arg15[%c44, %c0_99], %675 {strides = array<i32>} : memref<128x256xf32, #tpu.memory_space<vmem>>, vector<4x256xf32>,
    %677 = vector.shape_cast %668 : vector<256xf32> to vector<1x256xf32>
    %678 = vector.broadcast %677 : vector<1x256xf32> to vector<4x256xf32>
    %679 = arith.mulf %462, %678 : vector<4x256xf32>
    %680 = vector.shape_cast %661 : vector<256xf32> to vector<1x256xf32>
    %681 = vector.broadcast %680 : vector<1x256xf32> to vector<4x256xf32>
    %682 = arith.mulf %464, %681 : vector<4x256xf32>
    %683 = arith.addf %679, %682 : vector<4x256xf32>
    %c108 = arith.constant 108 : index
    %c0_100 = arith.constant 0 : index
    %684 = vector.load %arg15[%c108, %c0_100] : memref<128x256xf32, #tpu.memory_space<vmem>>, vector<4x256xf32>
    tpu.vector_store %arg15[%c108, %c0_100], %683 {strides = array<i32>} : memref<128x256xf32, #tpu.memory_space<vmem>>, vector<4x256xf32>,
    %c2_i32_101 = arith.constant 2 : i32
    %685 = arith.addi %0, %c2_i32_101 : i32
    %686 = arith.index_cast %685 : i32 to index
    %c0_102 = arith.constant 0 : index
    %687 = memref.load %arg1[%686, %c0_102] : memref<8x4xf32, #tpu.memory_space<smem>>
    %688 = vector.extract_strided_slice %454 {offsets = [0, 0], sizes = [1, 256], strides = [1, 1]} : vector<4x256xf32> to vector<1x256xf32>
    %689 = vector.shape_cast %688 : vector<1x256xf32> to vector<256xf32>
    %690 = vector.broadcast %687 : f32 to vector<256xf32>
    %691 = arith.mulf %690, %689 : vector<256xf32>
    %692 = vector.extract_strided_slice %456 {offsets = [0, 0], sizes = [1, 256], strides = [1, 1]} : vector<4x256xf32> to vector<1x256xf32>
    %693 = vector.shape_cast %692 : vector<1x256xf32> to vector<256xf32>
    %694 = vector.broadcast %687 : f32 to vector<256xf32>
    %695 = arith.mulf %694, %693 : vector<256xf32>
    %c2_i32_103 = arith.constant 2 : i32
    %696 = arith.addi %0, %c2_i32_103 : i32
    %697 = arith.index_cast %696 : i32 to index
    %c1_104 = arith.constant 1 : index
    %698 = memref.load %arg1[%697, %c1_104] : memref<8x4xf32, #tpu.memory_space<smem>>
    %699 = vector.extract_strided_slice %454 {offsets = [1, 0], sizes = [1, 256], strides = [1, 1]} : vector<4x256xf32> to vector<1x256xf32>
    %700 = vector.shape_cast %699 : vector<1x256xf32> to vector<256xf32>
    %701 = vector.broadcast %698 : f32 to vector<256xf32>
    %702 = arith.mulf %701, %700 : vector<256xf32>
    %703 = arith.addf %691, %702 : vector<256xf32>
    %704 = vector.extract_strided_slice %456 {offsets = [1, 0], sizes = [1, 256], strides = [1, 1]} : vector<4x256xf32> to vector<1x256xf32>
    %705 = vector.shape_cast %704 : vector<1x256xf32> to vector<256xf32>
    %706 = vector.broadcast %698 : f32 to vector<256xf32>
    %707 = arith.mulf %706, %705 : vector<256xf32>
    %708 = arith.addf %695, %707 : vector<256xf32>
    %c2_i32_105 = arith.constant 2 : i32
    %709 = arith.addi %0, %c2_i32_105 : i32
    %710 = arith.index_cast %709 : i32 to index
    %c2_106 = arith.constant 2 : index
    %711 = memref.load %arg1[%710, %c2_106] : memref<8x4xf32, #tpu.memory_space<smem>>
    %712 = vector.extract_strided_slice %454 {offsets = [2, 0], sizes = [1, 256], strides = [1, 1]} : vector<4x256xf32> to vector<1x256xf32>
    %713 = vector.shape_cast %712 : vector<1x256xf32> to vector<256xf32>
    %714 = vector.broadcast %711 : f32 to vector<256xf32>
    %715 = arith.mulf %714, %713 : vector<256xf32>
    %716 = arith.addf %703, %715 : vector<256xf32>
    %717 = vector.extract_strided_slice %456 {offsets = [2, 0], sizes = [1, 256], strides = [1, 1]} : vector<4x256xf32> to vector<1x256xf32>
    %718 = vector.shape_cast %717 : vector<1x256xf32> to vector<256xf32>
    %719 = vector.broadcast %711 : f32 to vector<256xf32>
    %720 = arith.mulf %719, %718 : vector<256xf32>
    %721 = arith.addf %708, %720 : vector<256xf32>
    %c2_i32_107 = arith.constant 2 : i32
    %722 = arith.addi %0, %c2_i32_107 : i32
    %723 = arith.index_cast %722 : i32 to index
    %c3_108 = arith.constant 3 : index
    %724 = memref.load %arg1[%723, %c3_108] : memref<8x4xf32, #tpu.memory_space<smem>>
    %725 = vector.extract_strided_slice %454 {offsets = [3, 0], sizes = [1, 256], strides = [1, 1]} : vector<4x256xf32> to vector<1x256xf32>
    %726 = vector.shape_cast %725 : vector<1x256xf32> to vector<256xf32>
    %727 = vector.broadcast %724 : f32 to vector<256xf32>
    %728 = arith.mulf %727, %726 : vector<256xf32>
    %729 = arith.addf %716, %728 : vector<256xf32>
    %730 = vector.extract_strided_slice %456 {offsets = [3, 0], sizes = [1, 256], strides = [1, 1]} : vector<4x256xf32> to vector<1x256xf32>
    %731 = vector.shape_cast %730 : vector<1x256xf32> to vector<256xf32>
    %732 = vector.broadcast %724 : f32 to vector<256xf32>
    %733 = arith.mulf %732, %731 : vector<256xf32>
    %734 = arith.addf %721, %733 : vector<256xf32>
    %735 = vector.extract_strided_slice %458 {offsets = [0, 0], sizes = [1, 256], strides = [1, 1]} : vector<2x256xf32> to vector<1x256xf32>
    %736 = vector.shape_cast %735 : vector<1x256xf32> to vector<256xf32>
    %737 = arith.mulf %736, %729 : vector<256xf32>
    %738 = vector.extract_strided_slice %460 {offsets = [0, 0], sizes = [1, 256], strides = [1, 1]} : vector<2x256xf32> to vector<1x256xf32>
    %739 = vector.shape_cast %738 : vector<1x256xf32> to vector<256xf32>
    %740 = arith.mulf %739, %734 : vector<256xf32>
    %741 = arith.subf %737, %740 : vector<256xf32>
    %742 = vector.extract_strided_slice %458 {offsets = [0, 0], sizes = [1, 256], strides = [1, 1]} : vector<2x256xf32> to vector<1x256xf32>
    %743 = vector.shape_cast %742 : vector<1x256xf32> to vector<256xf32>
    %744 = arith.mulf %743, %734 : vector<256xf32>
    %745 = vector.extract_strided_slice %460 {offsets = [0, 0], sizes = [1, 256], strides = [1, 1]} : vector<2x256xf32> to vector<1x256xf32>
    %746 = vector.shape_cast %745 : vector<1x256xf32> to vector<256xf32>
    %747 = arith.mulf %746, %729 : vector<256xf32>
    %748 = arith.addf %744, %747 : vector<256xf32>
    %749 = vector.shape_cast %741 : vector<256xf32> to vector<1x256xf32>
    %750 = vector.broadcast %749 : vector<1x256xf32> to vector<4x256xf32>
    %751 = arith.mulf %462, %750 : vector<4x256xf32>
    %752 = vector.shape_cast %748 : vector<256xf32> to vector<1x256xf32>
    %753 = vector.broadcast %752 : vector<1x256xf32> to vector<4x256xf32>
    %754 = arith.mulf %464, %753 : vector<4x256xf32>
    %755 = arith.subf %751, %754 : vector<4x256xf32>
    %c48 = arith.constant 48 : index
    %c0_109 = arith.constant 0 : index
    %756 = vector.load %arg15[%c48, %c0_109] : memref<128x256xf32, #tpu.memory_space<vmem>>, vector<4x256xf32>
    tpu.vector_store %arg15[%c48, %c0_109], %755 {strides = array<i32>} : memref<128x256xf32, #tpu.memory_space<vmem>>, vector<4x256xf32>,
    %757 = vector.shape_cast %748 : vector<256xf32> to vector<1x256xf32>
    %758 = vector.broadcast %757 : vector<1x256xf32> to vector<4x256xf32>
    %759 = arith.mulf %462, %758 : vector<4x256xf32>
    %760 = vector.shape_cast %741 : vector<256xf32> to vector<1x256xf32>
    %761 = vector.broadcast %760 : vector<1x256xf32> to vector<4x256xf32>
    %762 = arith.mulf %464, %761 : vector<4x256xf32>
    %763 = arith.addf %759, %762 : vector<4x256xf32>
    %c112 = arith.constant 112 : index
    %c0_110 = arith.constant 0 : index
    %764 = vector.load %arg15[%c112, %c0_110] : memref<128x256xf32, #tpu.memory_space<vmem>>, vector<4x256xf32>
    tpu.vector_store %arg15[%c112, %c0_110], %763 {strides = array<i32>} : memref<128x256xf32, #tpu.memory_space<vmem>>, vector<4x256xf32>,
    %765 = vector.extract_strided_slice %458 {offsets = [1, 0], sizes = [1, 256], strides = [1, 1]} : vector<2x256xf32> to vector<1x256xf32>
    %766 = vector.shape_cast %765 : vector<1x256xf32> to vector<256xf32>
    %767 = arith.mulf %766, %729 : vector<256xf32>
    %768 = vector.extract_strided_slice %460 {offsets = [1, 0], sizes = [1, 256], strides = [1, 1]} : vector<2x256xf32> to vector<1x256xf32>
    %769 = vector.shape_cast %768 : vector<1x256xf32> to vector<256xf32>
    %770 = arith.mulf %769, %734 : vector<256xf32>
    %771 = arith.subf %767, %770 : vector<256xf32>
    %772 = vector.extract_strided_slice %458 {offsets = [1, 0], sizes = [1, 256], strides = [1, 1]} : vector<2x256xf32> to vector<1x256xf32>
    %773 = vector.shape_cast %772 : vector<1x256xf32> to vector<256xf32>
    %774 = arith.mulf %773, %734 : vector<256xf32>
    %775 = vector.extract_strided_slice %460 {offsets = [1, 0], sizes = [1, 256], strides = [1, 1]} : vector<2x256xf32> to vector<1x256xf32>
    %776 = vector.shape_cast %775 : vector<1x256xf32> to vector<256xf32>
    %777 = arith.mulf %776, %729 : vector<256xf32>
    %778 = arith.addf %774, %777 : vector<256xf32>
    %779 = vector.shape_cast %771 : vector<256xf32> to vector<1x256xf32>
    %780 = vector.broadcast %779 : vector<1x256xf32> to vector<4x256xf32>
    %781 = arith.mulf %462, %780 : vector<4x256xf32>
    %782 = vector.shape_cast %778 : vector<256xf32> to vector<1x256xf32>
    %783 = vector.broadcast %782 : vector<1x256xf32> to vector<4x256xf32>
    %784 = arith.mulf %464, %783 : vector<4x256xf32>
    %785 = arith.subf %781, %784 : vector<4x256xf32>
    %c52 = arith.constant 52 : index
    %c0_111 = arith.constant 0 : index
    %786 = vector.load %arg15[%c52, %c0_111] : memref<128x256xf32, #tpu.memory_space<vmem>>, vector<4x256xf32>
    tpu.vector_store %arg15[%c52, %c0_111], %785 {strides = array<i32>} : memref<128x256xf32, #tpu.memory_space<vmem>>, vector<4x256xf32>,
    %787 = vector.shape_cast %778 : vector<256xf32> to vector<1x256xf32>
    %788 = vector.broadcast %787 : vector<1x256xf32> to vector<4x256xf32>
    %789 = arith.mulf %462, %788 : vector<4x256xf32>
    %790 = vector.shape_cast %771 : vector<256xf32> to vector<1x256xf32>
    %791 = vector.broadcast %790 : vector<1x256xf32> to vector<4x256xf32>
    %792 = arith.mulf %464, %791 : vector<4x256xf32>
    %793 = arith.addf %789, %792 : vector<4x256xf32>
    %c116 = arith.constant 116 : index
    %c0_112 = arith.constant 0 : index
    %794 = vector.load %arg15[%c116, %c0_112] : memref<128x256xf32, #tpu.memory_space<vmem>>, vector<4x256xf32>
    tpu.vector_store %arg15[%c116, %c0_112], %793 {strides = array<i32>} : memref<128x256xf32, #tpu.memory_space<vmem>>, vector<4x256xf32>,
    %c3_i32_113 = arith.constant 3 : i32
    %795 = arith.addi %0, %c3_i32_113 : i32
    %796 = arith.index_cast %795 : i32 to index
    %c0_114 = arith.constant 0 : index
    %797 = memref.load %arg1[%796, %c0_114] : memref<8x4xf32, #tpu.memory_space<smem>>
    %798 = vector.extract_strided_slice %454 {offsets = [0, 0], sizes = [1, 256], strides = [1, 1]} : vector<4x256xf32> to vector<1x256xf32>
    %799 = vector.shape_cast %798 : vector<1x256xf32> to vector<256xf32>
    %800 = vector.broadcast %797 : f32 to vector<256xf32>
    %801 = arith.mulf %800, %799 : vector<256xf32>
    %802 = vector.extract_strided_slice %456 {offsets = [0, 0], sizes = [1, 256], strides = [1, 1]} : vector<4x256xf32> to vector<1x256xf32>
    %803 = vector.shape_cast %802 : vector<1x256xf32> to vector<256xf32>
    %804 = vector.broadcast %797 : f32 to vector<256xf32>
    %805 = arith.mulf %804, %803 : vector<256xf32>
    %c3_i32_115 = arith.constant 3 : i32
    %806 = arith.addi %0, %c3_i32_115 : i32
    %807 = arith.index_cast %806 : i32 to index
    %c1_116 = arith.constant 1 : index
    %808 = memref.load %arg1[%807, %c1_116] : memref<8x4xf32, #tpu.memory_space<smem>>
    %809 = vector.extract_strided_slice %454 {offsets = [1, 0], sizes = [1, 256], strides = [1, 1]} : vector<4x256xf32> to vector<1x256xf32>
    %810 = vector.shape_cast %809 : vector<1x256xf32> to vector<256xf32>
    %811 = vector.broadcast %808 : f32 to vector<256xf32>
    %812 = arith.mulf %811, %810 : vector<256xf32>
    %813 = arith.addf %801, %812 : vector<256xf32>
    %814 = vector.extract_strided_slice %456 {offsets = [1, 0], sizes = [1, 256], strides = [1, 1]} : vector<4x256xf32> to vector<1x256xf32>
    %815 = vector.shape_cast %814 : vector<1x256xf32> to vector<256xf32>
    %816 = vector.broadcast %808 : f32 to vector<256xf32>
    %817 = arith.mulf %816, %815 : vector<256xf32>
    %818 = arith.addf %805, %817 : vector<256xf32>
    %c3_i32_117 = arith.constant 3 : i32
    %819 = arith.addi %0, %c3_i32_117 : i32
    %820 = arith.index_cast %819 : i32 to index
    %c2_118 = arith.constant 2 : index
    %821 = memref.load %arg1[%820, %c2_118] : memref<8x4xf32, #tpu.memory_space<smem>>
    %822 = vector.extract_strided_slice %454 {offsets = [2, 0], sizes = [1, 256], strides = [1, 1]} : vector<4x256xf32> to vector<1x256xf32>
    %823 = vector.shape_cast %822 : vector<1x256xf32> to vector<256xf32>
    %824 = vector.broadcast %821 : f32 to vector<256xf32>
    %825 = arith.mulf %824, %823 : vector<256xf32>
    %826 = arith.addf %813, %825 : vector<256xf32>
    %827 = vector.extract_strided_slice %456 {offsets = [2, 0], sizes = [1, 256], strides = [1, 1]} : vector<4x256xf32> to vector<1x256xf32>
    %828 = vector.shape_cast %827 : vector<1x256xf32> to vector<256xf32>
    %829 = vector.broadcast %821 : f32 to vector<256xf32>
    %830 = arith.mulf %829, %828 : vector<256xf32>
    %831 = arith.addf %818, %830 : vector<256xf32>
    %c3_i32_119 = arith.constant 3 : i32
    %832 = arith.addi %0, %c3_i32_119 : i32
    %833 = arith.index_cast %832 : i32 to index
    %c3_120 = arith.constant 3 : index
    %834 = memref.load %arg1[%833, %c3_120] : memref<8x4xf32, #tpu.memory_space<smem>>
    %835 = vector.extract_strided_slice %454 {offsets = [3, 0], sizes = [1, 256], strides = [1, 1]} : vector<4x256xf32> to vector<1x256xf32>
    %836 = vector.shape_cast %835 : vector<1x256xf32> to vector<256xf32>
    %837 = vector.broadcast %834 : f32 to vector<256xf32>
    %838 = arith.mulf %837, %836 : vector<256xf32>
    %839 = arith.addf %826, %838 : vector<256xf32>
    %840 = vector.extract_strided_slice %456 {offsets = [3, 0], sizes = [1, 256], strides = [1, 1]} : vector<4x256xf32> to vector<1x256xf32>
    %841 = vector.shape_cast %840 : vector<1x256xf32> to vector<256xf32>
    %842 = vector.broadcast %834 : f32 to vector<256xf32>
    %843 = arith.mulf %842, %841 : vector<256xf32>
    %844 = arith.addf %831, %843 : vector<256xf32>
    %845 = vector.extract_strided_slice %458 {offsets = [0, 0], sizes = [1, 256], strides = [1, 1]} : vector<2x256xf32> to vector<1x256xf32>
    %846 = vector.shape_cast %845 : vector<1x256xf32> to vector<256xf32>
    %847 = arith.mulf %846, %839 : vector<256xf32>
    %848 = vector.extract_strided_slice %460 {offsets = [0, 0], sizes = [1, 256], strides = [1, 1]} : vector<2x256xf32> to vector<1x256xf32>
    %849 = vector.shape_cast %848 : vector<1x256xf32> to vector<256xf32>
    %850 = arith.mulf %849, %844 : vector<256xf32>
    %851 = arith.subf %847, %850 : vector<256xf32>
    %852 = vector.extract_strided_slice %458 {offsets = [0, 0], sizes = [1, 256], strides = [1, 1]} : vector<2x256xf32> to vector<1x256xf32>
    %853 = vector.shape_cast %852 : vector<1x256xf32> to vector<256xf32>
    %854 = arith.mulf %853, %844 : vector<256xf32>
    %855 = vector.extract_strided_slice %460 {offsets = [0, 0], sizes = [1, 256], strides = [1, 1]} : vector<2x256xf32> to vector<1x256xf32>
    %856 = vector.shape_cast %855 : vector<1x256xf32> to vector<256xf32>
    %857 = arith.mulf %856, %839 : vector<256xf32>
    %858 = arith.addf %854, %857 : vector<256xf32>
    %859 = vector.shape_cast %851 : vector<256xf32> to vector<1x256xf32>
    %860 = vector.broadcast %859 : vector<1x256xf32> to vector<4x256xf32>
    %861 = arith.mulf %462, %860 : vector<4x256xf32>
    %862 = vector.shape_cast %858 : vector<256xf32> to vector<1x256xf32>
    %863 = vector.broadcast %862 : vector<1x256xf32> to vector<4x256xf32>
    %864 = arith.mulf %464, %863 : vector<4x256xf32>
    %865 = arith.subf %861, %864 : vector<4x256xf32>
    %c56 = arith.constant 56 : index
    %c0_121 = arith.constant 0 : index
    %866 = vector.load %arg15[%c56, %c0_121] : memref<128x256xf32, #tpu.memory_space<vmem>>, vector<4x256xf32>
    tpu.vector_store %arg15[%c56, %c0_121], %865 {strides = array<i32>} : memref<128x256xf32, #tpu.memory_space<vmem>>, vector<4x256xf32>,
    %867 = vector.shape_cast %858 : vector<256xf32> to vector<1x256xf32>
    %868 = vector.broadcast %867 : vector<1x256xf32> to vector<4x256xf32>
    %869 = arith.mulf %462, %868 : vector<4x256xf32>
    %870 = vector.shape_cast %851 : vector<256xf32> to vector<1x256xf32>
    %871 = vector.broadcast %870 : vector<1x256xf32> to vector<4x256xf32>
    %872 = arith.mulf %464, %871 : vector<4x256xf32>
    %873 = arith.addf %869, %872 : vector<4x256xf32>
    %c120 = arith.constant 120 : index
    %c0_122 = arith.constant 0 : index
    %874 = vector.load %arg15[%c120, %c0_122] : memref<128x256xf32, #tpu.memory_space<vmem>>, vector<4x256xf32>
    tpu.vector_store %arg15[%c120, %c0_122], %873 {strides = array<i32>} : memref<128x256xf32, #tpu.memory_space<vmem>>, vector<4x256xf32>,
    %875 = vector.extract_strided_slice %458 {offsets = [1, 0], sizes = [1, 256], strides = [1, 1]} : vector<2x256xf32> to vector<1x256xf32>
    %876 = vector.shape_cast %875 : vector<1x256xf32> to vector<256xf32>
    %877 = arith.mulf %876, %839 : vector<256xf32>
    %878 = vector.extract_strided_slice %460 {offsets = [1, 0], sizes = [1, 256], strides = [1, 1]} : vector<2x256xf32> to vector<1x256xf32>
    %879 = vector.shape_cast %878 : vector<1x256xf32> to vector<256xf32>
    %880 = arith.mulf %879, %844 : vector<256xf32>
    %881 = arith.subf %877, %880 : vector<256xf32>
    %882 = vector.extract_strided_slice %458 {offsets = [1, 0], sizes = [1, 256], strides = [1, 1]} : vector<2x256xf32> to vector<1x256xf32>
    %883 = vector.shape_cast %882 : vector<1x256xf32> to vector<256xf32>
    %884 = arith.mulf %883, %844 : vector<256xf32>
    %885 = vector.extract_strided_slice %460 {offsets = [1, 0], sizes = [1, 256], strides = [1, 1]} : vector<2x256xf32> to vector<1x256xf32>
    %886 = vector.shape_cast %885 : vector<1x256xf32> to vector<256xf32>
    %887 = arith.mulf %886, %839 : vector<256xf32>
    %888 = arith.addf %884, %887 : vector<256xf32>
    %889 = vector.shape_cast %881 : vector<256xf32> to vector<1x256xf32>
    %890 = vector.broadcast %889 : vector<1x256xf32> to vector<4x256xf32>
    %891 = arith.mulf %462, %890 : vector<4x256xf32>
    %892 = vector.shape_cast %888 : vector<256xf32> to vector<1x256xf32>
    %893 = vector.broadcast %892 : vector<1x256xf32> to vector<4x256xf32>
    %894 = arith.mulf %464, %893 : vector<4x256xf32>
    %895 = arith.subf %891, %894 : vector<4x256xf32>
    %c60 = arith.constant 60 : index
    %c0_123 = arith.constant 0 : index
    %896 = vector.load %arg15[%c60, %c0_123] : memref<128x256xf32, #tpu.memory_space<vmem>>, vector<4x256xf32>
    tpu.vector_store %arg15[%c60, %c0_123], %895 {strides = array<i32>} : memref<128x256xf32, #tpu.memory_space<vmem>>, vector<4x256xf32>,
    %897 = vector.shape_cast %888 : vector<256xf32> to vector<1x256xf32>
    %898 = vector.broadcast %897 : vector<1x256xf32> to vector<4x256xf32>
    %899 = arith.mulf %462, %898 : vector<4x256xf32>
    %900 = vector.shape_cast %881 : vector<256xf32> to vector<1x256xf32>
    %901 = vector.broadcast %900 : vector<1x256xf32> to vector<4x256xf32>
    %902 = arith.mulf %464, %901 : vector<4x256xf32>
    %903 = arith.addf %899, %902 : vector<4x256xf32>
    %c124 = arith.constant 124 : index
    %c0_124 = arith.constant 0 : index
    %904 = vector.load %arg15[%c124, %c0_124] : memref<128x256xf32, #tpu.memory_space<vmem>>, vector<4x256xf32>
    tpu.vector_store %arg15[%c124, %c0_124], %903 {strides = array<i32>} : memref<128x256xf32, #tpu.memory_space<vmem>>, vector<4x256xf32>,
    %c0_125 = arith.constant 0 : index
    %c0_126 = arith.constant 0 : index
    %905 = vector.load %arg15[%c0_125, %c0_126] : memref<128x256xf32, #tpu.memory_space<vmem>>, vector<128x256xf32>
    %c0_127 = arith.constant 0 : index
    %c0_128 = arith.constant 0 : index
    %906 = vector.load %arg11[%c0_127, %c0_128] : memref<256x256xf32, #tpu.memory_space<vmem>>, vector<256x256xf32>
    %cst = arith.constant dense<0.000000e+00> : vector<128x256xf32>
    %907 = tpu.matmul %905, %906, %cst {dimension_numbers = #tpu.dot_dimension_numbers<[1], [0], [0], [1], [0, 0, 1, 1], [], []>} : vector<128x256xf32>, vector<256x256xf32>, vector<128x256xf32> -> vector<128x256xf32>
    %c0_129 = arith.constant 0 : index
    %c0_130 = arith.constant 0 : index
    %908 = vector.load %arg12[%c0_129, %c0_130] : memref<256x256xf32, #tpu.memory_space<vmem>>, vector<256x256xf32>
    %cst_131 = arith.constant dense<0.000000e+00> : vector<128x256xf32>
    %909 = tpu.matmul %905, %908, %cst_131 {dimension_numbers = #tpu.dot_dimension_numbers<[1], [0], [0], [1], [0, 0, 1, 1], [], []>} : vector<128x256xf32>, vector<256x256xf32>, vector<128x256xf32> -> vector<128x256xf32>
    %910 = vector.extract_strided_slice %907 {offsets = [0, 0], sizes = [64, 256], strides = [1, 1]} : vector<128x256xf32> to vector<64x256xf32>
    %911 = vector.extract_strided_slice %909 {offsets = [64, 0], sizes = [64, 256], strides = [1, 1]} : vector<128x256xf32> to vector<64x256xf32>
    %912 = arith.subf %910, %911 : vector<64x256xf32>
    %913 = vector.extract_strided_slice %909 {offsets = [0, 0], sizes = [64, 256], strides = [1, 1]} : vector<128x256xf32> to vector<64x256xf32>
    %914 = vector.extract_strided_slice %907 {offsets = [64, 0], sizes = [64, 256], strides = [1, 1]} : vector<128x256xf32> to vector<64x256xf32>
    %915 = arith.addf %913, %914 : vector<64x256xf32>
    %c0_132 = arith.constant 0 : index
    %c0_133 = arith.constant 0 : index
    %916 = vector.load %arg8[%c0_132, %c0_133] : memref<2x256xf32, #tpu.memory_space<vmem>>, vector<1x256xf32>
    %917 = vector.shape_cast %916 : vector<1x256xf32> to vector<256xf32>
    %c0_134 = arith.constant 0 : index
    %c0_135 = arith.constant 0 : index
    %918 = vector.load %arg9[%c0_134, %c0_135] : memref<2x256xf32, #tpu.memory_space<vmem>>, vector<1x256xf32>
    %919 = vector.shape_cast %918 : vector<1x256xf32> to vector<256xf32>
    %920 = vector.extract_strided_slice %912 {offsets = [0, 0], sizes = [32, 256], strides = [1, 1]} : vector<64x256xf32> to vector<32x256xf32>
    %921 = vector.extract_strided_slice %915 {offsets = [0, 0], sizes = [32, 256], strides = [1, 1]} : vector<64x256xf32> to vector<32x256xf32>
    %922 = vector.shape_cast %917 : vector<256xf32> to vector<1x256xf32>
    %923 = vector.broadcast %922 : vector<1x256xf32> to vector<32x256xf32>
    %924 = arith.mulf %923, %920 : vector<32x256xf32>
    %925 = vector.shape_cast %919 : vector<256xf32> to vector<1x256xf32>
    %926 = vector.broadcast %925 : vector<1x256xf32> to vector<32x256xf32>
    %927 = arith.mulf %926, %921 : vector<32x256xf32>
    %928 = arith.subf %924, %927 : vector<32x256xf32>
    %929 = vector.shape_cast %917 : vector<256xf32> to vector<1x256xf32>
    %930 = vector.broadcast %929 : vector<1x256xf32> to vector<32x256xf32>
    %931 = arith.mulf %930, %921 : vector<32x256xf32>
    %932 = vector.shape_cast %919 : vector<256xf32> to vector<1x256xf32>
    %933 = vector.broadcast %932 : vector<1x256xf32> to vector<32x256xf32>
    %934 = arith.mulf %933, %920 : vector<32x256xf32>
    %935 = arith.addf %931, %934 : vector<32x256xf32>
    %c1_136 = arith.constant 1 : index
    %c0_137 = arith.constant 0 : index
    %936 = vector.load %arg8[%c1_136, %c0_137] : memref<2x256xf32, #tpu.memory_space<vmem>>, vector<1x256xf32>
    %937 = vector.shape_cast %936 : vector<1x256xf32> to vector<256xf32>
    %c1_138 = arith.constant 1 : index
    %c0_139 = arith.constant 0 : index
    %938 = vector.load %arg9[%c1_138, %c0_139] : memref<2x256xf32, #tpu.memory_space<vmem>>, vector<1x256xf32>
    %939 = vector.shape_cast %938 : vector<1x256xf32> to vector<256xf32>
    %940 = vector.extract_strided_slice %912 {offsets = [32, 0], sizes = [32, 256], strides = [1, 1]} : vector<64x256xf32> to vector<32x256xf32>
    %941 = vector.extract_strided_slice %915 {offsets = [32, 0], sizes = [32, 256], strides = [1, 1]} : vector<64x256xf32> to vector<32x256xf32>
    %942 = vector.shape_cast %937 : vector<256xf32> to vector<1x256xf32>
    %943 = vector.broadcast %942 : vector<1x256xf32> to vector<32x256xf32>
    %944 = arith.mulf %943, %940 : vector<32x256xf32>
    %945 = vector.shape_cast %939 : vector<256xf32> to vector<1x256xf32>
    %946 = vector.broadcast %945 : vector<1x256xf32> to vector<32x256xf32>
    %947 = arith.mulf %946, %941 : vector<32x256xf32>
    %948 = arith.subf %944, %947 : vector<32x256xf32>
    %949 = vector.shape_cast %937 : vector<256xf32> to vector<1x256xf32>
    %950 = vector.broadcast %949 : vector<1x256xf32> to vector<32x256xf32>
    %951 = arith.mulf %950, %941 : vector<32x256xf32>
    %952 = vector.shape_cast %939 : vector<256xf32> to vector<1x256xf32>
    %953 = vector.broadcast %952 : vector<1x256xf32> to vector<32x256xf32>
    %954 = arith.mulf %953, %940 : vector<32x256xf32>
    %955 = arith.addf %951, %954 : vector<32x256xf32>
    %956 = arith.addf %928, %948 : vector<32x256xf32>
    %957 = arith.addf %935, %955 : vector<32x256xf32>
    %c0_140 = arith.constant 0 : index
    %c0_141 = arith.constant 0 : index
    %c0_142 = arith.constant 0 : index
    %958 = vector.load %arg10[%c0_140, %c0_141, %c0_142] : memref<4x2x256xf32, #tpu.memory_space<vmem>>, vector<1x1x256xf32>
    %959 = vector.shape_cast %958 : vector<1x1x256xf32> to vector<256xf32>
    %960 = vector.shape_cast %959 : vector<256xf32> to vector<1x256xf32>
    %961 = vector.extract_strided_slice %956 {offsets = [0, 0], sizes = [4, 256], strides = [1, 1]} : vector<32x256xf32> to vector<4x256xf32>
    %962 = vector.broadcast %960 : vector<1x256xf32> to vector<4x256xf32>
    %963 = arith.mulf %962, %961 : vector<4x256xf32>
    %c0_143 = arith.constant 0 : index
    %c0_144 = arith.constant 0 : index
    %964 = vector.load %arg13[%c0_143, %c0_144] : memref<32x256xf32, #tpu.memory_space<vmem>>, vector<4x256xf32>
    tpu.vector_store %arg13[%c0_143, %c0_144], %963 {strides = array<i32>} : memref<32x256xf32, #tpu.memory_space<vmem>>, vector<4x256xf32>,
    %965 = vector.shape_cast %959 : vector<256xf32> to vector<1x256xf32>
    %966 = vector.extract_strided_slice %957 {offsets = [0, 0], sizes = [4, 256], strides = [1, 1]} : vector<32x256xf32> to vector<4x256xf32>
    %967 = vector.broadcast %965 : vector<1x256xf32> to vector<4x256xf32>
    %968 = arith.mulf %967, %966 : vector<4x256xf32>
    %c0_145 = arith.constant 0 : index
    %c0_146 = arith.constant 0 : index
    %969 = vector.load %arg14[%c0_145, %c0_146] : memref<32x256xf32, #tpu.memory_space<vmem>>, vector<4x256xf32>
    tpu.vector_store %arg14[%c0_145, %c0_146], %968 {strides = array<i32>} : memref<32x256xf32, #tpu.memory_space<vmem>>, vector<4x256xf32>,
    %c0_147 = arith.constant 0 : index
    %c1_148 = arith.constant 1 : index
    %c0_149 = arith.constant 0 : index
    %970 = vector.load %arg10[%c0_147, %c1_148, %c0_149] : memref<4x2x256xf32, #tpu.memory_space<vmem>>, vector<1x1x256xf32>
    %971 = vector.shape_cast %970 : vector<1x1x256xf32> to vector<256xf32>
    %972 = vector.shape_cast %971 : vector<256xf32> to vector<1x256xf32>
    %973 = vector.extract_strided_slice %956 {offsets = [4, 0], sizes = [4, 256], strides = [1, 1]} : vector<32x256xf32> to vector<4x256xf32>
    %974 = vector.broadcast %972 : vector<1x256xf32> to vector<4x256xf32>
    %975 = arith.mulf %974, %973 : vector<4x256xf32>
    %c4_150 = arith.constant 4 : index
    %c0_151 = arith.constant 0 : index
    %976 = vector.load %arg13[%c4_150, %c0_151] : memref<32x256xf32, #tpu.memory_space<vmem>>, vector<4x256xf32>
    tpu.vector_store %arg13[%c4_150, %c0_151], %975 {strides = array<i32>} : memref<32x256xf32, #tpu.memory_space<vmem>>, vector<4x256xf32>,
    %977 = vector.shape_cast %971 : vector<256xf32> to vector<1x256xf32>
    %978 = vector.extract_strided_slice %957 {offsets = [4, 0], sizes = [4, 256], strides = [1, 1]} : vector<32x256xf32> to vector<4x256xf32>
    %979 = vector.broadcast %977 : vector<1x256xf32> to vector<4x256xf32>
    %980 = arith.mulf %979, %978 : vector<4x256xf32>
    %c4_152 = arith.constant 4 : index
    %c0_153 = arith.constant 0 : index
    %981 = vector.load %arg14[%c4_152, %c0_153] : memref<32x256xf32, #tpu.memory_space<vmem>>, vector<4x256xf32>
    tpu.vector_store %arg14[%c4_152, %c0_153], %980 {strides = array<i32>} : memref<32x256xf32, #tpu.memory_space<vmem>>, vector<4x256xf32>,
    %c1_154 = arith.constant 1 : index
    %c0_155 = arith.constant 0 : index
    %c0_156 = arith.constant 0 : index
    %982 = vector.load %arg10[%c1_154, %c0_155, %c0_156] : memref<4x2x256xf32, #tpu.memory_space<vmem>>, vector<1x1x256xf32>
    %983 = vector.shape_cast %982 : vector<1x1x256xf32> to vector<256xf32>
    %984 = vector.shape_cast %983 : vector<256xf32> to vector<1x256xf32>
    %985 = vector.extract_strided_slice %956 {offsets = [8, 0], sizes = [4, 256], strides = [1, 1]} : vector<32x256xf32> to vector<4x256xf32>
    %986 = vector.broadcast %984 : vector<1x256xf32> to vector<4x256xf32>
    %987 = arith.mulf %986, %985 : vector<4x256xf32>
    %c8_157 = arith.constant 8 : index
    %c0_158 = arith.constant 0 : index
    %988 = vector.load %arg13[%c8_157, %c0_158] : memref<32x256xf32, #tpu.memory_space<vmem>>, vector<4x256xf32>
    tpu.vector_store %arg13[%c8_157, %c0_158], %987 {strides = array<i32>} : memref<32x256xf32, #tpu.memory_space<vmem>>, vector<4x256xf32>,
    %989 = vector.shape_cast %983 : vector<256xf32> to vector<1x256xf32>
    %990 = vector.extract_strided_slice %957 {offsets = [8, 0], sizes = [4, 256], strides = [1, 1]} : vector<32x256xf32> to vector<4x256xf32>
    %991 = vector.broadcast %989 : vector<1x256xf32> to vector<4x256xf32>
    %992 = arith.mulf %991, %990 : vector<4x256xf32>
    %c8_159 = arith.constant 8 : index
    %c0_160 = arith.constant 0 : index
    %993 = vector.load %arg14[%c8_159, %c0_160] : memref<32x256xf32, #tpu.memory_space<vmem>>, vector<4x256xf32>
    tpu.vector_store %arg14[%c8_159, %c0_160], %992 {strides = array<i32>} : memref<32x256xf32, #tpu.memory_space<vmem>>, vector<4x256xf32>,
    %c1_161 = arith.constant 1 : index
    %c1_162 = arith.constant 1 : index
    %c0_163 = arith.constant 0 : index
    %994 = vector.load %arg10[%c1_161, %c1_162, %c0_163] : memref<4x2x256xf32, #tpu.memory_space<vmem>>, vector<1x1x256xf32>
    %995 = vector.shape_cast %994 : vector<1x1x256xf32> to vector<256xf32>
    %996 = vector.shape_cast %995 : vector<256xf32> to vector<1x256xf32>
    %997 = vector.extract_strided_slice %956 {offsets = [12, 0], sizes = [4, 256], strides = [1, 1]} : vector<32x256xf32> to vector<4x256xf32>
    %998 = vector.broadcast %996 : vector<1x256xf32> to vector<4x256xf32>
    %999 = arith.mulf %998, %997 : vector<4x256xf32>
    %c12_164 = arith.constant 12 : index
    %c0_165 = arith.constant 0 : index
    %1000 = vector.load %arg13[%c12_164, %c0_165] : memref<32x256xf32, #tpu.memory_space<vmem>>, vector<4x256xf32>
    tpu.vector_store %arg13[%c12_164, %c0_165], %999 {strides = array<i32>} : memref<32x256xf32, #tpu.memory_space<vmem>>, vector<4x256xf32>,
    %1001 = vector.shape_cast %995 : vector<256xf32> to vector<1x256xf32>
    %1002 = vector.extract_strided_slice %957 {offsets = [12, 0], sizes = [4, 256], strides = [1, 1]} : vector<32x256xf32> to vector<4x256xf32>
    %1003 = vector.broadcast %1001 : vector<1x256xf32> to vector<4x256xf32>
    %1004 = arith.mulf %1003, %1002 : vector<4x256xf32>
    %c12_166 = arith.constant 12 : index
    %c0_167 = arith.constant 0 : index
    %1005 = vector.load %arg14[%c12_166, %c0_167] : memref<32x256xf32, #tpu.memory_space<vmem>>, vector<4x256xf32>
    tpu.vector_store %arg14[%c12_166, %c0_167], %1004 {strides = array<i32>} : memref<32x256xf32, #tpu.memory_space<vmem>>, vector<4x256xf32>,
    %c2_168 = arith.constant 2 : index
    %c0_169 = arith.constant 0 : index
    %c0_170 = arith.constant 0 : index
    %1006 = vector.load %arg10[%c2_168, %c0_169, %c0_170] : memref<4x2x256xf32, #tpu.memory_space<vmem>>, vector<1x1x256xf32>
    %1007 = vector.shape_cast %1006 : vector<1x1x256xf32> to vector<256xf32>
    %1008 = vector.shape_cast %1007 : vector<256xf32> to vector<1x256xf32>
    %1009 = vector.extract_strided_slice %956 {offsets = [16, 0], sizes = [4, 256], strides = [1, 1]} : vector<32x256xf32> to vector<4x256xf32>
    %1010 = vector.broadcast %1008 : vector<1x256xf32> to vector<4x256xf32>
    %1011 = arith.mulf %1010, %1009 : vector<4x256xf32>
    %c16_171 = arith.constant 16 : index
    %c0_172 = arith.constant 0 : index
    %1012 = vector.load %arg13[%c16_171, %c0_172] : memref<32x256xf32, #tpu.memory_space<vmem>>, vector<4x256xf32>
    tpu.vector_store %arg13[%c16_171, %c0_172], %1011 {strides = array<i32>} : memref<32x256xf32, #tpu.memory_space<vmem>>, vector<4x256xf32>,
    %1013 = vector.shape_cast %1007 : vector<256xf32> to vector<1x256xf32>
    %1014 = vector.extract_strided_slice %957 {offsets = [16, 0], sizes = [4, 256], strides = [1, 1]} : vector<32x256xf32> to vector<4x256xf32>
    %1015 = vector.broadcast %1013 : vector<1x256xf32> to vector<4x256xf32>
    %1016 = arith.mulf %1015, %1014 : vector<4x256xf32>
    %c16_173 = arith.constant 16 : index
    %c0_174 = arith.constant 0 : index
    %1017 = vector.load %arg14[%c16_173, %c0_174] : memref<32x256xf32, #tpu.memory_space<vmem>>, vector<4x256xf32>
    tpu.vector_store %arg14[%c16_173, %c0_174], %1016 {strides = array<i32>} : memref<32x256xf32, #tpu.memory_space<vmem>>, vector<4x256xf32>,
    %c2_175 = arith.constant 2 : index
    %c1_176 = arith.constant 1 : index
    %c0_177 = arith.constant 0 : index
    %1018 = vector.load %arg10[%c2_175, %c1_176, %c0_177] : memref<4x2x256xf32, #tpu.memory_space<vmem>>, vector<1x1x256xf32>
    %1019 = vector.shape_cast %1018 : vector<1x1x256xf32> to vector<256xf32>
    %1020 = vector.shape_cast %1019 : vector<256xf32> to vector<1x256xf32>
    %1021 = vector.extract_strided_slice %956 {offsets = [20, 0], sizes = [4, 256], strides = [1, 1]} : vector<32x256xf32> to vector<4x256xf32>
    %1022 = vector.broadcast %1020 : vector<1x256xf32> to vector<4x256xf32>
    %1023 = arith.mulf %1022, %1021 : vector<4x256xf32>
    %c20_178 = arith.constant 20 : index
    %c0_179 = arith.constant 0 : index
    %1024 = vector.load %arg13[%c20_178, %c0_179] : memref<32x256xf32, #tpu.memory_space<vmem>>, vector<4x256xf32>
    tpu.vector_store %arg13[%c20_178, %c0_179], %1023 {strides = array<i32>} : memref<32x256xf32, #tpu.memory_space<vmem>>, vector<4x256xf32>,
    %1025 = vector.shape_cast %1019 : vector<256xf32> to vector<1x256xf32>
    %1026 = vector.extract_strided_slice %957 {offsets = [20, 0], sizes = [4, 256], strides = [1, 1]} : vector<32x256xf32> to vector<4x256xf32>
    %1027 = vector.broadcast %1025 : vector<1x256xf32> to vector<4x256xf32>
    %1028 = arith.mulf %1027, %1026 : vector<4x256xf32>
    %c20_180 = arith.constant 20 : index
    %c0_181 = arith.constant 0 : index
    %1029 = vector.load %arg14[%c20_180, %c0_181] : memref<32x256xf32, #tpu.memory_space<vmem>>, vector<4x256xf32>
    tpu.vector_store %arg14[%c20_180, %c0_181], %1028 {strides = array<i32>} : memref<32x256xf32, #tpu.memory_space<vmem>>, vector<4x256xf32>,
    %c3_182 = arith.constant 3 : index
    %c0_183 = arith.constant 0 : index
    %c0_184 = arith.constant 0 : index
    %1030 = vector.load %arg10[%c3_182, %c0_183, %c0_184] : memref<4x2x256xf32, #tpu.memory_space<vmem>>, vector<1x1x256xf32>
    %1031 = vector.shape_cast %1030 : vector<1x1x256xf32> to vector<256xf32>
    %1032 = vector.shape_cast %1031 : vector<256xf32> to vector<1x256xf32>
    %1033 = vector.extract_strided_slice %956 {offsets = [24, 0], sizes = [4, 256], strides = [1, 1]} : vector<32x256xf32> to vector<4x256xf32>
    %1034 = vector.broadcast %1032 : vector<1x256xf32> to vector<4x256xf32>
    %1035 = arith.mulf %1034, %1033 : vector<4x256xf32>
    %c24_185 = arith.constant 24 : index
    %c0_186 = arith.constant 0 : index
    %1036 = vector.load %arg13[%c24_185, %c0_186] : memref<32x256xf32, #tpu.memory_space<vmem>>, vector<4x256xf32>
    tpu.vector_store %arg13[%c24_185, %c0_186], %1035 {strides = array<i32>} : memref<32x256xf32, #tpu.memory_space<vmem>>, vector<4x256xf32>,
    %1037 = vector.shape_cast %1031 : vector<256xf32> to vector<1x256xf32>
    %1038 = vector.extract_strided_slice %957 {offsets = [24, 0], sizes = [4, 256], strides = [1, 1]} : vector<32x256xf32> to vector<4x256xf32>
    %1039 = vector.broadcast %1037 : vector<1x256xf32> to vector<4x256xf32>
    %1040 = arith.mulf %1039, %1038 : vector<4x256xf32>
    %c24_187 = arith.constant 24 : index
    %c0_188 = arith.constant 0 : index
    %1041 = vector.load %arg14[%c24_187, %c0_188] : memref<32x256xf32, #tpu.memory_space<vmem>>, vector<4x256xf32>
    tpu.vector_store %arg14[%c24_187, %c0_188], %1040 {strides = array<i32>} : memref<32x256xf32, #tpu.memory_space<vmem>>, vector<4x256xf32>,
    %c3_189 = arith.constant 3 : index
    %c1_190 = arith.constant 1 : index
    %c0_191 = arith.constant 0 : index
    %1042 = vector.load %arg10[%c3_189, %c1_190, %c0_191] : memref<4x2x256xf32, #tpu.memory_space<vmem>>, vector<1x1x256xf32>
    %1043 = vector.shape_cast %1042 : vector<1x1x256xf32> to vector<256xf32>
    %1044 = vector.shape_cast %1043 : vector<256xf32> to vector<1x256xf32>
    %1045 = vector.extract_strided_slice %956 {offsets = [28, 0], sizes = [4, 256], strides = [1, 1]} : vector<32x256xf32> to vector<4x256xf32>
    %1046 = vector.broadcast %1044 : vector<1x256xf32> to vector<4x256xf32>
    %1047 = arith.mulf %1046, %1045 : vector<4x256xf32>
    %c28_192 = arith.constant 28 : index
    %c0_193 = arith.constant 0 : index
    %1048 = vector.load %arg13[%c28_192, %c0_193] : memref<32x256xf32, #tpu.memory_space<vmem>>, vector<4x256xf32>
    tpu.vector_store %arg13[%c28_192, %c0_193], %1047 {strides = array<i32>} : memref<32x256xf32, #tpu.memory_space<vmem>>, vector<4x256xf32>,
    %1049 = vector.shape_cast %1043 : vector<256xf32> to vector<1x256xf32>
    %1050 = vector.extract_strided_slice %957 {offsets = [28, 0], sizes = [4, 256], strides = [1, 1]} : vector<32x256xf32> to vector<4x256xf32>
    %1051 = vector.broadcast %1049 : vector<1x256xf32> to vector<4x256xf32>
    %1052 = arith.mulf %1051, %1050 : vector<4x256xf32>
    %c28_194 = arith.constant 28 : index
    %c0_195 = arith.constant 0 : index
    %1053 = vector.load %arg14[%c28_194, %c0_195] : memref<32x256xf32, #tpu.memory_space<vmem>>, vector<4x256xf32>
    tpu.vector_store %arg14[%c28_194, %c0_195], %1052 {strides = array<i32>} : memref<32x256xf32, #tpu.memory_space<vmem>>, vector<4x256xf32>,
    return
  }
  func.func @transform_0(%arg0: i32) -> (i32, i32) {
    %c0_i32 = arith.constant 0 : i32
    %c0_i32_0 = arith.constant 0 : i32
    %c0_i32_1 = arith.constant 0 : i32
    return %c0_i32, %c0_i32_0 : i32, i32
  }
  func.func @transform_1(%arg0: i32) -> (i32, i32, i32) {
    %c0_i32 = arith.constant 0 : i32
    %c0_i32_0 = arith.constant 0 : i32
    %c0_i32_1 = arith.constant 0 : i32
    %c0_i32_2 = arith.constant 0 : i32
    return %c0_i32, %c0_i32_0, %c0_i32_1 : i32, i32, i32
  }
  func.func @transform_2(%arg0: i32) -> (i32, i32, i32) {
    %c0_i32 = arith.constant 0 : i32
    %c0_i32_0 = arith.constant 0 : i32
    %c0_i32_1 = arith.constant 0 : i32
    %c0_i32_2 = arith.constant 0 : i32
    return %c0_i32, %c0_i32_0, %c0_i32_1 : i32, i32, i32
  }
  func.func @transform_3(%arg0: i32) -> (i32, i32, i32) {
    %c0_i32 = arith.constant 0 : i32
    %c0_i32_0 = arith.constant 0 : i32
    %c0_i32_1 = arith.constant 0 : i32
    %c0_i32_2 = arith.constant 0 : i32
    return %c0_i32, %c0_i32_0, %c0_i32_1 : i32, i32, i32
  }
  func.func @transform_4(%arg0: i32) -> (i32, i32, i32) {
    %c0_i32 = arith.constant 0 : i32
    %c0_i32_0 = arith.constant 0 : i32
    %c0_i32_1 = arith.constant 0 : i32
    %c0_i32_2 = arith.constant 0 : i32
    return %c0_i32, %c0_i32_0, %c0_i32_1 : i32, i32, i32
  }
  func.func @transform_5(%arg0: i32) -> (i32, i32, i32) {
    %c0_i32 = arith.constant 0 : i32
    %c0_i32_0 = arith.constant 0 : i32
    %c0_i32_1 = arith.constant 0 : i32
    %c0_i32_2 = arith.constant 0 : i32
    return %c0_i32, %c0_i32_0, %c0_i32_1 : i32, i32, i32
  }
  func.func @transform_6(%arg0: i32) -> (i32, i32, i32) {
    %c0_i32 = arith.constant 0 : i32
    %c0_i32_0 = arith.constant 0 : i32
    %c0_i32_1 = arith.constant 0 : i32
    %c0_i32_2 = arith.constant 0 : i32
    return %c0_i32, %c0_i32_0, %c0_i32_1 : i32, i32, i32
  }
  func.func @transform_7(%arg0: i32) -> (i32, i32) {
    %c0_i32 = arith.constant 0 : i32
    %c0_i32_0 = arith.constant 0 : i32
    %c0_i32_1 = arith.constant 0 : i32
    return %c0_i32, %c0_i32_0 : i32, i32
  }
  func.func @transform_8(%arg0: i32) -> (i32, i32) {
    %c0_i32 = arith.constant 0 : i32
    %c0_i32_0 = arith.constant 0 : i32
    %c0_i32_1 = arith.constant 0 : i32
    return %c0_i32, %c0_i32_0 : i32, i32
  }
  func.func @transform_9(%arg0: i32) -> (i32, i32, i32) {
    %c0_i32 = arith.constant 0 : i32
    %c0_i32_0 = arith.constant 0 : i32
    %c0_i32_1 = arith.constant 0 : i32
    return %arg0, %c0_i32, %c0_i32_0 : i32, i32, i32
  }
  func.func @transform_10(%arg0: i32) -> (i32, i32) {
    %c0_i32 = arith.constant 0 : i32
    %c0_i32_0 = arith.constant 0 : i32
    %c0_i32_1 = arith.constant 0 : i32
    return %c0_i32, %c0_i32_0 : i32, i32
  }
  func.func @transform_11(%arg0: i32) -> (i32, i32) {
    %c0_i32 = arith.constant 0 : i32
    %c0_i32_0 = arith.constant 0 : i32
    %c0_i32_1 = arith.constant 0 : i32
    return %c0_i32, %c0_i32_0 : i32, i32
  }
  func.func @transform_12(%arg0: i32) -> (i32, i32) {
    %c0_i32 = arith.constant 0 : i32
    %c0_i32_0 = arith.constant 0 : i32
    return %arg0, %c0_i32 : i32, i32
  }
  func.func @transform_13(%arg0: i32) -> (i32, i32) {
    %c0_i32 = arith.constant 0 : i32
    %c0_i32_0 = arith.constant 0 : i32
    return %arg0, %c0_i32 : i32, i32
  }
}

</mosaic_0001>

<bundles_post_ra>
// kernel: tpu_custom_call.1
= control target key start
LH: loop header
LB: loop body
LE: loop exit
PB: predicated region body
PF: predicated region fallthrough
CT: control target
= control target key end

     0   :  { %s6029_s0 = inlined_call_operand.vmem [shape: f32[8,4], index: 0, kind: input, shape index: {}]   ;;  %s6030_s1 = inlined_call_operand.hbm [shape: f32[2,4,256], index: 1, kind: input, shape index: {}]   ;;  %s6031_s2 = inlined_call_operand.hbm [shape: f32[2,4,256], index: 2, kind: input, shape index: {}]   ;;  %s6032_s3 = inlined_call_operand.vmem [shape: f32[2,2,256], index: 3, kind: input, shape index: {}]   ;;  %s6033_s4 = inlined_call_operand.hbm [shape: f32[2,2,256], index: 4, kind: input, shape index: {}]   ;;  %s6034_s5 = inlined_call_operand.hbm [shape: f32[2,4,256], index: 5, kind: input, shape index: {}]   ;;  %s6035_s6 = inlined_call_operand.hbm [shape: f32[2,4,256], index: 6, kind: input, shape index: {}]   ;;  %s6036_s7 = inlined_call_operand.vmem [shape: f32[2,256], index: 7, kind: input, shape index: {}]   ;;  %s6037_s8 = inlined_call_operand.hbm [shape: f32[2,256], index: 8, kind: input, shape index: {}]   ;;  %s6038_s9 = inlined_call_operand.vmem [shape: f32[8,2,256], index: 9, kind: input, shape index: {}]   ;;  %s6039_s10 = inlined_call_operand.hbm [shape: f32[256,256], index: 10, kind: input, shape index: {}]   ;;  %s6040_s11 = inlined_call_operand.hbm [shape: f32[256,256], index: 11, kind: input, shape index: {}]   ;;  %s6041_s12 = inlined_call_operand.hbm [shape: f32[64,256], index: 12, kind: output, shape index: {0}]   ;;  %s6042_s13 = inlined_call_operand.hbm [shape: f32[64,256], index: 13, kind: output, shape index: {1}]  }
   0x1   :  { %6081 = sst [smem:[#allocation54_spill]] %s6029_s0 }
   0x2   :  { %6082 = sst [smem:[#allocation55_spill]] %s6030_s1 }
   0x3   :  { %6083 = sst [smem:[#allocation56_spill]] %s6031_s2 }
   0x4   :  { %6084 = sst [smem:[#allocation57_spill]] %s6033_s4 }
   0x5   :  { %6085 = sst [smem:[#allocation58_spill]] %s6034_s5 }
   0x6   :  { %6086 = sst [smem:[#allocation59_spill]] %s6035_s6 }
   0x7   :  { %6087 = sst [smem:[#allocation60_spill]] %s6036_s7 }
   0x8   :  { %6088 = sst [smem:[#allocation61_spill]] %s6037_s8 }
   0x9   :  { %6089 = sst [smem:[#allocation62_spill]] %s6038_s9 }
   0xa   :  { %6090 = sst [smem:[#allocation63_spill]] %s6039_s10 }
   0xb   :  { %6091 = sst [smem:[#allocation64_spill]] %s6040_s11 }
   0xc   :  { %6092 = sst [smem:[#allocation65_spill]] %s6041_s12 }
   0xd   :  { %6093 = sst [smem:[#allocation66_spill]] %s6042_s13 }
   0xe   :  { %19 = vsyncpa [#allocation6], 0 }
   0xf   :  { %20 = vsyncpa [#allocation4], 0 }
  0x10   :  { %21 = vsyncpa [#allocation9], 0 }
  0x11   :  { %22 = vsyncpa [#allocation12], 0 }
  0x12   :  { %23 = vsyncpa [#allocation15], 0 }
  0x13   :  { %24 = vsyncpa [#allocation18], 0 }
  0x14   :  { %25 = vsyncpa [#allocation5], 0 }
  0x15   :  { %27 = vsyncpa [#allocation5 + $0x1], 0 }
  0x16   :  { %28 = vsyncpa [#allocation21], 0 }
  0x17   :  { %30 = vsyncpa [#allocation21 + $0x1], 0  ;;  %s4177_s25 = smov 0   ;;  %s4179_s26 = smov 0  }
  0x18   :  { %s4181_s27 = smov 0   ;;  %s4183_s28 = smov 0  }
  0x19 LB: > { %6094 = sst [smem:[#allocation30_spill]] %s4073_s25  ;;  %s4198_s29 = sadd.s32 4294967295, %s4085_s28   ;;  %s4085_s28 = sphi %s4183_s28, %s6258_s28   ;;  %s4081_s27 = sphi %s4181_s27, %s6261_s27   ;;  %s4077_s26 = sphi %s4179_s26, %s6260_s26   ;;  %s4073_s25 = sphi %s4177_s25, %s6259_s25  }
  0x1a   : > { %6095 = sst [smem:[#allocation31_spill]] %s4077_s26  ;;  %s3324_s30 = sadd.s32 4294967294, %s4085_s28  }
  0x1b   : > { %6096 = sst [smem:[#allocation32_spill]] %s4081_s27  ;;  %s4202_s14 = sadd.s32 1, %s4085_s28  }
  0x1c   : > { %6097 = sst [smem:[#allocation33_spill]] %s4085_s28  ;;  %s300_s15 = sadd.s32 1, %s4081_s27 }
  0x1d   : > { %6098 = sst [smem:[#allocation34_spill]] %s4202_s14  ;;  %s297_s16 = ssub.s32 %s4085_s28, %s4202_s14 }
  0x1e   : > { %p310_p0 = scmp.ne.s32.totalorder %s4081_s27, %s4077_s26  ;;  %p298_p1 = scmp.eq.s32.totalorder %s297_s16, 0 }
  0x1f   : > { %p311_p2 = scmp.eq.s32.totalorder %s4198_s29, 1  ;;  %p316_p3 = scmp.ne.s32.totalorder %s4077_s26, %s4073_s25 }
  0x20   : > { %p317_p4 = scmp.eq.s32.totalorder %s3324_s30, 1  ;;  %p3325_p7 = scmp.ge.s32.totalorder %s4085_s28, 1 }
  0x21   : > { %s4213_s17 = scalar_select %p298_p1, %s4081_s27, %s300_s15  }
  0x22   : > { %p4215_p5 = por %p311_p2, %p310_p0  ;;  %p4219_p6 = por %p317_p4, %p316_p3 }
  0x23   : > { %6099 = sst [smem:[#allocation35_spill]] %s4213_s17  ;;  %p350_p8 = scmp.lt.s32.totalorder %s4085_s28, 3 }
  0x24   : > { %s6100_s18 = scalar_select %p4215_p5, 1, 0 }
  0x25   : > { %s6102_s19 = scalar_select %p4219_p6, 1, 0 }
  0x26   : > { %6101 = sst [smem:[#allocation36_spill]] %s6100_s18  ;;  %p6048_p9 = scmp.eq.s32.totalorder %s4198_s29, 0 }
  0x27   : > { %6103 = sst [smem:[#allocation37_spill]] %s6102_s19  ;;  %p4226_p10 = pnand %p3325_p7, %p350_p8 }
  0x28   : > { %s4087_s21 = smov [#allocation8]   ;;  %s4088_s24 = smov [#allocation11]  }
  0x29   : > { %s6104_s20 = scalar_select %p4226_p10, 1, 0 }
  0x2a   : > { %p3622_p11 = pneg %p4226_p10  ;;  %s386_s22 = sshll.u32 %s4087_s21, 4  ;;  %s4232_s22 = int_to_ptr.vmem [resolvable:$true] %s386_s22 }
  0x2b   : > { %s415_s30 = sshll.u32 %s4088_s24, 4  ;;  %s4089_s15 = smov [#allocation14]   ;;  %s4240_s30 = int_to_ptr.vmem [resolvable:$true] %s415_s30 }
  0x2c   : > { %p4236_p12 = pnand %p6048_p9, %p3622_p11  ;;  %s4242_s16 = sshll.u32 %s4089_s15, 4  ;;  %s446_s16 = int_to_ptr.vmem [resolvable:$true] %s4242_s16 }
  0x2d   : > { %s6106_s2 = sld [smem:[#allocation56_spill]] }
  0x2e   : > { %p4252_p0 = pneg %p4236_p12 }
  0x33   : > { %s3728_s14 = scalar_lea.hbm %s6106_s2, 256 }
  0x34   : > { %p3729_p13 = scmp.ne.s32.totalorder %s6106_s2, %s3728_s14  ;;  %p3735_p3 = scmp.lt.u32.totalorder %s3728_s14, %s6106_s2 }
  0x36   : > { %p3731_p1 = pnand %p4252_p0, %p3729_p13 }
  0x38   : > { %p3732_p2 = pneg %p3731_p1 }
  0x3a   : > { %p3737_p4 = pnand %p3735_p3, %p3732_p2 }
  0x3c   : > { %3740 = shalt.err (!%p3737_p4)
}
  0x3d   : > { %s3741_s27 = scalar_lea.vmem %s4232_s22, 256  ;;  %p3749_p9 = scmp.lt.s32.totalorder %s4232_s22, %s4232_s22 }
  0x3e   : > { %p3742_p7 = scmp.ne.s32.totalorder %s4232_s22, %s3741_s27  ;;  %p3750_p6 = scmp.lt.s32.totalorder %s3741_s27, %s3741_s27 }
  0x40   : > { %p3744_p8 = pnand %p3742_p7, %p4252_p0  ;;  %p3751_p13 = por %p3750_p6, %p3749_p9 }
  0x42   : > { %p3745_p11 = pneg %p3744_p8 }
  0x44   : > { %p3752_p1 = pnand %p3751_p13, %p3745_p11 }
  0x46   : > { %3755 = shalt.err (!%p3752_p1)
}
  0x47   : > { %s6056_s17 = smov 128   ;;  %s6057_s14 = smov 8  }
  0x48   : > { %3631 = dma.hbm_to_vmem [thread:$0]  (!%p4236_p12), %s6106_s2, 256, %s4232_s22, [#allocation9], %s6056_s17, %s6056_s17, %s6057_s14  }
  0x49   : > { %s6108_s5 = sld [smem:[#allocation58_spill]] }
  0x4f   : > { %s3756_s27 = scalar_lea.hbm %s6108_s5, 256 }
  0x50   : > { %p3757_p6 = scmp.ne.s32.totalorder %s6108_s5, %s3756_s27  ;;  %p3763_p3 = scmp.lt.u32.totalorder %s3756_s27, %s6108_s5 }
  0x52   : > { %p3759_p9 = pnand %p3757_p6, %p4252_p0 }
  0x54   : > { %p3760_p2 = pneg %p3759_p9 }
  0x56   : > { %p3765_p4 = pnand %p3763_p3, %p3760_p2 }
  0x58   : > { %3768 = shalt.err (!%p3765_p4)
}
  0x59   : > { %s3769_s22 = scalar_lea.vmem %s4240_s30, 256  ;;  %p3777_p13 = scmp.lt.s32.totalorder %s4240_s30, %s4240_s30 }
  0x5a   : > { %p3770_p7 = scmp.ne.s32.totalorder %s4240_s30, %s3769_s22  ;;  %p3778_p1 = scmp.lt.s32.totalorder %s3769_s22, %s3769_s22 }
  0x5c   : > { %p3772_p8 = pnand %p3770_p7, %p4252_p0  ;;  %p3779_p6 = por %p3778_p1, %p3777_p13 }
  0x5e   : > { %p3773_p11 = pneg %p3772_p8 }
  0x60   : > { %p3780_p9 = pnand %p3779_p6, %p3773_p11 }
  0x62   : > { %3783 = shalt.err (!%p3780_p9)
}
  0x63   : > { %3637 = dma.hbm_to_vmem [thread:$0]  (!%p4236_p12), %s6108_s5, 256, %s4240_s30, [#allocation12], %s6056_s17, %s6056_s17, %s6057_s14  }
  0x64   : > { %s6109_s0 = sld [smem:[#allocation54_spill]]  ;;  %s6110_s8 = sld [smem:[#allocation61_spill]] }
  0x6a   : > { %s363_s19 = sshll.u32 %s6109_s0, 4  ;;  %s3784_s15 = scalar_lea.hbm %s6110_s8, 64  ;;  %s364_s19 = int_to_ptr.vmem [resolvable:$true] %s363_s19 }
  0x6b   : > { %p3785_p2 = scmp.ne.s32.totalorder %s6110_s8, %s3784_s15  ;;  %p3791_p7 = scmp.lt.u32.totalorder %s3784_s15, %s6110_s8 }
  0x6d   : > { %p3787_p3 = pnand %p3785_p2, %p4252_p0 }
  0x6f   : > { %p3788_p4 = pneg %p3787_p3 }
  0x71   : > { %p3793_p8 = pnand %p3791_p7, %p3788_p4 }
  0x73   : > { %3796 = shalt.err (!%p3793_p8)
}
  0x74   : > { %s3797_s30 = scalar_lea.vmem %s446_s16, 64  ;;  %p3805_p6 = scmp.lt.s32.totalorder %s446_s16, %s446_s16 }
  0x75   : > { %p3798_p11 = scmp.ne.s32.totalorder %s446_s16, %s3797_s30  ;;  %p3806_p9 = scmp.lt.s32.totalorder %s3797_s30, %s3797_s30 }
  0x77   : > { %p3800_p13 = pnand %p3798_p11, %p4252_p0  ;;  %p3807_p5 = por %p3806_p9, %p3805_p6 }
  0x79   : > { %p3801_p1 = pneg %p3800_p13 }
  0x7b   : > { %p3808_p10 = pnand %p3807_p5, %p3801_p1 }
  0x7d   : > { %3811 = shalt.err (!%p3808_p10)
}
  0x7e   : > { %3643 = dma.hbm_to_vmem [thread:$0]  (!%p4236_p12), %s6110_s8, 64, %s446_s16, [#allocation15]  }
  0x7f   : > { %s3812_s21 = scalar_lea.vmem %s364_s19, 128  ;;  %p3820_p7 = scmp.lt.s32.totalorder %s364_s19, %s364_s19 }
  0x80   : > { %p3813_p2 = scmp.ne.s32.totalorder %s364_s19, %s3812_s21  ;;  %p3821_p8 = scmp.lt.s32.totalorder %s3812_s21, %s3812_s21 }
  0x82   : > { %p3815_p3 = pnand %p3813_p2, %p4252_p0  ;;  %p3822_p11 = por %p3821_p8, %p3820_p7 }
  0x84   : > { %p3816_p4 = pneg %p3815_p3 }
  0x86   : > { %p3823_p13 = pnand %p3822_p11, %p3816_p4 }
  0x88   : > { %3826 = shalt.err (!%p3823_p13)
}
  0x89   : > { %s4092_s24 = smov [#allocation3]   ;;  %s4093_s15 = smov [#allocation7]  }
  0x8a   : > { %3625 = dma.vmem_to_smem (!%p4236_p12), %s364_s19, 128, %s4092_s24, [#allocation6]  }
  0x8b   : > { %s373_s27 = sshll.u32 %s4093_s15, 4  ;;  %s4094_s22 = smov [#allocation10]   ;;  %s374_s27 = int_to_ptr.vmem [resolvable:$true] %s373_s27 }
  0x8c   : > { %s402_s16 = sshll.u32 %s4094_s22, 4  ;;  %s6111_s1 = sld [smem:[#allocation55_spill]]  ;;  %s4328_s16 = int_to_ptr.vmem [resolvable:$true] %s402_s16 }
  0x92   : > { %s3827_s30 = scalar_lea.hbm %s6111_s1, 256 }
  0x93   : > { %p3828_p5 = scmp.ne.s32.totalorder %s6111_s1, %s3827_s30  ;;  %p3834_p6 = scmp.lt.u32.totalorder %s3827_s30, %s6111_s1 }
  0x95   : > { %p3830_p10 = pnand %p3828_p5, %p4252_p0 }
  0x97   : > { %p3831_p1 = pneg %p3830_p10 }
  0x99   : > { %p3836_p9 = pnand %p3834_p6, %p3831_p1 }
  0x9b   : > { %3839 = shalt.err (!%p3836_p9)
}
  0x9c   : > { %s3840_s24 = scalar_lea.vmem %s374_s27, 256  ;;  %p3848_p7 = scmp.lt.s32.totalorder %s374_s27, %s374_s27 }
  0x9d   : > { %p3841_p2 = scmp.ne.s32.totalorder %s374_s27, %s3840_s24  ;;  %p3849_p8 = scmp.lt.s32.totalorder %s3840_s24, %s3840_s24 }
  0x9f   : > { %p3843_p3 = pnand %p3841_p2, %p4252_p0  ;;  %p3850_p11 = por %p3849_p8, %p3848_p7 }
  0xa1   : > { %p3844_p4 = pneg %p3843_p3 }
  0xa3   : > { %p3851_p13 = pnand %p3850_p11, %p3844_p4 }
  0xa5   : > { %3854 = shalt.err (!%p3851_p13)
}
  0xa6   : > { %3628 = dma.hbm_to_vmem [thread:$0]  (!%p4236_p12), %s6111_s1, 256, %s374_s27, [#allocation4], %s6056_s17, %s6056_s17, %s6057_s14  }
  0xa7   : > { %s6112_s4 = sld [smem:[#allocation57_spill]] }
  0xad   : > { %s3855_s30 = scalar_lea.hbm %s6112_s4, 128 }
  0xae   : > { %p3856_p5 = scmp.ne.s32.totalorder %s6112_s4, %s3855_s30  ;;  %p3862_p6 = scmp.lt.u32.totalorder %s3855_s30, %s6112_s4 }
  0xb0   : > { %p3858_p10 = pnand %p3856_p5, %p4252_p0 }
  0xb2   : > { %p3859_p1 = pneg %p3858_p10 }
  0xb4   : > { %p3864_p9 = pnand %p3862_p6, %p3859_p1 }
  0xb6   : > { %3867 = shalt.err (!%p3864_p9)
}
  0xb7   : > { %s3868_s27 = scalar_lea.vmem %s4328_s16, 128  ;;  %p3876_p7 = scmp.lt.s32.totalorder %s4328_s16, %s4328_s16 }
  0xb8   : > { %p3869_p2 = scmp.ne.s32.totalorder %s4328_s16, %s3868_s27  ;;  %p3877_p8 = scmp.lt.s32.totalorder %s3868_s27, %s3868_s27 }
  0xba   : > { %p3871_p3 = pnand %p3869_p2, %p4252_p0  ;;  %p3878_p11 = por %p3877_p8, %p3876_p7 }
  0xbc   : > { %p3872_p4 = pneg %p3871_p3 }
  0xbe   : > { %p3879_p13 = pnand %p3878_p11, %p3872_p4 }
  0xc0   : > { %3882 = shalt.err (!%p3879_p13)
}
  0xc1   : > { %s4095_s24 = smov 64   ;;  %s4096_s15 = smov 4  }
  0xc2   : > { %3634 = dma.hbm_to_vmem [thread:$0]  (!%p4236_p12), %s6112_s4, 128, %s4328_s16, [#allocation9], %s4095_s24, %s4095_s24, %s4096_s15  }
  0xc3   : > { %s4097_s13 = smov [#allocation13]   ;;  %s4098_s28 = smov [#allocation16]  }
  0xc4   : > { %s428_s30 = sshll.u32 %s4097_s13, 4  ;;  %s455_s18 = sshll.u32 %s4098_s28, 4  ;;  %s429_s30 = int_to_ptr.vmem [resolvable:$true] %s428_s30  ;;  %s4374_s18 = int_to_ptr.vmem [resolvable:$true] %s455_s18 }
  0xc5   : > { %s6113_s6 = sld [smem:[#allocation59_spill]] }
  0xcb   : > { %s3883_s27 = scalar_lea.hbm %s6113_s6, 256 }
  0xcc   : > { %p3884_p5 = scmp.ne.s32.totalorder %s6113_s6, %s3883_s27  ;;  %p3890_p6 = scmp.lt.u32.totalorder %s3883_s27, %s6113_s6 }
  0xce   : > { %p3886_p10 = pnand %p3884_p5, %p4252_p0 }
  0xd0   : > { %p3887_p1 = pneg %p3886_p10 }
  0xd2   : > { %p3892_p9 = pnand %p3890_p6, %p3887_p1 }
  0xd4   : > { %3895 = shalt.err (!%p3892_p9)
}
  0xd5   : > { %s3896_s24 = scalar_lea.vmem %s429_s30, 256  ;;  %p3904_p7 = scmp.lt.s32.totalorder %s429_s30, %s429_s30 }
  0xd6   : > { %p3897_p2 = scmp.ne.s32.totalorder %s429_s30, %s3896_s24  ;;  %p3905_p8 = scmp.lt.s32.totalorder %s3896_s24, %s3896_s24 }
  0xd8   : > { %p3899_p3 = pnand %p3897_p2, %p4252_p0  ;;  %p3906_p11 = por %p3905_p8, %p3904_p7 }
  0xda   : > { %p3900_p4 = pneg %p3899_p3 }
  0xdc   : > { %p3907_p13 = pnand %p3906_p11, %p3900_p4 }
  0xde   : > { %3910 = shalt.err (!%p3907_p13)
}
  0xdf   : > { %s6114_s17 = smov 8   ;;  %s6115_s14 = smov 128  }
  0xe0   : > { %3640 = dma.hbm_to_vmem [thread:$0]  (!%p4236_p12), %s6113_s6, 256, %s429_s30, [#allocation12], %s6115_s14, %s6115_s14, %s6114_s17  }
  0xe1   : > { %s6116_s10 = sld [smem:[#allocation63_spill]] }
  0xe7   : > { %s3911_s21 = scalar_lea.hbm %s6116_s10, 8192 }
  0xe8   : > { %p3912_p5 = scmp.ne.s32.totalorder %s6116_s10, %s3911_s21  ;;  %p3918_p6 = scmp.lt.u32.totalorder %s3911_s21, %s6116_s10 }
  0xea   : > { %p3914_p10 = pnand %p3912_p5, %p4252_p0 }
  0xec   : > { %p3915_p1 = pneg %p3914_p10 }
  0xee   : > { %p3920_p9 = pnand %p3918_p6, %p3915_p1 }
  0xf0   : > { %3923 = shalt.err (!%p3920_p9)
}
  0xf1   : > { %s3924_s30 = scalar_lea.vmem %s4374_s18, 8192  ;;  %p3932_p7 = scmp.lt.s32.totalorder %s4374_s18, %s4374_s18 }
  0xf2   : > { %p3925_p2 = scmp.ne.s32.totalorder %s4374_s18, %s3924_s30  ;;  %p3933_p8 = scmp.lt.s32.totalorder %s3924_s30, %s3924_s30 }
  0xf4   : > { %p3927_p3 = pnand %p3925_p2, %p4252_p0  ;;  %p3934_p11 = por %p3933_p8, %p3932_p7 }
  0xf6   : > { %p3928_p4 = pneg %p3927_p3 }
  0xf8   : > { %p3935_p13 = pnand %p3934_p11, %p3928_p4 }
  0xfa   : > { %3938 = shalt.err (!%p3935_p13)
}
  0xfb   : > { %s4099_s24 = smov 256   ;;  %s4100_s17 = smov 16  }
  0xfc   : > { %3646 = dma.hbm_to_vmem [thread:$0]  (!%p4236_p12), %s6116_s10, 8192, %s4374_s18, [#allocation15], %s4099_s24, %s4099_s24, %s4100_s17  }
  0xfd   : > { %s4101_s12 = smov [#allocation17]   ;;  %s6117_s11 = sld [smem:[#allocation64_spill]] }
  0xfe   : > { %s468_s13 = sshll.u32 %s4101_s12, 4  ;;  %s469_s13 = int_to_ptr.vmem [resolvable:$true] %s468_s13 }
 0x103   : > { %s3939_s19 = scalar_lea.hbm %s6117_s11, 8192 }
 0x104   : > { %p3940_p5 = scmp.ne.s32.totalorder %s6117_s11, %s3939_s19  ;;  %p3946_p6 = scmp.lt.u32.totalorder %s3939_s19, %s6117_s11 }
 0x106   : > { %p3942_p10 = pnand %p3940_p5, %p4252_p0 }
 0x108   : > { %p3943_p1 = pneg %p3942_p10 }
 0x10a   : > { %p3948_p9 = pnand %p3946_p6, %p3943_p1 }
 0x10c   : > { %3951 = shalt.err (!%p3948_p9)
}
 0x10d   : > { %s3952_s18 = scalar_lea.vmem %s469_s13, 8192  ;;  %p3960_p7 = scmp.lt.s32.totalorder %s469_s13, %s469_s13 }
 0x10e   : > { %p3953_p2 = scmp.ne.s32.totalorder %s469_s13, %s3952_s18  ;;  %p3961_p8 = scmp.lt.s32.totalorder %s3952_s18, %s3952_s18 }
 0x110   : > { %p3955_p3 = pnand %p3953_p2, %p4252_p0  ;;  %p3962_p11 = por %p3961_p8, %p3960_p7 }
 0x112   : > { %p3956_p4 = pneg %p3955_p3 }
 0x114   : > { %p3963_p13 = pnand %p3962_p11, %p3956_p4 }
 0x116   : > { %3966 = shalt.err (!%p3963_p13)
}
 0x117   : > { %3649 = dma.hbm_to_vmem [thread:$0]  (!%p4236_p12), %s6117_s11, 8192, %s469_s13, [#allocation18], %s4099_s24, %s4099_s24, %s4100_s17  }
 0x118   : > { %p6118_p5 = scmp.ne.s32.totalorder %s6104_s20, 0 }
 0x11a   : > { %494 = sbr.rel (%p6118_p5) target bundleno = 827 (0x33b), region = 68 }
 0x121   : > { %p6119_p10 = scmp.eq.s32.totalorder %s4198_s29, 0 }
 0x123   : > { %4040 = dma.done.wait (%p6119_p10), [#allocation6], 128   ;;  %p6120_p0 = pmov %p6119_p10 }
 0x125   : > { %4042 = vsyncadd (%p6120_p0), [#allocation6], 4294967168  ;;  %p6121_p1 = pmov %p6120_p0 }
 0x126   : > { %p6122_p6 = pmov %p6120_p0 }
 0x127   : > { %4044 = dma.done.wait (%p6121_p1), [#allocation4], 256  }
 0x128   : > { %4046 = vsyncadd (%p6122_p6), [#allocation4], 4294967040  ;;  %p6123_p9 = pmov %p6120_p0 }
 0x129   : > { %p6124_p12 = pmov %p6120_p0 }
 0x12a   : > { %4048 = dma.done.wait (%p6123_p9), [#allocation9], 384  }
 0x12b   : > { %4050 = vsyncadd (%p6124_p12), [#allocation9], 4294966912  ;;  %p6125_p2 = pmov %p6120_p0 }
 0x12c   : > { %p6126_p3 = pmov %p6120_p0 }
 0x12d   : > { %4052 = dma.done.wait (%p6125_p2), [#allocation12], 512  }
 0x12e   : > { %4054 = vsyncadd (%p6126_p3), [#allocation12], 4294966784  ;;  %p6127_p4 = pmov %p6120_p0 }
 0x12f   : > { %p6128_p7 = pmov %p6120_p0 }
 0x130   : > { %4056 = dma.done.wait (%p6127_p4), [#allocation15], 8256  }
 0x131   : > { %4058 = vsyncadd (%p6128_p7), [#allocation15], 4294959040  ;;  %p6129_p8 = pmov %p6120_p0 }
 0x132   : > { %p6130_p11 = pmov %p6120_p0 }
 0x133   : > { %4060 = dma.done.wait (%p6129_p8), [#allocation18], 8192  }
 0x134   : > { %4062 = vsyncadd (%p6130_p11), [#allocation18], 4294959104 }
 0x135   : > { %532 = sfence }
 0x136   : > { %v2289_v0 = vld [vmem:[#allocation16 + $0x8] sm:$0xff]  ;;  %v2291_v1 = vld [vmem:[#allocation16 + $0x18] sm:$0xff]  ;;  %v2288_v5 = vld [vmem:[#allocation16] sm:$0xff]  ;;  %s4465_s25 = sshll.u32 %s4198_s29, 9 }
 0x137   : > { %v2514_v2 = vld [vmem:[#allocation17 + $0x8] sm:$0xff]  ;;  %v3438_v3 = vpack.c.bf16 %v2291_v1, %v2289_v0  ;;  %v2516_v4 = vld [vmem:[#allocation17 + $0x18] sm:$0xff]  ;;  %v2290_v6 = vld [vmem:[#allocation16 + $0x10] sm:$0xff]  ;;  %s6062_s20 = sadd.s32 1, %s4465_s25  ;;  %s6061_s23 = sadd.s32 2, %s4465_s25 }
 0x138   : > { %v3502_v7 = vpack.c.bf16 %v2516_v4, %v2514_v2  ;;  %v3440_v8 = vpack.c.bf16 %v2290_v6, %v2288_v5  ;;  %v2513_v9 = vld [vmem:[#allocation17] sm:$0xff]  ;;  %v2515_v10 = vld [vmem:[#allocation17 + $0x10] sm:$0xff]  ;;  %v2293_v11 = vld [vmem:[#allocation16 + $0x28] sm:$0xff]  ;;  %s4470_s24 = sadd.s32 128, %s4465_s25  ;;  %s4473_s17 = sld [smem:[#allocation3 + %s4465_s25]] }
 0x139   : > { %3439 = vmatprep.subr.bf16.mxu1 %v3438_v3  ;;  %v3504_v12 = vpack.c.bf16 %v2515_v10, %v2513_v9  ;;  %v2295_v13 = vld [vmem:[#allocation16 + $0x38] sm:$0xff]  ;;  %v2518_v14 = vld [vmem:[#allocation17 + $0x28] sm:$0xff]  ;;  %v2292_v18 = vld [vmem:[#allocation16 + $0x20] sm:$0xff]  ;;  %s6058_s12 = sadd.s32 3, %s4465_s25  ;;  %s4478_s13 = sld [smem:[#allocation3 + %s6062_s20]] }
 0x13a   : > { %v2520_v15 = vld [vmem:[#allocation17 + $0x38] sm:$0xff]  ;;  %3503 = vmatprep.subr.bf16.mxu0 %v3502_v7  ;;  %3441 = vmatpush1.bf16.msra.mxu1 %v3440_v8  ;;  %v3442_v16 = vpack.c.bf16 %v2295_v13, %v2293_v11  ;;  %v2294_v19 = vld [vmem:[#allocation16 + $0x30] sm:$0xff]  ;;  %v2517_v20 = vld [vmem:[#allocation17 + $0x20] sm:$0xff]  ;;  %s4482_s28 = sld [smem:[#allocation3 + %s6061_s23]]  ;;  %s6060_s21 = sadd.s32 1, %s4470_s24 }
 0x13b   : > { %v3506_v17 = vpack.c.bf16 %v2520_v15, %v2518_v14  ;;  %3505 = vmatpush1.bf16.msra.mxu0 %v3504_v12  ;;  %v3444_v21 = vpack.c.bf16 %v2294_v19, %v2292_v18  ;;  %v2519_v22 = vld [vmem:[#allocation17 + $0x30] sm:$0xff]  ;;  %v2297_v23 = vld [vmem:[#allocation16 + $0x48] sm:$0xff]  ;;  %v2299_v24 = vld [vmem:[#allocation16 + $0x58] sm:$0xff]  ;;  %s6059_s19 = sadd.s32 2, %s4470_s24  ;;  %s4488_s27 = sld [smem:[#allocation3 + %s6058_s12]]  ;;  %v647_v12 = vlaneseq }
 0x13c   : > { %3443 = vmatprep.subr.bf16.mxu1 %v3442_v16  ;;  %v3508_v25 = vpack.c.bf16 %v2519_v22, %v2517_v20  ;;  %v3446_v26 = vpack.c.bf16 %v2299_v24, %v2297_v23  ;;  %v2522_v27 = vld [vmem:[#allocation17 + $0x48] sm:$0xff]  ;;  %v2524_v28 = vld [vmem:[#allocation17 + $0x58] sm:$0xff]  ;;  %v2296_v29 = vld [vmem:[#allocation16 + $0x40] sm:$0xff]  ;;  %s4491_s22 = sadd.s32 256, %s4465_s25  ;;  %s4494_s16 = sld [smem:[#allocation3 + %s4470_s24]] }
 0x13d   : > { %3507 = vmatprep.subr.bf16.mxu0 %v3506_v17  ;;  %v3510_v30 = vpack.c.bf16 %v2524_v28, %v2522_v27  ;;  %v2298_v31 = vld [vmem:[#allocation16 + $0x50] sm:$0xff]  ;;  %v2521_v32 = vld [vmem:[#allocation17 + $0x40] sm:$0xff]  ;;  %v2301_v35 = vld [vmem:[#allocation16 + $0x68] sm:$0xff]  ;;  %s6063_s30 = sadd.s32 3, %s4470_s24  ;;  %s4499_s18 = sld [smem:[#allocation3 + %s6060_s21]] }
 0x13e   : > { %v2523_v33 = vld [vmem:[#allocation17 + $0x50] sm:$0xff]  ;;  %3445 = vmatpush1.bf16.msra.mxu1 %v3444_v21  ;;  %v3448_v34 = vpack.c.bf16 %v2298_v31, %v2296_v29  ;;  %v2303_v36 = vld [vmem:[#allocation16 + $0x78] sm:$0xff]  ;;  %v2526_v37 = vld [vmem:[#allocation17 + $0x68] sm:$0xff]  ;;  %s4503_s14 = sld [smem:[#allocation3 + %s6059_s19]]  ;;  %s6064_s15 = sadd.s32 1, %s4491_s22 }
 0x13f   : > { %3509 = vmatpush1.bf16.msra.mxu0 %v3508_v25  ;;  %3447 = vmatprep.subr.bf16.mxu1 %v3446_v26  ;;  %v3512_v38 = vpack.c.bf16 %v2523_v33, %v2521_v32  ;;  %v3450_v39 = vpack.c.bf16 %v2303_v36, %v2301_v35  ;;  %v2528_v40 = vld [vmem:[#allocation17 + $0x78] sm:$0xff]  ;;  %v2300_v41 = vld [vmem:[#allocation16 + $0x60] sm:$0xff]  ;;  %v2302_v42 = vld [vmem:[#allocation16 + $0x70] sm:$0xff]  ;;  %s4507_s12 = sadd.s32 384, %s4465_s25  ;;  %s4511_s19 = sld [smem:[#allocation3 + %s6063_s30]]  ;;  %v648_v26 = vshrl.u32 %v647_v12, 7 }
 0x140   : > { %3511 = vmatprep.subr.bf16.mxu0 %v3510_v30  ;;  %v3514_v43 = vpack.c.bf16 %v2528_v40, %v2526_v37  ;;  %v2525_v44 = vld [vmem:[#allocation17 + $0x60] sm:$0xff]  ;;  %v2527_v45 = vld [vmem:[#allocation17 + $0x70] sm:$0xff]  ;;  %v2305_v46 = vld [vmem:[#allocation16 + $0x88] sm:$0xff]  ;;  %v3452_v50 = vpack.c.bf16 %v2302_v42, %v2300_v41  ;;  %s4514_s21 = sld [smem:[#allocation3 + %s4491_s22]]  ;;  %v4102_v10 = vmov 1983009808  }
 0x141   : > { %v2307_v47 = vld [vmem:[#allocation16 + $0x98] sm:$0xff]  ;;  %v2530_v48 = vld [vmem:[#allocation17 + $0x88] sm:$0xff]  ;;  %v3516_v51 = vpack.c.bf16 %v2527_v45, %v2525_v44  ;;  %v2304_v53 = vld [vmem:[#allocation16 + $0x80] sm:$0xff]  ;;  %v645_v11 = vunpack.c.l.s4 %v4102_v10  ;;  %s6065_s20 = sadd.s32 3, %s4491_s22  ;;  %s4520_s0 = sld [smem:[#allocation3 + %s6064_s15]]  ;;  %v4550_v33 = vsub.s32 0, %v648_v26 }
 0x142   : > { %v2532_v49 = vld [vmem:[#allocation17 + $0x98] sm:$0xff]  ;;  %3449 = vmatpush1.bf16.msra.mxu1 %v3448_v34  ;;  %v3454_v52 = vpack.c.bf16 %v2307_v47, %v2305_v46  ;;  %v2306_v54 = vld [vmem:[#allocation16 + $0x90] sm:$0xff]  ;;  %v2529_v55 = vld [vmem:[#allocation17 + $0x80] sm:$0xff]  ;;  %s6131_s15 = sadd.s32 2, %s4491_s22  ;;  %s4531_s2 = sld [smem:[#allocation3 + %s6065_s20]] }
 0x143   : > { %3513 = vmatpush1.bf16.msra.mxu0 %v3512_v38  ;;  %3451 = vmatprep.subr.bf16.mxu1 %v3450_v39  ;;  %v3518_v56 = vpack.c.bf16 %v2532_v49, %v2530_v48  ;;  %v2531_v57 = vld [vmem:[#allocation17 + $0x90] sm:$0xff]  ;;  %v2309_v58 = vld [vmem:[#allocation16 + $0xa8] sm:$0xff]  ;;  %v2311_v59 = vld [vmem:[#allocation16 + $0xb8] sm:$0xff]  ;;  %v3456_v62 = vpack.c.bf16 %v2306_v54, %v2304_v53  ;;  %s4527_s1 = sld [smem:[#allocation3 + %s6131_s15]]  ;;  %v646_v25 = vunpack.c.0.s8 %v645_v11  ;;  %s6132_s30 = sadd.s32 1, %s4507_s12  ;;  %v4559_v38 = vsub.s32 2, %v648_v26 }
 0x144   : > { %3515 = vmatprep.subr.bf16.mxu0 %v3514_v43  ;;  %v2534_v60 = vld [vmem:[#allocation17 + $0xa8] sm:$0xff]  ;;  %v2536_v61 = vld [vmem:[#allocation17 + $0xb8] sm:$0xff]  ;;  %v3520_v63 = vpack.c.bf16 %v2531_v57, %v2529_v55  ;;  %v3458_v0 = vpack.c.bf16 %v2311_v59, %v2309_v58  ;;  %v2308_v1 = vld [vmem:[#allocation16 + $0xa0] sm:$0xff]  ;;  %s4534_s23 = sld [smem:[#allocation3 + %s4507_s12]]  ;;  %s6133_s5 = sadd.s32 2, %s4507_s12  ;;  %v4577_v43 = vsub.s32 1, %v648_v26  ;;  %v595_v48 = vstv %s4473_s17 }
 0x145   : > { %v2310_v2 = vld [vmem:[#allocation16 + $0xb0] sm:$0xff]  ;;  %v2533_v3 = vld [vmem:[#allocation17 + $0xa0] sm:$0xff]  ;;  %v3522_v4 = vpack.c.bf16 %v2536_v61, %v2534_v60  ;;  %v2313_v6 = vld [vmem:[#allocation16 + $0xc8] sm:$0xff]  ;;  %s4538_s4 = sld [smem:[#allocation3 + %s6132_s30]]  ;;  %s6134_s15 = sadd.s32 3, %s4507_s12  ;;  %v4575_v42 = vsub.s32 %v646_v25, %v648_v26  ;;  %v600_v49 = vstv %s4478_s13  ;;  %v630_v57 = vstv %s4488_s27 }
 0x146   : > { %3453 = vmatpush1.bf16.msra.mxu1 %v3452_v50  ;;  %v2535_v5 = vld [vmem:[#allocation17 + $0xb0] sm:$0xff]  ;;  %v2315_v7 = vld [vmem:[#allocation16 + $0xd8] sm:$0xff]  ;;  %v2538_v8 = vld [vmem:[#allocation17 + $0xc8] sm:$0xff]  ;;  %v3460_v13 = vpack.c.bf16 %v2310_v2, %v2308_v1  ;;  %s4542_s6 = sld [smem:[#allocation3 + %s6133_s5]]  ;;  %s6135_s5 = sadd.s32 1, %s4465_s25  ;;  %6138 = vst [vmem:[#allocation38_spill] sm:$0xff] %v4577_v43 }
 0x147   : > { %3517 = vmatpush1.bf16.msra.mxu0 %v3516_v51  ;;  %3455 = vmatprep.subr.bf16.mxu1 %v3454_v52  ;;  %v2540_v9 = vld [vmem:[#allocation17 + $0xd8] sm:$0xff]  ;;  %v3524_v14 = vpack.c.bf16 %v2535_v5, %v2533_v3  ;;  %v3462_v15 = vpack.c.bf16 %v2315_v7, %v2313_v6  ;;  %v2312_v16 = vld [vmem:[#allocation16 + $0xc0] sm:$0xff]  ;;  %v2314_v17 = vld [vmem:[#allocation16 + $0xd0] sm:$0xff]  ;;  %s4546_s8 = sld [smem:[#allocation3 + %s6134_s15]]  ;;  %s6136_s15 = sadd.s32 2, %s4465_s25  ;;  %v4594_v50 = vsub.s32 3, %v648_v26 }
 0x148   : > { %3519 = vmatprep.subr.bf16.mxu0 %v3518_v56  ;;  %v2537_v18 = vld [vmem:[#allocation17 + $0xc0] sm:$0xff]  ;;  %v3526_v19 = vpack.c.bf16 %v2540_v9, %v2538_v8  ;;  %v2539_v20 = vld [vmem:[#allocation17 + $0xd0] sm:$0xff]  ;;  %v2317_v21 = vld [vmem:[#allocation16 + $0xe8] sm:$0xff]  ;;  %v3464_v27 = vpack.c.bf16 %v2314_v17, %v2312_v16  ;;  %s4553_s30 = sld [smem:[#allocation3 + %s4465_s25]]  ;;  %s6137_s11 = sadd.s32 3, %s4465_s25  ;;  %v615_v56 = vstv %s4482_s28 }
 0x149   : > { %v2319_v22 = vld [vmem:[#allocation16 + $0xf8] sm:$0xff]  ;;  %v2542_v23 = vld [vmem:[#allocation17 + $0xe8] sm:$0xff]  ;;  %v3528_v28 = vpack.c.bf16 %v2539_v20, %v2537_v18  ;;  %v2316_v30 = vld [vmem:[#allocation16 + $0xe0] sm:$0xff]  ;;  %s4557_s20 = sld [smem:[#allocation3 + %s6135_s5]]  ;;  %s6139_s7 = sadd.s32 1, %s4470_s24 }
 0x14a   : > { %3457 = vmatpush1.bf16.msra.mxu1 %v3456_v62  ;;  %v2544_v24 = vld [vmem:[#allocation17 + $0xf8] sm:$0xff]  ;;  %v3466_v29 = vpack.c.bf16 %v2319_v22, %v2317_v21  ;;  %v2318_v31 = vld [vmem:[#allocation16 + $0xf0] sm:$0xff]  ;;  %v4548_v32 = vld [vmem:[#allocation17 + $0xe0] sm:$0xff]  ;;  %s4563_s10 = sld [smem:[#allocation3 + %s6136_s15]]  ;;  %v804_v62 = vstv %s4494_s16  ;;  %s6144_s17 = sadd.s32 2, %s4491_s22 }
 0x14b   : > { %3521 = vmatpush1.bf16.msra.mxu0 %v3520_v63  ;;  %3459 = vmatprep.subr.bf16.mxu1 %v3458_v0  ;;  %v3530_v34 = vpack.c.bf16 %v2544_v24, %v2542_v23  ;;  %v2543_v35 = vld [vmem:[#allocation17 + $0xf0] sm:$0xff]  ;;  %v2321_v36 = vld [vmem:[#allocation16 + $0x108] sm:$0xff]  ;;  %v2323_v37 = vld [vmem:[#allocation16 + $0x118] sm:$0xff]  ;;  %s4567_s26 = sld [smem:[#allocation3 + %s6137_s11]]  ;;  %v3468_v44 = vpack.c.bf16 %v2318_v31, %v2316_v30  ;;  %s6140_s11 = sadd.s32 2, %s4470_s24  ;;  %v809_v63 = vstv %s4499_s18 }
 0x14c   : > { %3523 = vmatprep.subr.bf16.mxu0 %v3522_v4  ;;  %v4569_v39 = vld [vmem:[#allocation17 + $0x108] sm:$0xff]  ;;  %v4571_v40 = vld [vmem:[#allocation17 + $0x118] sm:$0xff]  ;;  %v4573_v41 = vld [vmem:[#allocation16 + $0x100] sm:$0xff]  ;;  %s4580_s5 = sld [smem:[#allocation3 + %s4470_s24]]  ;;  %v3532_v51 = vpack.c.bf16 %v2543_v35, %v4548_v32  ;;  %v3470_v52 = vpack.c.bf16 %v2323_v37, %v2321_v36  ;;  %s3432_s28 = sshll.u32 %s4198_s29, 10 }
 0x14d   : > { %s4584_s15 = sld [smem:[#allocation3 + %s6139_s7]]  ;;  %v4586_v45 = vld [vmem:[#allocation16 + $0x110] sm:$0xff]  ;;  %v4588_v46 = vld [vmem:[#allocation17 + $0x100] sm:$0xff]  ;;  %s6141_s7 = sadd.s32 3, %s4470_s24  ;;  %v4605_v53 = vld [vmem:[#allocation16 + $0x128] sm:$0xff]  ;;  %v3534_v58 = vpack.c.bf16 %v4571_v40, %v4569_v39 }
 0x14e   : > { %3461 = vmatpush1.bf16.msra.mxu1 %v3460_v13  ;;  %v4590_v47 = vld [vmem:[#allocation17 + $0x110] sm:$0xff]  ;;  %s4598_s25 = sld [smem:[#allocation3 + %s6140_s11]]  ;;  %v4607_v54 = vld [vmem:[#allocation16 + $0x138] sm:$0xff]  ;;  %v4609_v55 = vld [vmem:[#allocation17 + $0x128] sm:$0xff]  ;;  %v3472_v9 = vpack.c.bf16 %v4586_v45, %v4573_v41  ;;  %s6142_s11 = sadd.s32 1, %s4491_s22 }
 0x14f   : > { %3525 = vmatpush1.bf16.msra.mxu0 %v3524_v14  ;;  %3463 = vmatprep.subr.bf16.mxu1 %v3462_v15  ;;  %s4602_s9 = sld [smem:[#allocation3 + %s6141_s7]]  ;;  %v4618_v59 = vld [vmem:[#allocation17 + $0x138] sm:$0xff]  ;;  %v4620_v60 = vld [vmem:[#allocation16 + $0x120] sm:$0xff]  ;;  %v4622_v61 = vld [vmem:[#allocation16 + $0x130] sm:$0xff]  ;;  %v3474_v20 = vpack.c.bf16 %v4607_v54, %v4605_v53 }
 0x150   : > { %3527 = vmatprep.subr.bf16.mxu0 %v3526_v19  ;;  %s4614_s24 = sld [smem:[#allocation3 + %s4491_s22]]  ;;  %v4627_v1 = vld [vmem:[#allocation17 + $0x120] sm:$0xff]  ;;  %v4629_v2 = vld [vmem:[#allocation17 + $0x130] sm:$0xff]  ;;  %v4631_v3 = vld [vmem:[#allocation16 + $0x148] sm:$0xff]  ;;  %v3536_v19 = vpack.c.bf16 %v4590_v47, %v4588_v46  ;;  %v3538_v31 = vpack.c.bf16 %v4618_v59, %v4609_v55  ;;  %v3476_v47 = vpack.c.bf16 %v4622_v61, %v4620_v60 }
 0x151   : > { %v4633_v4 = vld [vmem:[#allocation16 + $0x158] sm:$0xff]  ;;  %v4641_v10 = vld [vmem:[#allocation17 + $0x148] sm:$0xff]  ;;  %v4645_v12 = vld [vmem:[#allocation16 + $0x140] sm:$0xff]  ;;  %s4680_s7 = sld [smem:[#allocation3 + %s6142_s11]]  ;;  %v3540_v46 = vpack.c.bf16 %v4629_v2, %v4627_v1 }
 0x152   : > { %3465 = vmatpush1.bf16.msra.mxu1 %v3464_v27  ;;  %v4643_v11 = vld [vmem:[#allocation17 + $0x158] sm:$0xff]  ;;  %v4647_v13 = vld [vmem:[#allocation16 + $0x150] sm:$0xff]  ;;  %v4649_v14 = vld [vmem:[#allocation17 + $0x140] sm:$0xff]  ;;  %v3478_v45 = vpack.c.bf16 %v4633_v4, %v4631_v3  ;;  %s4843_s13 = sld [smem:[#allocation3 + %s6144_s17]] }
 0x153   : > { %3529 = vmatpush1.bf16.msra.mxu0 %v3528_v28  ;;  %3467 = vmatprep.subr.bf16.mxu1 %v3466_v29  ;;  %v4651_v15 = vld [vmem:[#allocation17 + $0x150] sm:$0xff]  ;;  %v4660_v21 = vld [vmem:[#allocation16 + $0x168] sm:$0xff]  ;;  %v4662_v22 = vld [vmem:[#allocation16 + $0x178] sm:$0xff]  ;;  %v3480_v59 = vpack.c.bf16 %v4647_v13, %v4645_v12  ;;  %s6207_s16 = sld [smem:[#allocation62_spill]] }
 0x154   : > { %3531 = vmatprep.subr.bf16.mxu0 %v3530_v34  ;;  %v4664_v23 = vld [vmem:[#allocation17 + $0x168] sm:$0xff]  ;;  %v4666_v24 = vld [vmem:[#allocation17 + $0x178] sm:$0xff]  ;;  %v4668_v25 = vld [vmem:[#allocation16 + $0x160] sm:$0xff]  ;;  %v3544_v1 = vpack.c.bf16 %v4651_v15, %v4649_v14 }
 0x155   : > { %v4670_v26 = vld [vmem:[#allocation16 + $0x170] sm:$0xff]  ;;  %v4672_v27 = vld [vmem:[#allocation17 + $0x160] sm:$0xff]  ;;  %v4684_v32 = vld [vmem:[#allocation16 + $0x188] sm:$0xff] }
 0x156   : > { %3469 = vmatpush1.bf16.msra.mxu1 %v3468_v44  ;;  %v4674_v28 = vld [vmem:[#allocation17 + $0x170] sm:$0xff]  ;;  %v4686_v34 = vld [vmem:[#allocation16 + $0x198] sm:$0xff]  ;;  %v4688_v35 = vld [vmem:[#allocation17 + $0x188] sm:$0xff] }
 0x157   : > { %3533 = vmatpush1.bf16.msra.mxu0 %v3532_v51  ;;  %3471 = vmatprep.subr.bf16.mxu1 %v3470_v52  ;;  %v4690_v36 = vld [vmem:[#allocation17 + $0x198] sm:$0xff]  ;;  %v4692_v37 = vld [vmem:[#allocation16 + $0x180] sm:$0xff]  ;;  %v4694_v39 = vld [vmem:[#allocation16 + $0x190] sm:$0xff] }
 0x158   : > { %3535 = vmatprep.subr.bf16.mxu0 %v3534_v58  ;;  %v4696_v40 = vld [vmem:[#allocation17 + $0x180] sm:$0xff]  ;;  %v4698_v41 = vld [vmem:[#allocation17 + $0x190] sm:$0xff]  ;;  %v4705_v51 = vld [vmem:[#allocation16 + $0x1a8] sm:$0xff] }
 0x159   : > { %v4707_v52 = vld [vmem:[#allocation16 + $0x1b8] sm:$0xff]  ;;  %v4709_v53 = vld [vmem:[#allocation17 + $0x1a8] sm:$0xff]  ;;  %v4720_v60 = vld [vmem:[#allocation16 + $0x1a0] sm:$0xff] }
 0x15a   : > { %v4711_v54 = vld [vmem:[#allocation17 + $0x1b8] sm:$0xff]  ;;  %3473 = vmatpush1.bf16.msra.mxu1 %v3472_v9  ;;  %v4722_v61 = vld [vmem:[#allocation16 + $0x1b0] sm:$0xff]  ;;  %v4724_v44 = vld [vmem:[#allocation17 + $0x1a0] sm:$0xff]  ;;  %v3542_v9 = vpack.c.bf16 %v4643_v11, %v4641_v10  ;;  %v3546_v10 = vpack.c.bf16 %v4666_v24, %v4664_v23  ;;  %v3484_v11 = vpack.c.bf16 %v4670_v26, %v4668_v25 }
 0x15b   : > { %3537 = vmatpush1.bf16.msra.mxu0 %v3536_v19  ;;  %3475 = vmatprep.subr.bf16.mxu1 %v3474_v20  ;;  %v4734_v2 = vld [vmem:[#allocation17 + $0x1b0] sm:$0xff]  ;;  %v4736_v3 = vld [vmem:[#allocation16 + $0x1c8] sm:$0xff]  ;;  %v4738_v4 = vld [vmem:[#allocation16 + $0x1d8] sm:$0xff]  ;;  %v3482_v19 = vpack.c.bf16 %v4662_v22, %v4660_v21 }
 0x15c   : > { %3539 = vmatprep.subr.bf16.mxu0 %v3538_v31  ;;  %v4749_v13 = vld [vmem:[#allocation17 + $0x1c8] sm:$0xff]  ;;  %v4751_v14 = vld [vmem:[#allocation17 + $0x1d8] sm:$0xff]  ;;  %v4753_v15 = vld [vmem:[#allocation16 + $0x1c0] sm:$0xff] }
 0x15d   : > { %v4763_v24 = vld [vmem:[#allocation16 + $0x1d0] sm:$0xff]  ;;  %v4765_v31 = vld [vmem:[#allocation17 + $0x1c0] sm:$0xff]  ;;  %v4777_v17 = vld [vmem:[#allocation16 + $0x1e8] sm:$0xff] }
 0x15e   : > { %v4767_v58 = vld [vmem:[#allocation17 + $0x1d0] sm:$0xff]  ;;  %3477 = vmatpush1.bf16.msra.mxu1 %v3476_v47  ;;  %v4779_v16 = vld [vmem:[#allocation16 + $0x1f8] sm:$0xff]  ;;  %v4781_v8 = vld [vmem:[#allocation17 + $0x1e8] sm:$0xff] }
 0x15f   : > { %3541 = vmatpush1.bf16.msra.mxu0 %v3540_v46  ;;  %3479 = vmatprep.subr.bf16.mxu1 %v3478_v45  ;;  %v4789_v18 = vld [vmem:[#allocation17 + $0x1f8] sm:$0xff]  ;;  %v4791_v29 = vld [vmem:[#allocation16 + $0x1e0] sm:$0xff]  ;;  %v4793_v23 = vld [vmem:[#allocation16 + $0x1f0] sm:$0xff] }
 0x160   : > { %3543 = vmatprep.subr.bf16.mxu0 %v3542_v9  ;;  %v4804_v7 = vld [vmem:[#allocation17 + $0x1e0] sm:$0xff]  ;;  %v4806_v6 = vld [vmem:[#allocation17 + $0x1f0] sm:$0xff] }
 0x161   : > { %6143 = vst [vmem:[#allocation39_spill] sm:$0xff] %v4804_v7  ;;  %v4808_v9 = vld [vmem:[#allocation7] sm:$0xff]  ;;  %v4812_v46 = vld [vmem:[#allocation8] sm:$0xff] }
 0x162   : > { %v596_v30 = vmul.f32 %v595_v48, %v4808_v9  ;;  %v601_v47 = vmul.f32 %v600_v49, %v4808_v9  ;;  %v616_v55 = vmul.f32 %v615_v56, %v4808_v9  ;;  %3481 = vmatpush1.bf16.msra.mxu1 %v3480_v59  ;;  %v597_v22 = vmul.f32 %v595_v48, %v4812_v46 }
 0x163   : > { %v607_v45 = vmul.f32 %v600_v49, %v4812_v46  ;;  %v622_v21 = vmul.f32 %v615_v56, %v4812_v46  ;;  %v631_v20 = vmul.f32 %v630_v57, %v4808_v9  ;;  %3545 = vmatpush1.bf16.msra.mxu0 %v3544_v1  ;;  %3483 = vmatprep.subr.bf16.mxu1 %v3482_v19 }
 0x164   : > { %v3353_v12 = vrot.slane %v601_v47, 9  ;;  %v3355_v59 = vrot.slane %v616_v55, 10  ;;  %v637_v48 = vmul.f32 %v630_v57, %v4812_v46  ;;  %v805_v49 = vmul.f32 %v804_v62, %v4808_v9  ;;  %3547 = vmatprep.subr.bf16.mxu0 %v3546_v10 }
 0x165   : > { %v3354_v56 = vrot.slane %v607_v45, 9  ;;  %v3356_v5 = vrot.slane %v622_v21, 10  ;;  %v3357_v0 = vrot.slane %v631_v20, 11  ;;  %v806_v1 = vmul.f32 %v804_v62, %v4812_v46 }
 0x166   : > { %v606_v55 = vadd.f32 %v3353_v12, %v596_v30  ;;  %v3358_v19 = vrot.slane %v637_v48, 11  ;;  %v810_v57 = vmul.f32 %v809_v63, %v4808_v9  ;;  %v816_v47 = vmul.f32 %v809_v63, %v4812_v46  ;;  %3485 = vmatpush1.bf16.msra.mxu1 %v3484_v11 }
 0x167   : > { %v612_v10 = vadd.f32 %v3354_v56, %v597_v22  ;;  %v6145_v21 = vstv %s4503_s14  ;;  %v6147_v62 = vstv %s4511_s19  ;;  %v6148_v12 = vpack.c.bf16 %v4674_v28, %v4672_v27 }
 0x168   : > { %v825_v20 = vmul.f32 %v6145_v21, %v4808_v9  ;;  %v6146_v45 = vmov %v6145_v21  ;;  %v840_v30 = vmul.f32 %v6147_v62, %v4808_v9  ;;  %v6149_v63 = vpack.c.bf16 %v4686_v34, %v4684_v32 }
 0x169   : > { %v831_v7 = vmul.f32 %v6146_v45, %v4812_v46  ;;  %3549 = vmatpush1.bf16.msra.mxu0 %v6148_v12  ;;  %v621_v25 = vadd.f32 %v3355_v59, %v606_v55  ;;  %v3360_v26 = vrot.slane %v810_v57, 9  ;;  %v3361_v11 = vrot.slane %v816_v47, 9 }
 0x16a   : > { %3487 = vmatprep.subr.bf16.mxu1 %v6149_v63  ;;  %v6150_v22 = vmov %v6147_v62  ;;  %v6151_v56 = vpack.c.bf16 %v4690_v36, %v4688_v35  ;;  %v627_v21 = vadd.f32 %v3356_v5, %v612_v10  ;;  %v3362_v27 = vrot.slane %v825_v20, 10  ;;  %v4884_v35 = vld [vmem:[%s6032_s3] sm:$0xf]  ;;  %v4886_v5 = vld [vmem:[#allocation10] sm:$0xf] }
 0x16b   : > { %v846_v48 = vmul.f32 %v6150_v22, %v4812_v46  ;;  %v3363_v28 = vrot.slane %v831_v7, 10  ;;  %v3364_v45 = vrot.slane %v840_v30, 11  ;;  %v636_v62 = vadd.f32 %v3357_v0, %v621_v25 }
 0x16c   : > { %3551 = vmatprep.subr.bf16.mxu0 %v6151_v56  ;;  %v815_v32 = vadd.f32 %v3360_v26, %v805_v49  ;;  %v821_v34 = vadd.f32 %v3361_v11, %v806_v1  ;;  %v6152_v55 = vpack.c.bf16 %v4694_v39, %v4692_v37  ;;  %v642_v7 = vadd.f32 %v3358_v19, %v627_v21 }
 0x16d   : > { %v3365_v59 = vrot.slane %v846_v48, 11  ;;  %v6153_v0 = vstv %s4514_s21  ;;  %v6155_v37 = vstv %s4520_s0  ;;  %v6156_v57 = vpack.c.bf16 %v4698_v41, %v4696_v40  ;;  %s6182_s0 = sadd.s32 3, %s4491_s22 }
 0x16e   : > { %3489 = vmatpush1.bf16.msra.mxu1 %v6152_v55  ;;  %v4891_v36 = vmul.f32 %v6153_v0, %v4808_v9  ;;  %v6154_v49 = vmov %v6153_v0  ;;  %v4901_v39 = vmul.f32 %v6155_v37, %v4808_v9  ;;  %v6157_v47 = vpack.c.bf16 %v4707_v52, %v4705_v51 }
 0x16f   : > { %v4896_v1 = vmul.f32 %v6154_v49, %v4812_v46  ;;  %3553 = vmatpush1.bf16.msra.mxu0 %v6156_v57  ;;  %v650_v19 = vrot.slane %v636_v62, %v4575_v42  ;;  %v830_v10 = vadd.f32 %v3362_v27, %v815_v32  ;;  %v836_v20 = vadd.f32 %v3363_v28, %v821_v34 }
 0x170   : > { %3491 = vmatprep.subr.bf16.mxu1 %v6157_v47  ;;  %v1867_v30 = vstv %s4843_s13  ;;  %v6158_v12 = vpack.c.bf16 %v4711_v54, %v4709_v53  ;;  %v660_v63 = vrot.slane %v642_v7, %v4575_v42  ;;  %v3367_v25 = vrot.slane %v4901_v39, 9 }
 0x171   : > { %v6159_v40 = vmov %v6155_v37  ;;  %v6160_v51 = vstv %s4527_s1  ;;  %v652_v26 = vmul.f32 %v650_v19, %v4884_v35  ;;  %v665_v11 = vmul.f32 %v650_v19, %v4886_v5 }
 0x172   : > { %3555 = vmatprep.subr.bf16.mxu0 %v6158_v12  ;;  %v4919_v41 = vmul.f32 %v6159_v40, %v4812_v46  ;;  %v4924_v52 = vmul.f32 %v6160_v51, %v4808_v9  ;;  %v729_v22 = vrot.slane %v650_v19, 7  ;;  %v845_v48 = vadd.f32 %v3364_v45, %v830_v10  ;;  %v4977_v51 = vld [vmem:[#allocation11] sm:$0xff] }
 0x173   : > { %v6161_v53 = vpack.c.bf16 %v4722_v61, %v4720_v60  ;;  %v662_v54 = vmul.f32 %v660_v63, %v4886_v5  ;;  %v664_v56 = vmul.f32 %v660_v63, %v4884_v35  ;;  %v732_v21 = vrot.slane %v660_v63, 7 }
 0x174   : > { %v851_v27 = vadd.f32 %v3365_v59, %v836_v20  ;;  %v6162_v28 = vpack.c.bf16 %v4734_v2, %v4724_v44  ;;  %v6163_v62 = vpack.c.bf16 %v4738_v4, %v4736_v3  ;;  %v731_v45 = vmul.f32 %v729_v22, %v4884_v35 }
 0x175   : > { %3493 = vmatpush1.bf16.msra.mxu1 %v6161_v53  ;;  %v737_v32 = vmul.f32 %v729_v22, %v4886_v5  ;;  %v4942_v60 = vrot.slane %v845_v48, %v4575_v42  ;;  %v3368_v61 = vrot.slane %v4919_v41, 9  ;;  %v6164_v34 = vpack.c.bf16 %v4751_v14, %v4749_v13 }
 0x176   : > { %3557 = vmatpush1.bf16.msra.mxu0 %v6162_v28  ;;  %3495 = vmatprep.subr.bf16.mxu1 %v6163_v62  ;;  %v663_v59 = vsub.f32 %v652_v26, %v662_v54  ;;  %v666_v44 = vadd.f32 %v665_v11, %v664_v56  ;;  %v734_v2 = vmul.f32 %v732_v21, %v4886_v5  ;;  %v6170_v56 = vld [vmem:[#allocation39_spill] sm:$0xff] }
 0x177   : > { %3559 = vmatprep.subr.bf16.mxu0 %v6164_v34  ;;  %v736_v3 = vmul.f32 %v732_v21, %v4884_v35  ;;  %v861_v4 = vmul.f32 %v4942_v60, %v4884_v35  ;;  %v869_v55 = vrot.slane %v851_v27, %v4575_v42  ;;  %v874_v7 = vmul.f32 %v4942_v60, %v4886_v5 }
 0x178   : > { %v938_v0 = vrot.slane %v4942_v60, 7  ;;  %v6165_v13 = vpack.c.bf16 %v4763_v24, %v4753_v15  ;;  %v671_v14 = vrot.slane %v663_v59, %v4550_v33  ;;  %v675_v49 = vrot.slane %v663_v59, %v4559_v38 }
 0x179   : > { %v695_v37 = vrot.slane %v666_v44, %v4550_v33  ;;  %v699_v57 = vrot.slane %v666_v44, %v4559_v38  ;;  %v6166_v47 = vpack.c.bf16 %v4767_v58, %v4765_v31  ;;  %v6167_v19 = vpack.c.bf16 %v4779_v16, %v4777_v17  ;;  %v4979_v16 = vld [vmem:[#allocation13] sm:$0xff] }
 0x17a   : > { %3497 = vmatpush1.bf16.msra.mxu1 %v6165_v13  ;;  %v735_v10 = vsub.f32 %v731_v45, %v734_v2  ;;  %v738_v20 = vadd.f32 %v737_v32, %v736_v3  ;;  %v871_v15 = vmul.f32 %v869_v55, %v4886_v5  ;;  %v941_v24 = vrot.slane %v869_v55, 7 }
 0x17b   : > { %3561 = vmatpush1.bf16.msra.mxu0 %v6166_v47  ;;  %3499 = vmatprep.subr.bf16.mxu1 %v6167_v19  ;;  %v6168_v12 = vpack.c.bf16 %v4789_v18, %v4781_v8  ;;  %v681_v63 = vrot.slane %v671_v14, %v4550_v33  ;;  %v685_v40 = vrot.slane %v675_v49, %v4550_v33 }
 0x17c   : > { %v705_v58 = vrot.slane %v695_v37, %v4550_v33  ;;  %v709_v31 = vrot.slane %v699_v57, %v4550_v33  ;;  %v743_v17 = vrot.slane %v735_v10, %v4577_v43  ;;  %v747_v26 = vrot.slane %v735_v10, %v4594_v50 }
 0x17d   : > { %3563 = vmatprep.subr.bf16.mxu0 %v6168_v12  ;;  %v767_v11 = vrot.slane %v738_v20, %v4577_v43  ;;  %v771_v8 = vrot.slane %v738_v20, %v4594_v50  ;;  %v6169_v18 = vpack.c.bf16 %v4793_v23, %v4791_v29  ;;  %v4988_v22 = vcombine.low %v681_v63, %v685_v40 }
 0x17e   : > { %v4990_v48 = vcombine.low %v705_v58, %v709_v31  ;;  %v872_v53 = vsub.f32 %v861_v4, %v871_v15  ;;  %v873_v54 = vmul.f32 %v869_v55, %v4884_v35  ;;  %v6171_v21 = vpack.c.bf16 %v4806_v6, %v6170_v56 }
 0x17f   : > { %3501 = vmatpush1.bf16.msra.mxu1 %v6169_v18  ;;  %v753_v27 = vrot.slane %v743_v17, %v4577_v43  ;;  %v757_v28 = vrot.slane %v747_v26, %v4577_v43  ;;  %v777_v62 = vrot.slane %v767_v11, %v4577_v43  ;;  %v781_v29 = vrot.slane %v771_v8, %v4577_v43 }
 0x180   : > { %3565 = vmatpush1.bf16.msra.mxu0 %v6171_v21  ;;  %v690_v23 = vmul.f32 %v4988_v22, %v4977_v51  ;;  %v714_v45 = vmul.f32 %v4990_v48, %v4979_v16  ;;  %v875_v32 = vadd.f32 %v874_v7, %v873_v54  ;;  %v880_v60 = vrot.slane %v872_v53, %v4550_v33 }
 0x181   : > { %v5005_v34 = vcombine.low %v753_v27, %v757_v28  ;;  %v5007_v6 = vcombine.low %v777_v62, %v781_v29  ;;  %v884_v59 = vrot.slane %v872_v53, %v4559_v38  ;;  %v940_v44 = vmul.f32 %v938_v0, %v4884_v35 }
 0x182   : > { %v715_v2 = vsub.f32 %v690_v23, %v714_v45  ;;  %v890_v3 = vrot.slane %v880_v60, %v4550_v33  ;;  %v904_v4 = vrot.slane %v875_v32, %v4550_v33  ;;  %v908_v55 = vrot.slane %v875_v32, %v4559_v38 }
 0x183   : > { %v762_v7 = vmul.f32 %v5005_v34, %v4977_v51  ;;  %v786_v13 = vmul.f32 %v5007_v6, %v4979_v16  ;;  %v894_v14 = vrot.slane %v884_v59, %v4550_v33  ;;  %v943_v49 = vmul.f32 %v941_v24, %v4886_v5 }
 0x184   : > { %v717_v37 = vcombine.high %v715_v2, %v715_v2  ;;  %719 = vst [vmem:[#allocation2] sm:$0xf] %v715_v2  ;;  %v914_v57 = vrot.slane %v904_v4, %v4550_v33  ;;  %v918_v47 = vrot.slane %v908_v55, %v4550_v33  ;;  %v945_v19 = vmul.f32 %v941_v24, %v4884_v35 }
 0x185   : > { %v787_v10 = vsub.f32 %v762_v7, %v786_v13  ;;  %v5023_v20 = vcombine.low %v890_v3, %v894_v14  ;;  %v944_v15 = vsub.f32 %v940_v44, %v943_v49  ;;  %v946_v12 = vmul.f32 %v938_v0, %v4886_v5 }
 0x186   : > { %720 = vst [vmem:[#allocation2 + $0x8] sm:$0xf] %v717_v37  ;;  %v5026_v63 = vcombine.low %v914_v57, %v918_v47  ;;  %v1024_v40 = vadd.f32 %v3367_v25, %v4891_v36  ;;  %v1030_v58 = vadd.f32 %v3368_v61, %v4896_v1  ;;  %v3369_v24 = vrot.slane %v4924_v52, 10 }
 0x187   : > { %792 = vst [vmem:[#allocation2 + $0x8] sm:$0xf0] %v787_v10  ;;  %v789_v31 = vcombine.low %v787_v10, %v787_v10  ;;  %v899_v0 = vmul.f32 %v5023_v20, %v4977_v51  ;;  %v947_v17 = vadd.f32 %v946_v12, %v945_v19  ;;  %v952_v26 = vrot.slane %v944_v15, %v4577_v43 }
 0x188   : > { %v923_v39 = vmul.f32 %v5026_v63, %v4979_v16  ;;  %v956_v36 = vrot.slane %v944_v15, %v4594_v50  ;;  %v1039_v25 = vadd.f32 %v3369_v24, %v1024_v40  ;;  %v6172_v1 = vstv %s4527_s1  ;;  %s5095_s1 = sld [smem:[#allocation3 + %s6182_s0]] }
 0x189   : > { %v1040_v41 = vmul.f32 %v6172_v1, %v4812_v46  ;;  %791 = vst [vmem:[#allocation2] sm:$0xf0] %v789_v31  ;;  %v962_v52 = vrot.slane %v952_v26, %v4577_v43  ;;  %v976_v61 = vrot.slane %v947_v17, %v4577_v43  ;;  %v980_v11 = vrot.slane %v947_v17, %v4594_v50 }
 0x18a   : > { %v6173_v8 = vstv %s4531_s2  ;;  %v924_v53 = vsub.f32 %v899_v0, %v923_v39  ;;  %v966_v54 = vrot.slane %v956_v36, %v4577_v43  ;;  %v6175_v23 = vstv %s4534_s23  ;;  %s5171_s2 = sld [smem:[#allocation3 + %s4507_s12]]  ;;  %s6201_s23 = sadd.s32 3, %s4507_s12 }
 0x18b   : > { %v1049_v18 = vmul.f32 %v6173_v8, %v4808_v9  ;;  %v3370_v56 = vrot.slane %v1040_v41, 10  ;;  %v6174_v21 = vmov %v6173_v8  ;;  %v986_v28 = vrot.slane %v976_v61, %v4577_v43  ;;  %s5254_s21 = sld [smem:[#allocation3 + %s6201_s23]] }
 0x18c   : > { %v1055_v27 = vmul.f32 %v6174_v21, %v4812_v46  ;;  %v990_v62 = vrot.slane %v980_v11, %v4577_v43  ;;  %v1223_v45 = vmul.f32 %v6175_v23, %v4808_v9  ;;  %v926_v32 = vcombine.high %v924_v53, %v924_v53  ;;  %928 = vst [vmem:[#allocation2 + $0x10] sm:$0xf] %v924_v53 }
 0x18d   : > { %v3371_v29 = vrot.slane %v1049_v18, 11  ;;  %v5059_v60 = vcombine.low %v962_v52, %v966_v54  ;;  %v1045_v59 = vadd.f32 %v3370_v56, %v1030_v58  ;;  %v6176_v4 = vmov %v6175_v23 }
 0x18e   : > { %v3372_v44 = vrot.slane %v1055_v27, 11  ;;  %v5061_v2 = vcombine.low %v986_v28, %v990_v62  ;;  %v1224_v55 = vmul.f32 %v6176_v4, %v4812_v46  ;;  %v6177_v7 = vstv %s4538_s4  ;;  %v2257_v14 = vld [vmem:[#allocation2 + $0x8] sm:$0xff]  ;;  %929 = vst [vmem:[#allocation2 + $0x18] sm:$0xf] %v926_v32  ;;  %s6190_s4 = sadd.s32 1, %s4507_s12 }
 0x18f   : > { %v1054_v3 = vadd.f32 %v3371_v29, %v1039_v25  ;;  %v1228_v13 = vmul.f32 %v6177_v7, %v4808_v9  ;;  %v971_v49 = vmul.f32 %v5059_v60, %v4977_v51  ;;  %v6178_v57 = vmov %v6177_v7  ;;  %2416 = vmatprep.mubr.f32.mxu1 %v2257_v14 }
 0x190   : > { %v1060_v37 = vadd.f32 %v3372_v44, %v1045_v59  ;;  %v1234_v47 = vmul.f32 %v6178_v57, %v4812_v46  ;;  %v6179_v19 = vstv %s4542_s6  ;;  %2641 = vmatprep.mubr.f32.mxu0 %v2257_v14  ;;  %v995_v15 = vmul.f32 %v5061_v2, %v4979_v16  ;;  %v2256_v31 = vld [vmem:[#allocation2] sm:$0xff]  ;;  %s5179_s6 = sld [smem:[#allocation3 + %s6190_s4]] }
 0x191   : > { %v1243_v10 = vmul.f32 %v6179_v19, %v4808_v9  ;;  %v1068_v12 = vrot.slane %v1054_v3, %v4575_v42  ;;  %v3374_v40 = vrot.slane %v1228_v13, 9  ;;  %v6180_v58 = vmov %v6179_v19  ;;  %2417 = vmatmul.mubr.f32.vlgmr.msra.gmra.mrb[0].mxu1 %v2256_v31  ;;  %2642 = vmatmul.mubr.f32.vlgmr.msra.gmra.mrb[0].mxu0 %v2256_v31  ;;  %s6250_s4 = sld [smem:[#allocation36_spill]] }
 0x192   : > { %v1249_v24 = vmul.f32 %v6180_v58, %v4812_v46  ;;  %v1078_v0 = vrot.slane %v1060_v37, %v4575_v42  ;;  %v3375_v17 = vrot.slane %v1234_v47, 9  ;;  %v6181_v39 = vstv %s4546_s8 }
 0x193   : > { %v3376_v26 = vrot.slane %v1243_v10, 10  ;;  %v1258_v36 = vmul.f32 %v6181_v39, %v4808_v9  ;;  %v996_v25 = vsub.f32 %v971_v49, %v995_v15  ;;  %v1070_v1 = vmul.f32 %v1068_v12, %v4884_v35 }
 0x194   : > { %v1083_v41 = vmul.f32 %v1068_v12, %v4886_v5  ;;  %v1147_v52 = vrot.slane %v1068_v12, 7  ;;  %v1080_v61 = vmul.f32 %v1078_v0, %v4886_v5  ;;  %v1082_v11 = vmul.f32 %v1078_v0, %v4884_v35 }
 0x195   : > { %v1150_v8 = vrot.slane %v1078_v0, 7  ;;  %v1233_v18 = vadd.f32 %v3374_v40, %v1223_v45  ;;  %1001 = vst [vmem:[#allocation2 + $0x18] sm:$0xf0] %v996_v25  ;;  %v998_v53 = vcombine.low %v996_v25, %v996_v25  ;;  %v1239_v56 = vadd.f32 %v3375_v17, %v1224_v55 }
 0x196   : > { %v1149_v9 = vmul.f32 %v1147_v52, %v4884_v35  ;;  %v1155_v54 = vmul.f32 %v1147_v52, %v4886_v5  ;;  %v1081_v21 = vsub.f32 %v1070_v1, %v1080_v61  ;;  %v1084_v27 = vadd.f32 %v1083_v41, %v1082_v11 }
 0x197   : > { %v1152_v28 = vmul.f32 %v1150_v8, %v4886_v5  ;;  %v1154_v62 = vmul.f32 %v1150_v8, %v4884_v35  ;;  %1000 = vst [vmem:[#allocation2 + $0x10] sm:$0xf0] %v998_v53  ;;  %v1248_v29 = vadd.f32 %v3376_v26, %v1233_v18  ;;  %v3377_v23 = vrot.slane %v1249_v24, 10  ;;  %p6253_p10 = scmp.ne.s32.totalorder %s6250_s4, 0 }
 0x198   : > { %v3378_v45 = vrot.slane %v1258_v36, 11  ;;  %v6183_v32 = vmov %v6181_v39  ;;  %v1089_v44 = vrot.slane %v1081_v21, %v4550_v33  ;;  %v1093_v3 = vrot.slane %v1081_v21, %v4559_v38 }
 0x199   : > { %v1264_v59 = vmul.f32 %v6183_v32, %v4812_v46  ;;  %v1113_v4 = vrot.slane %v1084_v27, %v4550_v33  ;;  %v1117_v55 = vrot.slane %v1084_v27, %v4559_v38  ;;  %v1153_v7 = vsub.f32 %v1149_v9, %v1152_v28  ;;  %v5132_v9 = vld [vmem:[#allocation7 + $0x8] sm:$0xff]  ;;  %v5137_v27 = vld [vmem:[#allocation8 + $0x8] sm:$0xff] }
 0x19a   : > { %v1156_v13 = vadd.f32 %v1155_v54, %v1154_v62  ;;  %v1254_v14 = vadd.f32 %v3377_v23, %v1239_v56  ;;  %v1263_v49 = vadd.f32 %v3378_v45, %v1248_v29  ;;  %v1099_v37 = vrot.slane %v1089_v44, %v4550_v33 }
 0x19b   : > { %v1103_v57 = vrot.slane %v1093_v3, %v4550_v33  ;;  %v1123_v47 = vrot.slane %v1113_v4, %v4550_v33  ;;  %v1127_v46 = vrot.slane %v1117_v55, %v4550_v33  ;;  %v1161_v19 = vrot.slane %v1153_v7, %v4577_v43 }
 0x19c   : > { %v1165_v10 = vrot.slane %v1153_v7, %v4594_v50  ;;  %v1185_v15 = vrot.slane %v1156_v13, %v4577_v43  ;;  %v1189_v12 = vrot.slane %v1156_v13, %v4594_v50  ;;  %v2259_v40 = vld [vmem:[#allocation2 + $0x18] sm:$0xff]  ;;  %v3379_v31 = vrot.slane %v1264_v59, 11 }
 0x19d   : > { %v5114_v58 = vcombine.low %v1099_v37, %v1103_v57  ;;  %v5116_v24 = vcombine.low %v1123_v47, %v1127_v46  ;;  %v1277_v0 = vrot.slane %v1263_v49, %v4575_v42  ;;  %2422 = vmatprep.mubr.f32.mxu1 %v2259_v40  ;;  %2647 = vmatprep.mubr.f32.mxu0 %v2259_v40  ;;  %v1881_v36 = vstv %s5095_s1 }
 0x19e   : > { %v1171_v17 = vrot.slane %v1161_v19, %v4577_v43  ;;  %v1175_v26 = vrot.slane %v1165_v10, %v4577_v43  ;;  %v1195_v39 = vrot.slane %v1185_v15, %v4577_v43  ;;  %v2258_v25 = vld [vmem:[#allocation2 + $0x10] sm:$0xff]  ;;  %v1199_v52 = vrot.slane %v1189_v12, %v4577_v43 }
 0x19f   : > { %v1108_v1 = vmul.f32 %v5114_v58, %v4977_v51  ;;  %v1132_v41 = vmul.f32 %v5116_v24, %v4979_v16  ;;  %v1269_v61 = vadd.f32 %v3379_v31, %v1254_v14  ;;  %2423 = vmatmul.mubr.f32.gmra.mrb[2].mxu1 %v2258_v25  ;;  %2648 = vmatmul.mubr.f32.gmra.mrb[2].mxu0 %v2258_v25  ;;  %v1356_v53 = vrot.slane %v1277_v0, 7 }
 0x1a0   : > { %v5128_v11 = vcombine.low %v1171_v17, %v1175_v26  ;;  %v1279_v8 = vmul.f32 %v1277_v0, %v4884_v35  ;;  %v1292_v18 = vmul.f32 %v1277_v0, %v4886_v5  ;;  %v5134_v56 = vcombine.low %v1195_v39, %v1199_v52 }
 0x1a1   : > { %v1133_v54 = vsub.f32 %v1108_v1, %v1132_v41  ;;  %v1287_v21 = vrot.slane %v1269_v61, %v4575_v42  ;;  %v6184_v28 = vstv %s4553_s30  ;;  %v1358_v23 = vmul.f32 %v1356_v53, %v4884_v35 }
 0x1a2   : > { %v1442_v62 = vmul.f32 %v6184_v28, %v5132_v9  ;;  %v1180_v29 = vmul.f32 %v5128_v11, %v4977_v51  ;;  %v1364_v45 = vmul.f32 %v1356_v53, %v4886_v5  ;;  %v6185_v32 = vmov %v6184_v28 }
 0x1a3   : > { %v1443_v59 = vmul.f32 %v6185_v32, %v5137_v27  ;;  %v1135_v44 = vcombine.high %v1133_v54, %v1133_v54  ;;  %v1204_v3 = vmul.f32 %v5134_v56, %v4979_v16  ;;  %1137 = vst [vmem:[#allocation2 + $0x20] sm:$0xf] %v1133_v54  ;;  %v1289_v4 = vmul.f32 %v1287_v21, %v4886_v5 }
 0x1a4   : > { %v1291_v55 = vmul.f32 %v1287_v21, %v4884_v35  ;;  %v1359_v7 = vrot.slane %v1287_v21, 7  ;;  %v6186_v13 = vstv %s4557_s20  ;;  %v6188_v57 = vstv %s4563_s10 }
 0x1a5   : > { %v1446_v14 = vmul.f32 %v6186_v13, %v5132_v9  ;;  %v6187_v49 = vmov %v6186_v13  ;;  %v1460_v47 = vmul.f32 %v6188_v57, %v5132_v9  ;;  %1138 = vst [vmem:[#allocation2 + $0x28] sm:$0xf] %v1135_v44  ;;  %v1205_v46 = vsub.f32 %v1180_v29, %v1204_v3 }
 0x1a6   : > { %v1452_v37 = vmul.f32 %v6187_v49, %v5137_v27  ;;  %v1290_v19 = vsub.f32 %v1279_v8, %v1289_v4  ;;  %v1293_v10 = vadd.f32 %v1292_v18, %v1291_v55  ;;  %v6189_v15 = vmov %v6188_v57 }
 0x1a7   : > { %v1466_v12 = vmul.f32 %v6189_v15, %v5137_v27  ;;  %v1361_v40 = vmul.f32 %v1359_v7, %v4886_v5  ;;  %v1363_v31 = vmul.f32 %v1359_v7, %v4884_v35  ;;  %v3381_v0 = vrot.slane %v1446_v14, 9  ;;  %1210 = vst [vmem:[#allocation2 + $0x28] sm:$0xf0] %v1205_v46 }
 0x1a8   : > { %v3382_v17 = vrot.slane %v1452_v37, 9  ;;  %v1207_v26 = vcombine.low %v1205_v46, %v1205_v46  ;;  %v1298_v39 = vrot.slane %v1290_v19, %v4550_v33  ;;  %v1302_v25 = vrot.slane %v1290_v19, %v4559_v38 }
 0x1a9   : > { %v1322_v1 = vrot.slane %v1293_v10, %v4550_v33  ;;  %v1326_v41 = vrot.slane %v1293_v10, %v4559_v38  ;;  %v1362_v52 = vsub.f32 %v1358_v23, %v1361_v40  ;;  %v1365_v61 = vadd.f32 %v1364_v45, %v1363_v31 }
 0x1aa   : > { %v1451_v5 = vadd.f32 %v3381_v0, %v1442_v62  ;;  %1209 = vst [vmem:[#allocation2 + $0x20] sm:$0xf0] %v1207_v26  ;;  %v1308_v35 = vrot.slane %v1298_v39, %v4550_v33  ;;  %v1312_v8 = vrot.slane %v1302_v25, %v4550_v33  ;;  %v1457_v53 = vadd.f32 %v3382_v17, %v1443_v59 }
 0x1ab   : > { %v1332_v18 = vrot.slane %v1322_v1, %v4550_v33  ;;  %v1336_v54 = vrot.slane %v1326_v41, %v4550_v33  ;;  %v1370_v21 = vrot.slane %v1362_v52, %v4577_v43  ;;  %v1374_v28 = vrot.slane %v1362_v52, %v4594_v50 }
 0x1ac   : > { %v1394_v29 = vrot.slane %v1365_v61, %v4577_v43  ;;  %v5185_v62 = vcombine.low %v1308_v35, %v1312_v8  ;;  %v1398_v23 = vrot.slane %v1365_v61, %v4594_v50  ;;  %v3383_v45 = vrot.slane %v1460_v47, 10 }
 0x1ad   : > { %v3384_v32 = vrot.slane %v1466_v12, 10  ;;  %v5188_v59 = vcombine.low %v1332_v18, %v1336_v54  ;;  %v1380_v44 = vrot.slane %v1370_v21, %v4577_v43  ;;  %v1384_v3 = vrot.slane %v1374_v28, %v4577_v43 }
 0x1ae   : > { %v1404_v4 = vrot.slane %v1394_v29, %v4577_v43  ;;  %v1317_v55 = vmul.f32 %v5185_v62, %v4977_v51  ;;  %v1408_v7 = vrot.slane %v1398_v23, %v4577_v43  ;;  %v1465_v13 = vadd.f32 %v3383_v45, %v1451_v5  ;;  %v2261_v49 = vld [vmem:[#allocation2 + $0x28] sm:$0xff] }
 0x1af   : > { %v1471_v14 = vadd.f32 %v3384_v32, %v1457_v53  ;;  %v1341_v37 = vmul.f32 %v5188_v59, %v4979_v16  ;;  %v5198_v57 = vcombine.low %v1380_v44, %v1384_v3  ;;  %v6191_v47 = vstv %s4567_s26  ;;  %2428 = vmatprep.mubr.f32.mxu1 %v2261_v49  ;;  %2653 = vmatprep.mubr.f32.mxu0 %v2261_v49  ;;  %v5232_v45 = vld [vmem:[%s6032_s3 + $0x4] sm:$0xf]  ;;  %v5234_v32 = vld [vmem:[#allocation10 + $0x4] sm:$0xf]  ;;  %s6200_s26 = sadd.s32 2, %s4507_s12 }
 0x1b0   : > { %v1474_v46 = vmul.f32 %v6191_v47, %v5132_v9  ;;  %v6192_v19 = vmov %v6191_v47  ;;  %v5206_v15 = vcombine.low %v1404_v4, %v1408_v7  ;;  %v6193_v12 = vstv %s4580_s5  ;;  %s5246_s20 = sld [smem:[#allocation3 + %s6200_s26]] }
 0x1b1   : > { %v1480_v10 = vmul.f32 %v6192_v19, %v5137_v27  ;;  %v1646_v40 = vmul.f32 %v6193_v12, %v5132_v9  ;;  %v6194_v31 = vmov %v6193_v12  ;;  %v2053_v17 = vstv %s5171_s2  ;;  %v2260_v26 = vld [vmem:[#allocation2 + $0x20] sm:$0xff]  ;;  %s6208_s5 = sld [smem:[#allocation60_spill]]  ;;  %s6249_s2 = sld [smem:[#allocation65_spill]] }
 0x1b2   : > { %v1647_v0 = vmul.f32 %v6194_v31, %v5137_v27  ;;  %v1342_v39 = vsub.f32 %v1317_v55, %v1341_v37  ;;  %v1389_v25 = vmul.f32 %v5198_v57, %v4977_v51  ;;  %v3385_v1 = vrot.slane %v1474_v46, 11  ;;  %2429 = vmatmul.mubr.f32.gmra.mrb[4].mxu1 %v2260_v26  ;;  %2654 = vmatmul.mubr.f32.gmra.mrb[4].mxu0 %v2260_v26  ;;  %s6251_s26 = sld [smem:[#allocation66_spill]] }
 0x1b3   : > { %v3386_v41 = vrot.slane %v1480_v10, 11  ;;  %v1413_v52 = vmul.f32 %v5206_v15, %v4979_v16  ;;  %v6195_v61 = vstv %s4584_s15  ;;  %v2057_v18 = vstv %s5179_s6 }
 0x1b4   : > { %v1650_v5 = vmul.f32 %v6195_v61, %v5132_v9  ;;  %v6196_v35 = vmov %v6195_v61  ;;  %v1344_v53 = vcombine.high %v1342_v39, %v1342_v39  ;;  %1346 = vst [vmem:[#allocation2 + $0x30] sm:$0xf] %v1342_v39  ;;  %v1479_v54 = vadd.f32 %v3385_v1, %v1465_v13 }
 0x1b5   : > { %v1656_v8 = vmul.f32 %v6196_v35, %v5137_v27  ;;  %v1485_v21 = vadd.f32 %v3386_v41, %v1471_v14  ;;  %v6197_v28 = vstv %s4598_s25  ;;  %v1414_v23 = vsub.f32 %v1389_v25, %v1413_v52 }
 0x1b6   : > { %v1664_v29 = vmul.f32 %v6197_v28, %v5132_v9  ;;  %v3387_v44 = vrot.slane %v1650_v5, 9  ;;  %v6198_v4 = vmov %v6197_v28  ;;  %1347 = vst [vmem:[#allocation2 + $0x38] sm:$0xf] %v1344_v53  ;;  %v1493_v7 = vrot.slane %v1479_v54, %v4575_v42 }
 0x1b7   : > { %v3388_v3 = vrot.slane %v1656_v8, 9  ;;  %v1670_v55 = vmul.f32 %v6198_v4, %v5137_v27  ;;  %v1503_v13 = vrot.slane %v1485_v21, %v4575_v42  ;;  %v6199_v49 = vstv %s4602_s9  ;;  %1419 = vst [vmem:[#allocation2 + $0x38] sm:$0xf0] %v1414_v23  ;;  %s3348_s9 = sshll.u32 %s4198_s29, 2  ;;  %s5943_s6 = scalar_lea.hbm %s6249_s2, %s3432_s28 }
 0x1b8   : > { %v3389_v14 = vrot.slane %v1664_v29, 10  ;;  %v1678_v37 = vmul.f32 %v6199_v49, %v5132_v9  ;;  %v1416_v47 = vcombine.low %v1414_v23, %v1414_v23  ;;  %v1655_v46 = vadd.f32 %v3387_v44, %v1646_v40  ;;  %p578_p13 = scmp.lt.s32.totalorder %s3348_s9, 7  ;;  %s5950_s23 = scalar_lea.hbm %s6251_s26, %s3432_s28 }
 0x1b9   : > { %v1661_v19 = vadd.f32 %v3388_v3, %v1647_v0  ;;  %v3390_v10 = vrot.slane %v1670_v55, 10  ;;  %v1495_v12 = vmul.f32 %v5232_v45, %v1493_v7  ;;  %v1505_v31 = vmul.f32 %v1503_v13, %v5234_v32 }
 0x1ba   : > { %v1507_v26 = vmul.f32 %v5232_v45, %v1503_v13  ;;  %v1508_v39 = vmul.f32 %v1493_v7, %v5234_v32  ;;  %1418 = vst [vmem:[#allocation2 + $0x30] sm:$0xf0] %v1416_v47  ;;  %v1572_v25 = vrot.slane %v1493_v7, 7  ;;  %v1575_v1 = vrot.slane %v1503_v13, 7  ;;  %s6263_s9 = smov (!%p578_p13, %s3348_s9), 7 }
 0x1bb   : > { %v1669_v41 = vadd.f32 %v3389_v14, %v1655_v46  ;;  %v1675_v52 = vadd.f32 %v3390_v10, %v1661_v19  ;;  %v1506_v40 = vsub.f32 %v1495_v12, %v1505_v31  ;;  %v3391_v61 = vrot.slane %v1678_v37, 11  ;;  %v5271_v46 = vld [vmem:[#allocation11 + $0x8] sm:$0xff]  ;;  %v5273_v19 = vld [vmem:[#allocation13 + $0x8] sm:$0xff]  ;;  %s3423_s12 = sshll.u32 %s6263_s9, 2 }
 0x1bc   : > { %v1509_v0 = vadd.f32 %v1508_v39, %v1507_v26  ;;  %v6202_v5 = vmov %v6199_v49  ;;  %v1574_v8 = vmul.f32 %v5232_v45, %v1572_v25  ;;  %v1577_v53 = vmul.f32 %v1575_v1, %v5234_v32  ;;  %s582_s18 = scalar_lea.vmem %s6207_s16, %s3423_s12  ;;  %s4103_s12 = smov [#allocation19]  }
 0x1bd   : > { %v1684_v35 = vmul.f32 %v6202_v5, %v5137_v27  ;;  %v1579_v54 = vmul.f32 %v5232_v45, %v1575_v1  ;;  %v1580_v21 = vmul.f32 %v1572_v25, %v5234_v32  ;;  %v1514_v28 = vrot.slane %v1506_v40, %v4550_v33  ;;  %s3971_s27 = sshll.u32 %s4103_s12, 4  ;;  %s3972_s27 = int_to_ptr.vmem [resolvable:$false] %s3971_s27 }
 0x1be   : > { %v1518_v29 = vrot.slane %v1506_v40, %v4559_v38  ;;  %v1538_v23 = vrot.slane %v1509_v0, %v4550_v33  ;;  %v1542_v44 = vrot.slane %v1509_v0, %v4559_v38  ;;  %v1578_v3 = vsub.f32 %v1574_v8, %v1577_v53  ;;  %v2263_v13 = vld [vmem:[#allocation2 + $0x38] sm:$0xff]  ;;  %s3973_s22 = scalar_lea.vmem %s3972_s27, 2048 }
 0x1bf   : > { %v1581_v4 = vadd.f32 %v1580_v21, %v1579_v54  ;;  %v1683_v55 = vadd.f32 %v3391_v61, %v1669_v41  ;;  %v3392_v7 = vrot.slane %v1684_v35, 11  ;;  %v1524_v14 = vrot.slane %v1514_v28, %v4550_v33  ;;  %2434 = vmatprep.mubr.f32.mxu1 %v2263_v13  ;;  %2659 = vmatprep.mubr.f32.mxu0 %v2263_v13 }
 0x1c0   : > { %v1528_v49 = vrot.slane %v1518_v29, %v4550_v33  ;;  %v1548_v37 = vrot.slane %v1538_v23, %v4550_v33  ;;  %v1552_v47 = vrot.slane %v1542_v44, %v4550_v33  ;;  %v1586_v10 = vrot.slane %v1578_v3, %v4577_v43 }
 0x1c1   : > { %v1590_v12 = vrot.slane %v1578_v3, %v4594_v50  ;;  %v1610_v31 = vrot.slane %v1581_v4, %v4577_v43  ;;  %v2071_v26 = vstv %s5246_s20  ;;  %v2262_v39 = vld [vmem:[#allocation2 + $0x30] sm:$0xff]  ;;  %v1614_v41 = vrot.slane %v1581_v4, %v4594_v50  ;;  %s6252_s20 = smov %s6251_s26 }
 0x1c2   : > { %v5279_v25 = vcombine.low %v1524_v14, %v1528_v49  ;;  %v5281_v1 = vcombine.low %v1548_v37, %v1552_v47  ;;  %v1689_v40 = vadd.f32 %v3392_v7, %v1675_v52  ;;  %2435 = vmatmul.mubr.f32.gmra.mrb[6].mxu1 %v2262_v39  ;;  %2660 = vmatmul.mubr.f32.gmra.mrb[6].mxu0 %v2262_v39  ;;  %v2085_v35 = vstv %s5254_s21 }
 0x1c3   : > { %v1596_v0 = vrot.slane %v1586_v10, %v4577_v43  ;;  %v1600_v61 = vrot.slane %v1590_v12, %v4577_v43  ;;  %v1620_v5 = vrot.slane %v1610_v31, %v4577_v43  ;;  %v1624_v54 = vrot.slane %v1614_v41, %v4577_v43 }
 0x1c4   : > { %v1533_v8 = vmul.f32 %v5279_v25, %v5271_v46  ;;  %v1557_v53 = vmul.f32 %v5281_v1, %v5273_v19  ;;  %v1697_v21 = vrot.slane %v1683_v55, %v4575_v42  ;;  %v1707_v28 = vrot.slane %v1689_v40, %v4575_v42 }
 0x1c5   : > { %v5294_v52 = vcombine.low %v1596_v0, %v1600_v61  ;;  %v6203_v29 = vstv %s4614_s24  ;;  %v5303_v7 = vcombine.low %v1620_v5, %v1624_v54  ;;  %v6205_v39 = vstv %s4680_s7  ;;  %s6222_s24 = sld [smem:[#allocation31_spill]] }
 0x1c6   : > { %v1850_v23 = vmul.f32 %v6203_v29, %v5132_v9  ;;  %v6204_v44 = vmov %v6203_v29  ;;  %v1558_v4 = vsub.f32 %v1533_v8, %v1557_v53  ;;  %v1699_v13 = vmul.f32 %v5232_v45, %v1697_v21 }
 0x1c7   : > { %v1851_v3 = vmul.f32 %v6204_v44, %v5137_v27  ;;  %v1712_v14 = vmul.f32 %v1697_v21, %v5234_v32  ;;  %v1605_v55 = vmul.f32 %v5294_v52, %v5271_v46  ;;  %v1709_v49 = vmul.f32 %v1707_v28, %v5234_v32 }
 0x1c8   : > { %v1711_v37 = vmul.f32 %v5232_v45, %v1707_v28  ;;  %v1776_v47 = vrot.slane %v1697_v21, 7  ;;  %v1560_v10 = vcombine.high %v1558_v4, %v1558_v4  ;;  %v1629_v12 = vmul.f32 %v5303_v7, %v5273_v19  ;;  %1562 = vst [vmem:[#allocation2 + $0x40] sm:$0xf] %v1558_v4 }
 0x1c9   : > { %v1779_v31 = vrot.slane %v1707_v28, 7  ;;  %v1854_v41 = vmul.f32 %v6205_v39, %v5132_v9  ;;  %v1710_v40 = vsub.f32 %v1699_v13, %v1709_v49 }
 0x1ca   : > { %v1713_v0 = vadd.f32 %v1712_v14, %v1711_v37  ;;  %v1778_v61 = vmul.f32 %v5232_v45, %v1776_v47  ;;  %v1784_v5 = vmul.f32 %v1776_v47, %v5234_v32  ;;  %1563 = vst [vmem:[#allocation2 + $0x48] sm:$0xf] %v1560_v10  ;;  %v1630_v8 = vsub.f32 %v1605_v55, %v1629_v12 }
 0x1cb   : > { %v1781_v53 = vmul.f32 %v1779_v31, %v5234_v32  ;;  %v1783_v54 = vmul.f32 %v5232_v45, %v1779_v31  ;;  %v3393_v21 = vrot.slane %v1854_v41, 9  ;;  %v1718_v29 = vrot.slane %v1710_v40, %v4550_v33  ;;  %s5788_s11 = sand.u32 1, %s6222_s24  }
 0x1cc   : > { %v1722_v28 = vrot.slane %v1710_v40, %v4559_v38  ;;  %v1742_v44 = vrot.slane %v1713_v0, %v4550_v33  ;;  %v1746_v4 = vrot.slane %v1713_v0, %v4559_v38  ;;  %1635 = vst [vmem:[#allocation2 + $0x48] sm:$0xf0] %v1630_v8  ;;  %v1632_v13 = vcombine.low %v1630_v8, %v1630_v8  ;;  %s3100_s21 = scalar_lea.sflag [#allocation5], %s5788_s11 }
 0x1cd   : > { %v1782_v14 = vsub.f32 %v1778_v61, %v1781_v53  ;;  %v1785_v49 = vadd.f32 %v1784_v5, %v1783_v54  ;;  %v1859_v55 = vadd.f32 %v3393_v21, %v1850_v23  ;;  %v1728_v37 = vrot.slane %v1718_v29, %v4550_v33 }
 0x1ce   : > { %v1732_v47 = vrot.slane %v1722_v28, %v4550_v33  ;;  %v1752_v10 = vrot.slane %v1742_v44, %v4550_v33  ;;  %v1756_v12 = vrot.slane %v1746_v4, %v4550_v33  ;;  %1634 = vst [vmem:[#allocation2 + $0x40] sm:$0xf0] %v1632_v13  ;;  %v6206_v61 = vstv %s4680_s7  ;;  %s3346_s7 = sshll.u32 %s5788_s11, 6 }
 0x1cf   : > { %v1790_v31 = vrot.slane %v1782_v14, %v4577_v43  ;;  %v1794_v39 = vrot.slane %v1782_v14, %v4594_v50  ;;  %v1814_v41 = vrot.slane %v1785_v49, %v4577_v43  ;;  %v1818_v40 = vrot.slane %v1785_v49, %v4594_v50  ;;  %s5827_s17 = scalar_lea.vmem [#allocation19], %s3346_s7  ;;  %s5832_s13 = scalar_lea.vmem [#allocation20], %s3346_s7 }
 0x1d0   : > { %v5332_v23 = vcombine.low %v1728_v37, %v1732_v47  ;;  %v5334_v0 = vcombine.low %v1752_v10, %v1756_v12  ;;  %v1860_v5 = vmul.f32 %v6206_v61, %v5137_v27  ;;  %v1868_v8 = vmul.f32 %v1867_v30, %v5132_v9  ;;  %s3119_s19 = sshll.u32 %s5827_s17, 4  ;;  %s3136_s0 = sshll.u32 %s5832_s13, 4  ;;  %s5945_s19 = int_to_ptr.vmem [resolvable:$true] %s3119_s19  ;;  %s5952_s0 = int_to_ptr.vmem [resolvable:$true] %s3136_s0 }
 0x1d1   : > { %v1800_v53 = vrot.slane %v1790_v31, %v4577_v43  ;;  %v1804_v54 = vrot.slane %v1794_v39, %v4577_v43  ;;  %v1824_v21 = vrot.slane %v1814_v41, %v4577_v43  ;;  %v1828_v29 = vrot.slane %v1818_v40, %v4577_v43  ;;  %s3967_s9 = scalar_lea.vmem %s5945_s19, 1024  ;;  %p3974_p6 = scmp.lt.s32.totalorder %s5945_s19, %s3972_s27 }
 0x1d2   : > { %v1737_v28 = vmul.f32 %v5332_v23, %v5271_v46  ;;  %v1761_v44 = vmul.f32 %v5334_v0, %v5273_v19  ;;  %v3394_v4 = vrot.slane %v1860_v5, 9  ;;  %v3395_v13 = vrot.slane %v1868_v8, 10  ;;  %p3968_p5 = scmp.ne.s32.totalorder %s5945_s19, %s3967_s9  ;;  %p3975_p9 = scmp.lt.s32.totalorder %s3973_s22, %s3967_s9 }
 0x1d3   : > { %v5350_v14 = vcombine.low %v1800_v53, %v1804_v54  ;;  %v5352_v49 = vcombine.low %v1824_v21, %v1828_v29  ;;  %v1874_v37 = vmul.f32 %v1867_v30, %v5137_v27  ;;  %v1882_v47 = vmul.f32 %v1881_v36, %v5132_v9  ;;  %v2265_v10 = vld [vmem:[#allocation2 + $0x48] sm:$0xff] }
 0x1d4   : > { %v1762_v12 = vsub.f32 %v1737_v28, %v1761_v44  ;;  %v1865_v31 = vadd.f32 %v3394_v4, %v1851_v3  ;;  %v1873_v39 = vadd.f32 %v3395_v13, %v1859_v55  ;;  %v1888_v41 = vmul.f32 %v1881_v36, %v5137_v27  ;;  %2440 = vmatprep.mubr.f32.mxu1 %v2265_v10  ;;  %p3969_p0 = pnand %p3968_p5, %p6253_p10  ;;  %p3976_p12 = por %p3975_p9, %p3974_p6 }
 0x1d5   : > { %2665 = vmatprep.mubr.f32.mxu0 %v2265_v10  ;;  %v1809_v40 = vmul.f32 %v5350_v14, %v5271_v46  ;;  %v1833_v30 = vmul.f32 %v5352_v49, %v5273_v19  ;;  %v3396_v61 = vrot.slane %v1874_v37, 10  ;;  %v3397_v5 = vrot.slane %v1882_v47, 11  ;;  %v2264_v8 = vld [vmem:[#allocation2 + $0x40] sm:$0xff] }
 0x1d6   : > { %v1764_v3 = vcombine.high %v1762_v12, %v1762_v12  ;;  %1766 = vst [vmem:[#allocation2 + $0x50] sm:$0xf] %v1762_v12  ;;  %v3398_v55 = vrot.slane %v1888_v41, 11  ;;  %v2054_v36 = vmul.f32 %v2053_v17, %v5132_v9  ;;  %v2055_v53 = vmul.f32 %v2053_v17, %v5137_v27  ;;  %2441 = vmatmul.mubr.f32.gmra.mrb[8].mxu1 %v2264_v8  ;;  %p3970_p1 = pneg %p3969_p0 }
 0x1d7   : > { %2666 = vmatmul.mubr.f32.gmra.mrb[8].mxu0 %v2264_v8  ;;  %v1834_v54 = vsub.f32 %v1809_v40, %v1833_v30  ;;  %v1879_v21 = vadd.f32 %v3396_v61, %v1865_v31  ;;  %v1887_v29 = vadd.f32 %v3397_v5, %v1873_v39  ;;  %v2058_v28 = vmul.f32 %v2057_v18, %v5132_v9 }
 0x1d8   : > { %1767 = vst [vmem:[#allocation2 + $0x58] sm:$0xf] %v1764_v3  ;;  %v2064_v44 = vmul.f32 %v2057_v18, %v5137_v27  ;;  %v2072_v4 = vmul.f32 %v2071_v26, %v5132_v9  ;;  %v2078_v13 = vmul.f32 %v2071_v26, %v5137_v27  ;;  %v2086_v10 = vmul.f32 %v2085_v35, %v5132_v9  ;;  %p3977_p2 = pnand %p3976_p12, %p3970_p1 }
 0x1d9   : > { %1839 = vst [vmem:[#allocation2 + $0x58] sm:$0xf0] %v1834_v54  ;;  %v1836_v17 = vcombine.low %v1834_v54, %v1834_v54  ;;  %v1893_v37 = vadd.f32 %v3398_v55, %v1879_v21  ;;  %v1901_v47 = vrot.slane %v1887_v29, %v4575_v42  ;;  %v3399_v12 = vrot.slane %v2058_v28, 9 }
 0x1da   : > { %v3400_v31 = vrot.slane %v2064_v44, 9  ;;  %v3401_v39 = vrot.slane %v2072_v4, 10  ;;  %v3402_v41 = vrot.slane %v2078_v13, 10  ;;  %v3403_v8 = vrot.slane %v2086_v10, 11 }
 0x1db   : > { %1838 = vst [vmem:[#allocation2 + $0x50] sm:$0xf0] %v1836_v17  ;;  %v1903_v18 = vmul.f32 %v5232_v45, %v1901_v47  ;;  %v1911_v40 = vrot.slane %v1893_v37, %v4575_v42  ;;  %v1916_v26 = vmul.f32 %v1901_v47, %v5234_v32  ;;  %v1980_v30 = vrot.slane %v1901_v47, 7 }
 0x1dc   : > { %v2063_v61 = vadd.f32 %v3399_v12, %v2054_v36  ;;  %v2069_v5 = vadd.f32 %v3400_v31, %v2055_v53  ;;  %v2092_v3 = vmul.f32 %v2085_v35, %v5137_v27  ;;  %v721_v47 = vmul.f32 %v4990_v48, %v4977_v51 }
 0x1dd   : > { %v1913_v9 = vmul.f32 %v1911_v40, %v5234_v32  ;;  %v1915_v55 = vmul.f32 %v5232_v45, %v1911_v40  ;;  %v1982_v54 = vmul.f32 %v5232_v45, %v1980_v30  ;;  %v1983_v21 = vrot.slane %v1911_v40, 7 }
 0x1de   : > { %v1988_v29 = vmul.f32 %v1980_v30, %v5234_v32  ;;  %v2077_v28 = vadd.f32 %v3401_v39, %v2063_v61  ;;  %v2083_v44 = vadd.f32 %v3402_v41, %v2069_v5  ;;  %v3404_v4 = vrot.slane %v2092_v3, 11 }
 0x1df   : > { %v1914_v13 = vsub.f32 %v1903_v18, %v1913_v9  ;;  %v1917_v17 = vadd.f32 %v1916_v26, %v1915_v55  ;;  %v1985_v36 = vmul.f32 %v1983_v21, %v5234_v32  ;;  %v1987_v53 = vmul.f32 %v5232_v45, %v1983_v21 }
 0x1e0   : > { %v2267_v37 = vld [vmem:[#allocation2 + $0x58] sm:$0xff]  ;;  %v2091_v27 = vadd.f32 %v3403_v8, %v2077_v28  ;;  %v2097_v35 = vadd.f32 %v3404_v4, %v2083_v44  ;;  %v722_v10 = vmul.f32 %v4988_v22, %v4979_v16 }
 0x1e1   : > { %2446 = vmatprep.mubr.f32.mxu1 %v2267_v37  ;;  %2671 = vmatprep.mubr.f32.mxu0 %v2267_v37  ;;  %v1922_v12 = vrot.slane %v1914_v13, %v4550_v33  ;;  %v1926_v31 = vrot.slane %v1914_v13, %v4559_v38  ;;  %v1946_v39 = vrot.slane %v1917_v17, %v4550_v33 }
 0x1e2   : > { %v2266_v41 = vld [vmem:[#allocation2 + $0x50] sm:$0xff]  ;;  %v1950_v18 = vrot.slane %v1917_v17, %v4559_v38  ;;  %v1986_v40 = vsub.f32 %v1982_v54, %v1985_v36  ;;  %v1989_v26 = vadd.f32 %v1988_v29, %v1987_v53  ;;  %v2105_v30 = vrot.slane %v2091_v27, %v4575_v42 }
 0x1e3   : > { %2447 = vmatmul.mubr.f32.gmra.mrb[10].mxu1 %v2266_v41  ;;  %2672 = vmatmul.mubr.f32.gmra.mrb[10].mxu0 %v2266_v41  ;;  %v1932_v48 = vrot.slane %v1922_v12, %v4550_v33  ;;  %v1936_v22 = vrot.slane %v1926_v31, %v4550_v33  ;;  %v1956_v61 = vrot.slane %v1946_v39, %v4550_v33 }
 0x1e4   : > { %v1960_v5 = vrot.slane %v1950_v18, %v4550_v33  ;;  %v1994_v8 = vrot.slane %v1986_v40, %v4577_v43  ;;  %v1998_v3 = vrot.slane %v1986_v40, %v4594_v50  ;;  %v2018_v9 = vrot.slane %v1989_v26, %v4577_v43 }
 0x1e5   : > { %v5417_v55 = vcombine.low %v1932_v48, %v1936_v22  ;;  %v2022_v54 = vrot.slane %v1989_v26, %v4594_v50  ;;  %v2107_v21 = vmul.f32 %v5232_v45, %v2105_v30  ;;  %v2115_v29 = vrot.slane %v2097_v35, %v4575_v42 }
 0x1e6   : > { %v5422_v28 = vcombine.low %v1956_v61, %v1960_v5  ;;  %v2004_v44 = vrot.slane %v1994_v8, %v4577_v43  ;;  %v2008_v4 = vrot.slane %v1998_v3, %v4577_v43  ;;  %v2028_v13 = vrot.slane %v2018_v9, %v4577_v43 }
 0x1e7   : > { %v1941_v17 = vmul.f32 %v5417_v55, %v5271_v46  ;;  %v2032_v36 = vrot.slane %v2022_v54, %v4577_v43  ;;  %v2117_v53 = vmul.f32 %v2115_v29, %v5234_v32  ;;  %v2119_v37 = vmul.f32 %v5232_v45, %v2115_v29 }
 0x1e8   : > { %v1965_v42 = vmul.f32 %v5422_v28, %v5273_v19  ;;  %v5434_v27 = vcombine.low %v2004_v44, %v2008_v4  ;;  %v2120_v35 = vmul.f32 %v2105_v30, %v5234_v32  ;;  %v2184_v12 = vrot.slane %v2105_v30, 7 }
 0x1e9   : > { %v5437_v31 = vcombine.low %v2028_v13, %v2032_v36  ;;  %v2118_v39 = vsub.f32 %v2107_v21, %v2117_v53  ;;  %v2187_v41 = vrot.slane %v2115_v29, 7  ;;  %v723_v18 = vadd.f32 %v722_v10, %v721_v47 }
 0x1ea   : > { %v1966_v40 = vsub.f32 %v1941_v17, %v1965_v42  ;;  %v2013_v26 = vmul.f32 %v5434_v27, %v5271_v46  ;;  %v2121_v48 = vadd.f32 %v2120_v35, %v2119_v37  ;;  %v2186_v22 = vmul.f32 %v5232_v45, %v2184_v12 }
 0x1eb   : > { %v2037_v61 = vmul.f32 %v5437_v31, %v5273_v19  ;;  %v2126_v5 = vrot.slane %v2118_v39, %v4550_v33  ;;  %v2130_v8 = vrot.slane %v2118_v39, %v4559_v38  ;;  %v2189_v30 = vmul.f32 %v2187_v41, %v5234_v32  ;;  %727 = vst [vmem:[#allocation2 + $0x80] sm:$0xf] %v723_v18 }
 0x1ec   : > { %v1968_v3 = vcombine.high %v1966_v40, %v1966_v40  ;;  %1970 = vst [vmem:[#allocation2 + $0x60] sm:$0xf] %v1966_v40  ;;  %v2150_v47 = vrot.slane %v2121_v48, %v4550_v33  ;;  %v2154_v10 = vrot.slane %v2121_v48, %v4559_v38  ;;  %v2191_v9 = vmul.f32 %v5232_v45, %v2187_v41  ;;  %v3726_v40 = vld [vmem:[#allocation11] sm:$0xff] }
 0x1ed   : > { %v2038_v54 = vsub.f32 %v2013_v26, %v2037_v61  ;;  %v2136_v21 = vrot.slane %v2126_v5, %v4550_v33  ;;  %v2140_v29 = vrot.slane %v2130_v8, %v4550_v33  ;;  %v2190_v44 = vsub.f32 %v2186_v22, %v2189_v30 }
 0x1ee   : > { %1971 = vst [vmem:[#allocation2 + $0x68] sm:$0xf] %v1968_v3  ;;  %v2160_v4 = vrot.slane %v2150_v47, %v4550_v33  ;;  %v2164_v13 = vrot.slane %v2154_v10, %v4550_v33  ;;  %v2192_v17 = vmul.f32 %v2184_v12, %v5234_v32  ;;  %v725_v36 = vcombine.high %v723_v18, %v723_v18 }
 0x1ef   : > { %2043 = vst [vmem:[#allocation2 + $0x68] sm:$0xf0] %v2038_v54  ;;  %v2040_v53 = vcombine.low %v2038_v54, %v2038_v54  ;;  %v5455_v37 = vcombine.low %v2136_v21, %v2140_v29  ;;  %v2198_v38 = vrot.slane %v2190_v44, %v4577_v43  ;;  %v2202_v45 = vrot.slane %v2190_v44, %v4594_v50 }
 0x1f0   : > { %v5459_v42 = vcombine.low %v2160_v4, %v2164_v13  ;;  %v2193_v35 = vadd.f32 %v2192_v17, %v2191_v9  ;;  %728 = vst [vmem:[#allocation2 + $0x88] sm:$0xf] %v725_v36  ;;  %v793_v39 = vmul.f32 %v5007_v6, %v4977_v51  ;;  %v794_v41 = vmul.f32 %v5005_v34, %v4979_v16  ;;  %v3727_v34 = vld [vmem:[#allocation13] sm:$0xff] }
 0x1f1   : > { %2042 = vst [vmem:[#allocation2 + $0x60] sm:$0xf0] %v2040_v53  ;;  %v2145_v32 = vmul.f32 %v5455_v37, %v5271_v46  ;;  %v2208_v12 = vrot.slane %v2198_v38, %v4577_v43  ;;  %v2212_v18 = vrot.slane %v2202_v45, %v4577_v43  ;;  %v930_v26 = vmul.f32 %v3726_v40, %v5026_v63 }
 0x1f2   : > { %v2169_v48 = vmul.f32 %v5459_v42, %v5273_v19  ;;  %v2222_v22 = vrot.slane %v2193_v35, %v4577_v43  ;;  %v2226_v51 = vrot.slane %v2193_v35, %v4594_v50  ;;  %v795_v6 = vadd.f32 %v794_v41, %v793_v39 }
 0x1f3   : > { %v5474_v16 = vcombine.low %v2208_v12, %v2212_v18  ;;  %v931_v61 = vmul.f32 %v3727_v34, %v5023_v20  ;;  %v1002_v5 = vmul.f32 %v3726_v40, %v5061_v2  ;;  %v1003_v8 = vmul.f32 %v3727_v34, %v5059_v60 }
 0x1f4   : > { %v2170_v30 = vsub.f32 %v2145_v32, %v2169_v48  ;;  %v2232_v63 = vrot.slane %v2222_v22, %v4577_v43  ;;  %v2236_v3 = vrot.slane %v2226_v51, %v4577_v43  ;;  %800 = vst [vmem:[#allocation2 + $0x88] sm:$0xf0] %v795_v6  ;;  %v797_v47 = vcombine.low %v795_v6, %v795_v6 }
 0x1f5   : > { %v2217_v50 = vmul.f32 %v5474_v16, %v5271_v46  ;;  %v932_v10 = vadd.f32 %v931_v61, %v930_v26  ;;  %v1004_v9 = vadd.f32 %v1003_v8, %v1002_v5  ;;  %v1139_v54 = vmul.f32 %v3726_v40, %v5116_v24 }
 0x1f6   : > { %v2269_v21 = vld [vmem:[#allocation2 + $0x68] sm:$0xff]  ;;  %v2172_v20 = vcombine.high %v2170_v30, %v2170_v30  ;;  %v5484_v29 = vcombine.low %v2232_v63, %v2236_v3  ;;  %2174 = vst [vmem:[#allocation2 + $0x70] sm:$0xf] %v2170_v30  ;;  %799 = vst [vmem:[#allocation2 + $0x80] sm:$0xf0] %v797_v47  ;;  %v1140_v60 = vmul.f32 %v3727_v34, %v5114_v58 }
 0x1f7   : > { %v1211_v2 = vmul.f32 %v3726_v40, %v5134_v56  ;;  %2452 = vmatprep.mubr.f32.mxu1 %v2269_v21  ;;  %2677 = vmatprep.mubr.f32.mxu0 %v2269_v21  ;;  %v934_v44 = vcombine.high %v932_v10, %v932_v10  ;;  %1009 = vst [vmem:[#allocation2 + $0x98] sm:$0xf0] %v1004_v9  ;;  %936 = vst [vmem:[#allocation2 + $0x90] sm:$0xf] %v932_v10 }
 0x1f8   : > { %v1006_v4 = vcombine.low %v1004_v9, %v1004_v9  ;;  %v1212_v13 = vmul.f32 %v3727_v34, %v5128_v11  ;;  %v2268_v17 = vld [vmem:[#allocation2 + $0x60] sm:$0xff]  ;;  %2175 = vst [vmem:[#allocation2 + $0x78] sm:$0xf] %v2172_v20  ;;  %v2241_v24 = vmul.f32 %v5484_v29, %v5273_v19  ;;  %v1141_v36 = vadd.f32 %v1140_v60, %v1139_v54 }
 0x1f9   : > { %v1348_v53 = vmul.f32 %v3726_v40, %v5188_v59  ;;  %v1349_v58 = vmul.f32 %v3727_v34, %v5185_v62  ;;  %2453 = vmatmul.mubr.f32.gmra.mrb[12].mxu1 %v2268_v17  ;;  %2678 = vmatmul.mubr.f32.gmra.mrb[12].mxu0 %v2268_v17  ;;  %937 = vst [vmem:[#allocation2 + $0x98] sm:$0xf] %v934_v44 }
 0x1fa   : > { %1008 = vst [vmem:[#allocation2 + $0x90] sm:$0xf0] %v1006_v4  ;;  %v1213_v56 = vadd.f32 %v1212_v13, %v1211_v2  ;;  %v1420_v38 = vmul.f32 %v3726_v40, %v5206_v15  ;;  %v1421_v45 = vmul.f32 %v3727_v34, %v5198_v57  ;;  %v2242_v11 = vsub.f32 %v2217_v50, %v2241_v24 }
 0x1fb   : > { %v1143_v35 = vcombine.high %v1141_v36, %v1141_v36  ;;  %1145 = vst [vmem:[#allocation2 + $0xa0] sm:$0xf] %v1141_v36  ;;  %v1350_v39 = vadd.f32 %v1349_v58, %v1348_v53  ;;  %v1564_v41 = vmul.f32 %v5281_v1, %v5271_v46  ;;  %v1565_v62 = vmul.f32 %v5279_v25, %v5273_v19  ;;  %v2273_v50 = vld [vmem:[#allocation2 + $0x88] sm:$0xff] }
 0x1fc   : > { %1218 = vst [vmem:[#allocation2 + $0xa8] sm:$0xf0] %v1213_v56  ;;  %v1215_v59 = vcombine.low %v1213_v56, %v1213_v56  ;;  %v1422_v32 = vadd.f32 %v1421_v45, %v1420_v38  ;;  %v1636_v12 = vmul.f32 %v5303_v7, %v5271_v46  ;;  %2247 = vst [vmem:[#allocation2 + $0x78] sm:$0xf0] %v2242_v11 }
 0x1fd   : > { %v2244_v15 = vcombine.low %v2242_v11, %v2242_v11  ;;  %1146 = vst [vmem:[#allocation2 + $0xa8] sm:$0xf] %v1143_v35  ;;  %v1352_v57 = vcombine.high %v1350_v39, %v1350_v39  ;;  %1354 = vst [vmem:[#allocation2 + $0xb0] sm:$0xf] %v1350_v39  ;;  %v1637_v18 = vmul.f32 %v5294_v52, %v5273_v19 }
 0x1fe   : > { %v1768_v1 = vmul.f32 %v5334_v0, %v5271_v46  ;;  %1217 = vst [vmem:[#allocation2 + $0xa0] sm:$0xf0] %v1215_v59  ;;  %1427 = vst [vmem:[#allocation2 + $0xb8] sm:$0xf0] %v1422_v32  ;;  %v1424_v40 = vcombine.low %v1422_v32, %v1422_v32  ;;  %v1566_v26 = vadd.f32 %v1565_v62, %v1564_v41 }
 0x1ff   : > { %v1769_v25 = vmul.f32 %v5332_v23, %v5273_v19  ;;  %v1840_v7 = vmul.f32 %v5352_v49, %v5271_v46  ;;  %2246 = vst [vmem:[#allocation2 + $0x70] sm:$0xf0] %v2244_v15  ;;  %1355 = vst [vmem:[#allocation2 + $0xb8] sm:$0xf] %v1352_v57  ;;  %v1638_v48 = vadd.f32 %v1637_v18, %v1636_v12 }
 0x200   : > { %v1841_v22 = vmul.f32 %v5350_v14, %v5273_v19  ;;  %v1972_v52 = vmul.f32 %v5422_v28, %v5271_v46  ;;  %v1973_v0 = vmul.f32 %v5417_v55, %v5273_v19  ;;  %1426 = vst [vmem:[#allocation2 + $0xb0] sm:$0xf0] %v1424_v40  ;;  %v1568_v51 = vcombine.high %v1566_v26, %v1566_v26 }
 0x201   : > { %1570 = vst [vmem:[#allocation2 + $0xc0] sm:$0xf] %v1566_v26  ;;  %v1770_v6 = vadd.f32 %v1769_v25, %v1768_v1  ;;  %v2044_v23 = vmul.f32 %v5437_v31, %v5271_v46  ;;  %v2045_v49 = vmul.f32 %v5434_v27, %v5273_v19  ;;  %1643 = vst [vmem:[#allocation2 + $0xc8] sm:$0xf0] %v1638_v48  ;;  %v2274_v54 = vld [vmem:[#allocation2 + $0x90] sm:$0xff] }
 0x202   : > { %v1640_v34 = vcombine.low %v1638_v48, %v1638_v48  ;;  %v1842_v61 = vadd.f32 %v1841_v22, %v1840_v7  ;;  %v1974_v14 = vadd.f32 %v1973_v0, %v1972_v52  ;;  %v2176_v28 = vmul.f32 %v5459_v42, %v5271_v46  ;;  %1571 = vst [vmem:[#allocation2 + $0xc8] sm:$0xf] %v1568_v51 }
 0x203   : > { %v1772_v5 = vcombine.high %v1770_v6, %v1770_v6  ;;  %1774 = vst [vmem:[#allocation2 + $0xd0] sm:$0xf] %v1770_v6  ;;  %v2046_v55 = vadd.f32 %v2045_v49, %v2044_v23  ;;  %v2177_v8 = vmul.f32 %v5455_v37, %v5273_v19  ;;  %v2248_v31 = vmul.f32 %v5484_v29, %v5271_v46  ;;  %v2271_v3 = vld [vmem:[#allocation2 + $0x78] sm:$0xff] }
 0x204   : > { %1642 = vst [vmem:[#allocation2 + $0xc0] sm:$0xf0] %v1640_v34  ;;  %1847 = vst [vmem:[#allocation2 + $0xd8] sm:$0xf0] %v1842_v61  ;;  %v1844_v27 = vcombine.low %v1842_v61, %v1842_v61  ;;  %v1976_v30 = vcombine.high %v1974_v14, %v1974_v14  ;;  %v2249_v63 = vmul.f32 %v5474_v16, %v5273_v19  ;;  %2458 = vmatprep.mubr.f32.mxu1 %v2271_v3  ;;  %v2272_v19 = vld [vmem:[#allocation2 + $0x80] sm:$0xff]  ;;  %v2275_v16 = vld [vmem:[#allocation2 + $0x98] sm:$0xff] }
 0x205   : > { %1978 = vst [vmem:[#allocation2 + $0xe0] sm:$0xf] %v1974_v14  ;;  %1775 = vst [vmem:[#allocation2 + $0xd8] sm:$0xf] %v1772_v5  ;;  %v2048_v42 = vcombine.low %v2046_v55, %v2046_v55  ;;  %v2178_v47 = vadd.f32 %v2177_v8, %v2176_v28  ;;  %2683 = vmatprep.mubr.f32.mxu0 %v2271_v3  ;;  %v2277_v21 = vld [vmem:[#allocation2 + $0xa8] sm:$0xff]  ;;  %v2276_v20 = vld [vmem:[#allocation2 + $0xa0] sm:$0xff] }
 0x206   : > { %2051 = vst [vmem:[#allocation2 + $0xe8] sm:$0xf0] %v2046_v55  ;;  %1846 = vst [vmem:[#allocation2 + $0xd0] sm:$0xf0] %v1844_v27  ;;  %v2250_v37 = vadd.f32 %v2249_v63, %v2248_v31  ;;  %v2270_v46 = vld [vmem:[#allocation2 + $0x70] sm:$0xff]  ;;  %v2279_v29 = vld [vmem:[#allocation2 + $0xb8] sm:$0xff] }
 0x207   : > { %1979 = vst [vmem:[#allocation2 + $0xe8] sm:$0xf] %v1976_v30  ;;  %2050 = vst [vmem:[#allocation2 + $0xe0] sm:$0xf0] %v2048_v42  ;;  %v2180_v10 = vcombine.high %v2178_v47, %v2178_v47  ;;  %2459 = vmatmul.mubr.f32.gmra.mrb[14].mxu1 %v2270_v46  ;;  %2684 = vmatmul.mubr.f32.gmra.mrb[14].mxu0 %v2270_v46  ;;  %v2278_v60 = vld [vmem:[#allocation2 + $0xb0] sm:$0xff] }
 0x208   : > { %2182 = vst [vmem:[#allocation2 + $0xf0] sm:$0xf] %v2178_v47  ;;  %2255 = vst [vmem:[#allocation2 + $0xf8] sm:$0xf0] %v2250_v37  ;;  %v2252_v9 = vcombine.low %v2250_v37, %v2250_v37  ;;  %2464 = vmatprep.mubr.f32.mxu1 %v2273_v50  ;;  %2689 = vmatprep.mubr.f32.mxu0 %v2273_v50 }
 0x209   : > { %2183 = vst [vmem:[#allocation2 + $0xf8] sm:$0xf] %v2180_v10  ;;  %v2281_v2 = vld [vmem:[#allocation2 + $0xc8] sm:$0xff]  ;;  %v3409_v42 = vld [vmem:[%s582_s18 + $0x8] ss:$2 sm:$0x3] }
 0x20a   : > { %2254 = vst [vmem:[#allocation2 + $0xf0] sm:$0xf0] %v2252_v9  ;;  %v2770_v34 = vld [vmem:[%s6208_s5] ss:$2 sm:$0x3] }
 0x20b   : > { %2465 = vmatmul.mubr.f32.gmra.mrb[16].mxu1 %v2272_v19  ;;  %2690 = vmatmul.mubr.f32.gmra.mrb[16].mxu0 %v2272_v19  ;;  %v2280_v44 = vld [vmem:[#allocation2 + $0xc0] sm:$0xff]  ;;  %v2771_v61 = vld [vmem:[#allocation14] ss:$2 sm:$0x3]  ;;  %v5598_v63 = vrot.slane %v2770_v34, %v4550_v33  ;;  %v5608_v37 = vrot.slane %v2770_v34, %v4577_v43  ;;  %v5654_v34 = vrot.slane %v3409_v42, %v4550_v33 }
 0x20c   : > { %2470 = vmatprep.mubr.f32.mxu1 %v2275_v16  ;;  %2695 = vmatprep.mubr.f32.mxu0 %v2275_v16  ;;  %v2283_v4 = vld [vmem:[#allocation2 + $0xd8] sm:$0xff]  ;;  %v3405_v14 = vld [vmem:[%s6208_s5 + $0x1] ss:$2 sm:$0x3]  ;;  %v5601_v3 = vrot.slane %v2771_v61, %v4550_v33  ;;  %v5611_v46 = vrot.slane %v2771_v61, %v4577_v43 }
 0x20d   : > { %v2282_v13 = vld [vmem:[#allocation2 + $0xd0] sm:$0xff]  ;;  %v2845_v28 = vld [vmem:[#allocation14 + $0x1] ss:$2 sm:$0x3]  ;;  %v5614_v10 = vrot.slane %v3405_v14, %v4550_v33  ;;  %6216 = vst [vmem:[#allocation46_spill] sm:$0xff] %v5654_v34 }
 0x20e   : > { %v2285_v17 = vld [vmem:[#allocation2 + $0xe8] sm:$0xff]  ;;  %v2284_v24 = vld [vmem:[#allocation2 + $0xe0] sm:$0xff]  ;;  %v5617_v9 = vrot.slane %v2845_v28, %v4550_v33  ;;  %v3410_v19 = vld [vmem:[%s582_s18 + $0x9] ss:$2 sm:$0x3] }
 0x20f   : > { %2471 = vmatmul.mubr.f32.gmra.mrb[18].mxu1 %v2274_v54  ;;  %2696 = vmatmul.mubr.f32.gmra.mrb[18].mxu0 %v2274_v54  ;;  %v2932_v5 = vld [vmem:[%s582_s18] ss:$2 sm:$0x3]  ;;  %v3406_v55 = vld [vmem:[%s582_s18 + $0x1] ss:$2 sm:$0x3]  ;;  %v5657_v61 = vrot.slane %v3410_v19, %v4550_v33 }
 0x210   : > { %2476 = vmatprep.mubr.f32.mxu1 %v2277_v21  ;;  %2701 = vmatprep.mubr.f32.mxu0 %v2277_v21  ;;  %v2287_v36 = vld [vmem:[#allocation2 + $0xf8] sm:$0xff]  ;;  %v3407_v8 = vld [vmem:[%s582_s18 + $0x4] ss:$2 sm:$0x3]  ;;  %v5620_v16 = vrot.slane %v2932_v5, %v4550_v33  ;;  %v5623_v54 = vrot.slane %v3406_v55, %v4550_v33  ;;  %v5626_v21 = vrot.slane %v3405_v14, %v4577_v43 }
 0x211   : > { %v2286_v53 = vld [vmem:[#allocation2 + $0xf0] sm:$0xff]  ;;  %v3408_v31 = vld [vmem:[%s582_s18 + $0x5] ss:$2 sm:$0x3]  ;;  %6217 = vst [vmem:[#allocation47_spill] sm:$0xff] %v5657_v61 }
 0x213   : > { %2477 = vmatmul.mubr.f32.gmra.mrb[20].mxu1 %v2276_v20  ;;  %2702 = vmatmul.mubr.f32.gmra.mrb[20].mxu0 %v2276_v20  ;;  %v5629_v20 = vrot.slane %v2845_v28, %v4577_v43 }
 0x214   : > { %2482 = vmatprep.mubr.f32.mxu1 %v2279_v29  ;;  %2707 = vmatprep.mubr.f32.mxu0 %v2279_v29  ;;  %v5632_v29 = vrot.slane %v2932_v5, %v4577_v43 }
 0x217   : > { %2483 = vmatmul.mubr.f32.gmra.mrb[22].mxu1 %v2278_v60  ;;  %2708 = vmatmul.mubr.f32.gmra.mrb[22].mxu0 %v2278_v60  ;;  %v5635_v60 = vrot.slane %v3406_v55, %v4577_v43 }
 0x218   : > { %2488 = vmatprep.mubr.f32.mxu1 %v2281_v2  ;;  %2713 = vmatprep.mubr.f32.mxu0 %v2281_v2  ;;  %v5638_v2 = vrot.slane %v3407_v8, %v4550_v33 }
 0x21b   : > { %2489 = vmatmul.mubr.f32.gmra.mrb[24].mxu1 %v2280_v44  ;;  %2714 = vmatmul.mubr.f32.gmra.mrb[24].mxu0 %v2280_v44  ;;  %v5641_v44 = vrot.slane %v3408_v31, %v4550_v33 }
 0x21c   : > { %2494 = vmatprep.mubr.f32.mxu1 %v2283_v4  ;;  %2719 = vmatprep.mubr.f32.mxu0 %v2283_v4  ;;  %v5643_v4 = vld [vmem:[%s582_s18 + $0xc] ss:$2 sm:$0x3] }
 0x21d   : > { %6213 = vst [vmem:[#allocation43_spill] sm:$0xff] %v5643_v4  ;;  %v5671_v34 = vrot.slane %v5643_v4, %v4550_v33 }
 0x21f   : > { %2495 = vmatmul.mubr.f32.gmra.mrb[26].mxu1 %v2282_v13  ;;  %2720 = vmatmul.mubr.f32.gmra.mrb[26].mxu0 %v2282_v13  ;;  %v5645_v13 = vld [vmem:[%s582_s18 + $0xd] ss:$2 sm:$0x3]  ;;  %6220 = vst [vmem:[#allocation50_spill] sm:$0xff] %v5671_v34 }
 0x220   : > { %2500 = vmatprep.mubr.f32.mxu1 %v2285_v17  ;;  %2725 = vmatprep.mubr.f32.mxu0 %v2285_v17  ;;  %6214 = vst [vmem:[#allocation44_spill] sm:$0xff] %v5645_v13 }
 0x223   : > { %2501 = vmatmul.mubr.f32.gmra.mrb[28].mxu1 %v2284_v24  ;;  %2726 = vmatmul.mubr.f32.gmra.mrb[28].mxu0 %v2284_v24 }
 0x224   : > { %2506 = vmatprep.mubr.f32.mxu1 %v2287_v36  ;;  %2731 = vmatprep.mubr.f32.mxu0 %v2287_v36  ;;  %v5648_v36 = vrot.slane %v3407_v8, %v4577_v43  ;;  %v5665_v8 = vrot.slane %v3410_v19, %v4577_v43 }
 0x226   : > { %6219 = vst [vmem:[#allocation49_spill] sm:$0xff] %v5665_v8 }
 0x227   : > { %2507 = vmatmul.mubr.f32.gmra.mrb[30].mxu1 %v2286_v53  ;;  %2732 = vmatmul.mubr.f32.gmra.mrb[30].mxu0 %v2286_v53  ;;  %v5651_v53 = vrot.slane %v3408_v31, %v4577_v43 }
 0x229   : > { %6215 = vst [vmem:[#allocation45_spill] sm:$0xff] %v5651_v53 }
 0x264   : > { %v5527_v58 = vpop.f32.mrb[0].mxu1  ;;  %v5529_v56 = vpop.f32.mrb[0].mxu0 }
 0x265   : > { %v5531_v38 = vpop.f32.mrb[1].mxu1  ;;  %v5533_v45 = vpop.f32.mrb[1].mxu0 }
 0x272   : > { %v5535_v11 = vpop.f32.mrb[2].mxu1  ;;  %v5537_v35 = vpop.f32.mrb[2].mxu0 }
 0x273   : > { %v5539_v39 = vpop.f32.mrb[3].mxu1  ;;  %v5541_v41 = vpop.f32.mrb[3].mxu0 }
 0x285   : > { %v5543_v59 = vpop.f32.mrb[4].mxu1  ;;  %v5545_v32 = vpop.f32.mrb[4].mxu0 }
 0x286   : > { %v5547_v62 = vpop.f32.mrb[5].mxu1  ;;  %v5549_v12 = vpop.f32.mrb[5].mxu0 }
 0x295   : > { %v5551_v15 = vpop.f32.mrb[6].mxu1  ;;  %v5553_v57 = vpop.f32.mrb[6].mxu0 }
 0x296   : > { %v5555_v18 = vpop.f32.mrb[7].mxu1  ;;  %v5557_v1 = vpop.f32.mrb[7].mxu0 }
 0x2a9   : > { %v5559_v40 = vpop.f32.mrb[8].mxu1 }
 0x2aa   : > { %v5561_v26 = vpop.f32.mrb[8].mxu0  ;;  %v5563_v25 = vpop.f32.mrb[9].mxu1 }
 0x2ab   : > { %v5565_v7 = vpop.f32.mrb[9].mxu0 }
 0x2b6   : > { %v5567_v48 = vpop.f32.mrb[10].mxu1  ;;  %v5569_v22 = vpop.f32.mrb[10].mxu0 }
 0x2b7   : > { %v5571_v52 = vpop.f32.mrb[11].mxu1  ;;  %v5573_v0 = vpop.f32.mrb[11].mxu0 }
 0x2cc   : > { %v5576_v51 = vpop.f32.mrb[12].mxu1  ;;  %v5578_v6 = vpop.f32.mrb[12].mxu0 }
 0x2cd   : > { %v5580_v23 = vpop.f32.mrb[13].mxu1  ;;  %v5582_v49 = vpop.f32.mrb[13].mxu0 }
 0x2da   : > { %v5593_v27 = vpop.f32.mrb[14].mxu1  ;;  %v5595_v30 = vpop.f32.mrb[14].mxu0 }
 0x2db   : > { %6209 = vst [vmem:[#allocation39_spill] sm:$0xff] %v5593_v27  ;;  %6210 = vst [vmem:[#allocation40_spill] sm:$0xff] %v5595_v30  ;;  %v5603_v47 = vpop.f32.mrb[15].mxu1  ;;  %v5605_v50 = vpop.f32.mrb[15].mxu0 }
 0x2dc   : > { %6211 = vst [vmem:[#allocation41_spill] sm:$0xff] %v5603_v47  ;;  %6212 = vst [vmem:[#allocation42_spill] sm:$0xff] %v5605_v50  ;;  %v5662_v47 = vrot.slane %v3409_v42, %v4577_v43 }
 0x2de   : > { %v2466_v17 = vpop.f32.mrb[16].mxu1  ;;  %v2691_v24 = vpop.f32.mrb[16].mxu0  ;;  %6218 = vst [vmem:[#allocation48_spill] sm:$0xff] %v5662_v47 }
 0x2df   : > { %v2754_v14 = vadd.f32 %v5529_v56, %v2466_v17  ;;  %v2738_v28 = vsub.f32 %v5527_v58, %v2691_v24  ;;  %v2468_v5 = vpop.f32.mrb[17].mxu1  ;;  %v2693_v55 = vpop.f32.mrb[17].mxu0  ;;  %v5675_v56 = vrot.slane %v5645_v13, %v4550_v33 }
 0x2e0   : > { %v2755_v31 = vadd.f32 %v5533_v45, %v2468_v5  ;;  %v2739_v50 = vsub.f32 %v5531_v38, %v2693_v55 }
 0x2e1   : > { %6221 = vst [vmem:[#allocation51_spill] sm:$0xff] %v5675_v56  ;;  %v5678_v58 = vmul.f32 %v5601_v3, %v2754_v14  ;;  %v2818_v42 = vmul.f32 %v5598_v63, %v2754_v14  ;;  %v5682_v19 = vmul.f32 %v5598_v63, %v2738_v28  ;;  %v2826_v45 = vmul.f32 %v5601_v3, %v2738_v28 }
 0x2e2   : > { %v5686_v38 = vmul.f32 %v5611_v46, %v2755_v31  ;;  %v2819_v17 = vmul.f32 %v5608_v37, %v2755_v31  ;;  %v5690_v24 = vmul.f32 %v5608_v37, %v2739_v50  ;;  %v2827_v33 = vmul.f32 %v5611_v46, %v2739_v50  ;;  %v2472_v5 = vpop.f32.mrb[18].mxu1  ;;  %v2697_v55 = vpop.f32.mrb[18].mxu0 }
 0x2e3   : > { %v5695_v56 = vadd.f32 %v2826_v45, %v2818_v42  ;;  %v2756_v34 = vadd.f32 %v5537_v35, %v2472_v5  ;;  %v2740_v28 = vsub.f32 %v5535_v11, %v2697_v55  ;;  %v2474_v13 = vpop.f32.mrb[19].mxu1  ;;  %v2699_v4 = vpop.f32.mrb[19].mxu0 }
 0x2e4   : > { %v5701_v43 = vadd.f32 %v2827_v33, %v2819_v17  ;;  %v2757_v50 = vadd.f32 %v5541_v41, %v2474_v13  ;;  %v2741_v8 = vsub.f32 %v5539_v39, %v2699_v4 }
 0x2e5   : > { %v5706_v47 = vmul.f32 %v5601_v3, %v2756_v34  ;;  %v2820_v42 = vmul.f32 %v5598_v63, %v2756_v34  ;;  %v5710_v35 = vmul.f32 %v5598_v63, %v2740_v28  ;;  %v2828_v11 = vmul.f32 %v5601_v3, %v2740_v28 }
 0x2e6   : > { %v5714_v45 = vmul.f32 %v5611_v46, %v2757_v50  ;;  %v2821_v17 = vmul.f32 %v5608_v37, %v2757_v50  ;;  %v5718_v33 = vmul.f32 %v5608_v37, %v2741_v8  ;;  %v2829_v39 = vmul.f32 %v5611_v46, %v2741_v8  ;;  %v2478_v41 = vpop.f32.mrb[20].mxu1  ;;  %v2703_v4 = vpop.f32.mrb[20].mxu0 }
 0x2e7   : > { %v5723_v34 = vadd.f32 %v2828_v11, %v2820_v42  ;;  %v2758_v5 = vadd.f32 %v5545_v32, %v2478_v41  ;;  %v2742_v55 = vsub.f32 %v5543_v59, %v2703_v4  ;;  %v2480_v28 = vpop.f32.mrb[21].mxu1  ;;  %v2705_v31 = vpop.f32.mrb[21].mxu0 }
 0x2e8   : > { %v5729_v14 = vadd.f32 %v2829_v39, %v2821_v17  ;;  %v2759_v8 = vadd.f32 %v5549_v12, %v2480_v28  ;;  %v2743_v61 = vsub.f32 %v5547_v62, %v2705_v31 }
 0x2e9   : > { %v5734_v27 = vmul.f32 %v5601_v3, %v2758_v5  ;;  %v2822_v42 = vmul.f32 %v5598_v63, %v2758_v5  ;;  %v5738_v32 = vmul.f32 %v5598_v63, %v2742_v55  ;;  %v2830_v59 = vmul.f32 %v5601_v3, %v2742_v55 }
 0x2ea   : > { %v5742_v11 = vmul.f32 %v5611_v46, %v2759_v8  ;;  %v2823_v17 = vmul.f32 %v5608_v37, %v2759_v8  ;;  %v5746_v39 = vmul.f32 %v5608_v37, %v2743_v61  ;;  %v2831_v62 = vmul.f32 %v5611_v46, %v2743_v61  ;;  %v2484_v12 = vpop.f32.mrb[22].mxu1  ;;  %v2709_v31 = vpop.f32.mrb[22].mxu0 }
 0x2eb   : > { %v5751_v4 = vadd.f32 %v2830_v59, %v2822_v42  ;;  %v2760_v5 = vadd.f32 %v5553_v57, %v2484_v12  ;;  %v2744_v55 = vsub.f32 %v5551_v15, %v2709_v31  ;;  %v2486_v28 = vpop.f32.mrb[23].mxu1  ;;  %v2711_v50 = vpop.f32.mrb[23].mxu0 }
 0x2ec   : > { %v5757_v13 = vadd.f32 %v2831_v62, %v2823_v17  ;;  %v2761_v61 = vadd.f32 %v5557_v1, %v2486_v28  ;;  %v2745_v30 = vsub.f32 %v5555_v18, %v2711_v50 }
 0x2ed   : > { %v5762_v53 = vmul.f32 %v5601_v3, %v2760_v5  ;;  %v2824_v42 = vmul.f32 %v5598_v63, %v2760_v5  ;;  %v5766_v57 = vmul.f32 %v5598_v63, %v2744_v55  ;;  %v2832_v15 = vmul.f32 %v5601_v3, %v2744_v55 }
 0x2ee   : > { %v5770_v59 = vmul.f32 %v5611_v46, %v2761_v61  ;;  %v2825_v17 = vmul.f32 %v5608_v37, %v2761_v61  ;;  %v5774_v1 = vmul.f32 %v5608_v37, %v2745_v30  ;;  %v2833_v18 = vmul.f32 %v5611_v46, %v2745_v30  ;;  %v2490_v50 = vpop.f32.mrb[24].mxu1  ;;  %v2715_v62 = vpop.f32.mrb[24].mxu0 }
 0x2ef   : > { %v5779_v63 = vadd.f32 %v2832_v15, %v2824_v42  ;;  %v2762_v31 = vadd.f32 %v5561_v26, %v2490_v50  ;;  %v2746_v3 = vsub.f32 %v5559_v40, %v2715_v62  ;;  %v2492_v5 = vpop.f32.mrb[25].mxu1  ;;  %v2717_v55 = vpop.f32.mrb[25].mxu0 }
 0x2f0   : > { %6223 = vst [vmem:[#allocation52_spill] sm:$0xff] %v5770_v59  ;;  %v5785_v37 = vadd.f32 %v2833_v18, %v2825_v17  ;;  %v2763_v30 = vadd.f32 %v5565_v7, %v2492_v5  ;;  %v2747_v46 = vsub.f32 %v5563_v25, %v2717_v55 }
 0x2f1   : > { %v2876_v61 = vmul.f32 %v5617_v9, %v2762_v31  ;;  %v2892_v26 = vmul.f32 %v5614_v10, %v2762_v31  ;;  %v2857_v40 = vmul.f32 %v5614_v10, %v2746_v3  ;;  %v2900_v42 = vmul.f32 %v5617_v9, %v2746_v3 }
 0x2f2   : > { %6224 = vst [vmem:[#allocation53_spill] sm:$0xff] %v5785_v37  ;;  %v2877_v15 = vmul.f32 %v5629_v20, %v2763_v30  ;;  %v2893_v17 = vmul.f32 %v5626_v21, %v2763_v30  ;;  %v2858_v18 = vmul.f32 %v5626_v21, %v2747_v46  ;;  %v2901_v50 = vmul.f32 %v5629_v20, %v2747_v46  ;;  %v2496_v62 = vpop.f32.mrb[26].mxu1  ;;  %v2721_v7 = vpop.f32.mrb[26].mxu0 }
 0x2f3   : > { %v2884_v25 = vsub.f32 %v2857_v40, %v2876_v61  ;;  %v2908_v5 = vadd.f32 %v2900_v42, %v2892_v26  ;;  %v2764_v55 = vadd.f32 %v5569_v22, %v2496_v62  ;;  %v2748_v31 = vsub.f32 %v5567_v48, %v2721_v7  ;;  %v2498_v28 = vpop.f32.mrb[27].mxu1  ;;  %v2723_v12 = vpop.f32.mrb[27].mxu0 }
 0x2f4   : > { %v2885_v3 = vsub.f32 %v2858_v18, %v2877_v15  ;;  %v2909_v8 = vadd.f32 %v2901_v50, %v2893_v17  ;;  %v2765_v41 = vadd.f32 %v5573_v0, %v2498_v28  ;;  %v2749_v30 = vsub.f32 %v5571_v52, %v2723_v12 }
 0x2f5   : > { %v6225_v46 = vsub.f32 %v5682_v19, %v5678_v58  ;;  %v2924_v59 = vadd.f32 %v2908_v5, %v5695_v56  ;;  %v2878_v61 = vmul.f32 %v5617_v9, %v2764_v55  ;;  %v2894_v22 = vmul.f32 %v5614_v10, %v2764_v55 }
 0x2f6   : > { %v6226_v48 = vsub.f32 %v5690_v24, %v5686_v38  ;;  %v2925_v40 = vadd.f32 %v2909_v8, %v5701_v43  ;;  %v2859_v0 = vmul.f32 %v5614_v10, %v2748_v31  ;;  %v2902_v52 = vmul.f32 %v5617_v9, %v2748_v31  ;;  %v2502_v58 = vpop.f32.mrb[28].mxu1  ;;  %v2727_v19 = vpop.f32.mrb[28].mxu0 }
 0x2f7   : > { %v2916_v37 = vadd.f32 %v2884_v25, %v6225_v46  ;;  %v2948_v12 = vmul.f32 %v5620_v16, %v2924_v59  ;;  %v2969_v42 = vmul.f32 %v5623_v54, %v2924_v59  ;;  %v2504_v38 = vpop.f32.mrb[29].mxu1  ;;  %v2729_v24 = vpop.f32.mrb[29].mxu0  ;;  %v2860_v59 = vmul.f32 %v5626_v21, %v2749_v30 }
 0x2f8   : > { %v2917_v26 = vadd.f32 %v2885_v3, %v6226_v48  ;;  %v2949_v43 = vmul.f32 %v5632_v29, %v2925_v40  ;;  %v2970_v17 = vmul.f32 %v5635_v60, %v2925_v40  ;;  %v2766_v18 = vadd.f32 %v5578_v6, %v2502_v58 }
 0x2f9   : > { %v2944_v56 = vmul.f32 %v5620_v16, %v2916_v37  ;;  %v2965_v28 = vmul.f32 %v5623_v54, %v2916_v37  ;;  %2950 = vst [vmem:[%s5832_s13] sm:$0xf] %v2948_v12  ;;  %2971 = vst [vmem:[%s5832_s13] sm:$0xf0] %v2969_v42  ;;  %v2886_v16 = vsub.f32 %v2859_v0, %v2878_v61 }
 0x2fa   : > { %v2945_v15 = vmul.f32 %v5632_v29, %v2917_v26  ;;  %v2966_v8 = vmul.f32 %v5635_v60, %v2917_v26  ;;  %v2910_v54 = vadd.f32 %v2902_v52, %v2894_v22  ;;  %v2879_v29 = vmul.f32 %v5629_v20, %v2765_v41  ;;  %2951 = vst [vmem:[%s5832_s13 + $0x8] sm:$0xf] %v2949_v43  ;;  %v2508_v62 = vpop.f32.mrb[30].mxu1  ;;  %v2733_v7 = vpop.f32.mrb[30].mxu0  ;;  %v6229_v52 = vld [vmem:[#allocation45_spill] sm:$0xff] }
 0x2fb   : > { %2946 = vst [vmem:[%s5827_s17] sm:$0xf] %v2944_v56  ;;  %2967 = vst [vmem:[%s5827_s17] sm:$0xf0] %v2965_v28  ;;  %v2895_v60 = vmul.f32 %v5626_v21, %v2765_v41  ;;  %v2903_v37 = vmul.f32 %v5629_v20, %v2749_v30  ;;  %v2750_v50 = vsub.f32 %v5576_v51, %v2727_v19  ;;  %v2510_v3 = vpop.f32.mrb[31].mxu1  ;;  %v2735_v30 = vpop.f32.mrb[31].mxu0 }
 0x2fc   : > { %2947 = vst [vmem:[%s5827_s17 + $0x8] sm:$0xf] %v2945_v15  ;;  %2968 = vst [vmem:[%s5827_s17 + $0x8] sm:$0xf0] %v2966_v8  ;;  %v6227_v25 = vsub.f32 %v5710_v35, %v5706_v47  ;;  %v2926_v41 = vadd.f32 %v2910_v54, %v5723_v34  ;;  %v2767_v55 = vadd.f32 %v5582_v49, %v2504_v38  ;;  %v6230_v38 = vld [vmem:[#allocation40_spill] sm:$0xff]  ;;  %v6231_v15 = vld [vmem:[#allocation39_spill] sm:$0xff] }
 0x2fd   : > { %2972 = vst [vmem:[%s5832_s13 + $0x8] sm:$0xf0] %v2970_v17  ;;  %v2751_v31 = vsub.f32 %v5580_v23, %v2729_v24  ;;  %v2887_v6 = vsub.f32 %v2860_v59, %v2879_v29  ;;  %v2911_v51 = vadd.f32 %v2903_v37, %v2895_v60  ;;  %v2880_v46 = vmul.f32 %v5617_v9, %v2766_v18  ;;  %v6232_v8 = vld [vmem:[#allocation42_spill] sm:$0xff] }
 0x2fe   : > { %v2918_v5 = vadd.f32 %v2886_v16, %v6227_v25  ;;  %v2896_v61 = vmul.f32 %v5614_v10, %v2766_v18  ;;  %v2990_v35 = vmul.f32 %v5638_v2, %v2926_v41  ;;  %v3011_v34 = vmul.f32 %v5641_v44, %v2926_v41  ;;  %v6233_v16 = vld [vmem:[#allocation41_spill] sm:$0xff] }
 0x2ff   : > { %v6228_v23 = vsub.f32 %v5718_v33, %v5714_v45  ;;  %v2927_v48 = vadd.f32 %v2911_v51, %v5729_v14  ;;  %v2861_v26 = vmul.f32 %v5614_v10, %v2750_v50  ;;  %v2904_v40 = vmul.f32 %v5617_v9, %v2750_v50 }
 0x300   : > { %v2986_v47 = vmul.f32 %v5638_v2, %v2918_v5  ;;  %v3007_v49 = vmul.f32 %v5641_v44, %v2918_v5  ;;  %2992 = vst [vmem:[%s5832_s13 + $0x10] sm:$0xf] %v2990_v35  ;;  %3013 = vst [vmem:[%s5832_s13 + $0x10] sm:$0xf0] %v3011_v34  ;;  %v2881_v2 = vmul.f32 %v5629_v20, %v2767_v55  ;;  %v6238_v5 = vld [vmem:[#allocation48_spill] sm:$0xff] }
 0x301   : > { %v2919_v22 = vadd.f32 %v2887_v6, %v6228_v23  ;;  %v2897_v44 = vmul.f32 %v5626_v21, %v2767_v55  ;;  %v2862_v45 = vmul.f32 %v5626_v21, %v2751_v31  ;;  %v2905_v14 = vmul.f32 %v5629_v20, %v2751_v31  ;;  %v6239_v31 = vld [vmem:[#allocation49_spill] sm:$0xff] }
 0x302   : > { %2988 = vst [vmem:[%s5827_s17 + $0x10] sm:$0xf] %v2986_v47  ;;  %3009 = vst [vmem:[%s5827_s17 + $0x10] sm:$0xf0] %v3007_v49  ;;  %v2991_v0 = vmul.f32 %v5648_v36, %v2927_v48  ;;  %v3012_v19 = vmul.f32 %v6229_v52, %v2927_v48  ;;  %v2888_v56 = vsub.f32 %v2861_v26, %v2880_v46  ;;  %v6242_v48 = vld [vmem:[#allocation43_spill] sm:$0xff] }
 0x303   : > { %v2987_v33 = vmul.f32 %v5648_v36, %v2919_v22  ;;  %v3008_v58 = vmul.f32 %v6229_v52, %v2919_v22  ;;  %v2912_v12 = vadd.f32 %v2904_v40, %v2896_v61  ;;  %v2889_v28 = vsub.f32 %v2862_v45, %v2881_v2  ;;  %v6241_v22 = vld [vmem:[#allocation38_spill] sm:$0xff]  ;;  %v6246_v45 = vld [vmem:[#allocation52_spill] sm:$0xff] }
 0x304   : > { %v2913_v42 = vadd.f32 %v2905_v14, %v2897_v44  ;;  %2993 = vst [vmem:[%s5832_s13 + $0x18] sm:$0xf] %v2991_v0  ;;  %3014 = vst [vmem:[%s5832_s13 + $0x18] sm:$0xf0] %v3012_v19  ;;  %v2768_v24 = vadd.f32 %v6230_v38, %v2508_v62  ;;  %v2752_v43 = vsub.f32 %v6231_v15, %v2733_v7  ;;  %v6248_v0 = vld [vmem:[#allocation53_spill] sm:$0xff] }
 0x305   : > { %2989 = vst [vmem:[%s5827_s17 + $0x18] sm:$0xf] %v2987_v33  ;;  %3010 = vst [vmem:[%s5827_s17 + $0x18] sm:$0xf0] %v3008_v58  ;;  %v2769_v17 = vadd.f32 %v6232_v8, %v2510_v3  ;;  %v2753_v36 = vsub.f32 %v6233_v16, %v2735_v30  ;;  %v6234_v54 = vsub.f32 %v5738_v32, %v5734_v27  ;;  %v6236_v32 = vld [vmem:[#allocation46_spill] sm:$0xff] }
 0x306   : > { %v2928_v60 = vadd.f32 %v2912_v12, %v5751_v4  ;;  %v6235_v59 = vsub.f32 %v5746_v39, %v5742_v11  ;;  %v2929_v18 = vadd.f32 %v2913_v42, %v5757_v13  ;;  %v2882_v50 = vmul.f32 %v5617_v9, %v2768_v24  ;;  %v6237_v11 = vld [vmem:[#allocation47_spill] sm:$0xff] }
 0x307   : > { %v2920_v29 = vadd.f32 %v2888_v56, %v6234_v54  ;;  %v2898_v62 = vmul.f32 %v5614_v10, %v2768_v24  ;;  %v2863_v7 = vmul.f32 %v5614_v10, %v2752_v43  ;;  %v2906_v27 = vmul.f32 %v5617_v9, %v2752_v43 }
 0x308   : > { %v2921_v37 = vadd.f32 %v2889_v28, %v6235_v59  ;;  %v3032_v4 = vmul.f32 %v6236_v32, %v2928_v60  ;;  %v3053_v13 = vmul.f32 %v6237_v11, %v2928_v60  ;;  %v3033_v55 = vmul.f32 %v6238_v5, %v2929_v18 }
 0x309   : > { %v3028_v25 = vmul.f32 %v6236_v32, %v2920_v29  ;;  %v3049_v39 = vmul.f32 %v6237_v11, %v2920_v29  ;;  %v3054_v9 = vmul.f32 %v6239_v31, %v2929_v18  ;;  %v2890_v3 = vsub.f32 %v2863_v7, %v2882_v50 }
 0x30a   : > { %v3029_v41 = vmul.f32 %v6238_v5, %v2921_v37  ;;  %v3050_v10 = vmul.f32 %v6239_v31, %v2921_v37  ;;  %3034 = vst [vmem:[%s5832_s13 + $0x20] sm:$0xf] %v3032_v4  ;;  %3055 = vst [vmem:[%s5832_s13 + $0x20] sm:$0xf0] %v3053_v13  ;;  %v2914_v30 = vadd.f32 %v2906_v27, %v2898_v62 }
 0x30b   : > { %3030 = vst [vmem:[%s5827_s17 + $0x20] sm:$0xf] %v3028_v25  ;;  %3051 = vst [vmem:[%s5827_s17 + $0x20] sm:$0xf0] %v3049_v39  ;;  %v2883_v6 = vmul.f32 %v5629_v20, %v2769_v17  ;;  %v2899_v51 = vmul.f32 %v5626_v21, %v2769_v17  ;;  %v2864_v46 = vmul.f32 %v5626_v21, %v2753_v36  ;;  %v6243_v21 = vld [vmem:[#allocation44_spill] sm:$0xff] }
 0x30c   : > { %3031 = vst [vmem:[%s5827_s17 + $0x28] sm:$0xf] %v3029_v41  ;;  %3035 = vst [vmem:[%s5832_s13 + $0x28] sm:$0xf] %v3033_v55  ;;  %v2907_v61 = vmul.f32 %v5629_v20, %v2753_v36  ;;  %v6240_v47 = vsub.f32 %v5766_v57, %v5762_v53  ;;  %v2930_v49 = vadd.f32 %v2914_v30, %v5779_v63  ;;  %v6244_v20 = vld [vmem:[#allocation50_spill] sm:$0xff]  ;;  %v6245_v57 = vld [vmem:[#allocation51_spill] sm:$0xff] }
 0x30d   : > { %3052 = vst [vmem:[%s5827_s17 + $0x28] sm:$0xf0] %v3050_v10  ;;  %3056 = vst [vmem:[%s5832_s13 + $0x28] sm:$0xf0] %v3054_v9  ;;  %v2891_v34 = vsub.f32 %v2864_v46, %v2883_v6  ;;  %v3067_v26 = vrot.slane %v6242_v48, %v6241_v22  ;;  %v3088_v40 = vrot.slane %v6243_v21, %v6241_v22 }
 0x30e   : > { %v2922_v35 = vadd.f32 %v2890_v3, %v6240_v47  ;;  %v2915_v23 = vadd.f32 %v2907_v61, %v2899_v51  ;;  %v3074_v53 = vmul.f32 %v6244_v20, %v2930_v49  ;;  %v3095_v63 = vmul.f32 %v6245_v57, %v2930_v49 }
 0x30f   : > { %v6247_v14 = vsub.f32 %v5774_v1, %v6246_v45 }
 0x310   : > { %v3070_v2 = vmul.f32 %v6244_v20, %v2922_v35  ;;  %v3091_v44 = vmul.f32 %v6245_v57, %v2922_v35  ;;  %v2931_v52 = vadd.f32 %v2915_v23, %v6248_v0  ;;  %3076 = vst [vmem:[%s5832_s13 + $0x30] sm:$0xf] %v3074_v53  ;;  %3097 = vst [vmem:[%s5832_s13 + $0x30] sm:$0xf0] %v3095_v63 }
 0x311   : > { %v2923_v33 = vadd.f32 %v2891_v34, %v6247_v14 }
 0x312   : > { %3072 = vst [vmem:[%s5827_s17 + $0x30] sm:$0xf] %v3070_v2  ;;  %3093 = vst [vmem:[%s5827_s17 + $0x30] sm:$0xf0] %v3091_v44  ;;  %v3075_v58 = vmul.f32 %v3067_v26, %v2931_v52  ;;  %v3096_v56 = vmul.f32 %v3088_v40, %v2931_v52 }
 0x313   : > { %v3071_v1 = vmul.f32 %v3067_v26, %v2923_v33  ;;  %v3092_v19 = vmul.f32 %v3088_v40, %v2923_v33 }
 0x314   : > { %3077 = vst [vmem:[%s5832_s13 + $0x38] sm:$0xf] %v3075_v58  ;;  %3098 = vst [vmem:[%s5832_s13 + $0x38] sm:$0xf0] %v3096_v56 }
 0x315   : > { %3073 = vst [vmem:[%s5827_s17 + $0x38] sm:$0xf] %v3071_v1  ;;  %3094 = vst [vmem:[%s5827_s17 + $0x38] sm:$0xf0] %v3092_v19 }
 0x316   : > { %3980 = shalt.err (!%p3977_p2)
}
 0x317   : > { %s3981_s16 = scalar_lea.hbm %s5943_s6, 1024  ;;  %s3985_s30 = scalar_lea.hbm %s6249_s2, 2048 }
 0x318   : > { %p3982_p3 = scmp.ne.s32.totalorder %s5943_s6, %s3981_s16  ;;  %p3986_p8 = scmp.lt.u32.totalorder %s5943_s6, %s6249_s2 }
 0x319   : > { %p3987_p11 = scmp.lt.u32.totalorder %s3985_s30, %s3981_s16  ;;  %p3989_p5 = scmp.lt.u32.totalorder %s3981_s16, %s5943_s6 }
 0x31a   : > { %p3983_p4 = pnand %p3982_p3, %p6253_p10 }
 0x31b   : > { %p3988_p13 = por %p3987_p11, %p3986_p8 }
 0x31c   : > { %p3984_p7 = pneg %p3983_p4 }
 0x31d   : > { %p3990_p0 = por %p3989_p5, %p3988_p13 }
 0x31f   : > { %p3991_p1 = pnand %p3990_p0, %p3984_p7 }
 0x321   : > { %3994 = shalt.err (!%p3991_p1)
}
 0x322   : > { %s4104_s24 = smov 256   ;;  %s4105_s7 = smov 16  }
 0x323   : > { %3618 = dma.vmem_to_hbm [thread:$0]  (%p6253_p10), %s5945_s19, 1024, %s5943_s6, %s3100_s21, %s4104_s24, %s4104_s24, %s4105_s7  }
 0x324   : > { %s3105_s17 = scalar_lea.sflag [#allocation21], %s5788_s11  ;;  %s3995_s13 = scalar_lea.vmem %s5952_s0, 1024 }
 0x325   : > { %p3996_p6 = scmp.ne.s32.totalorder %s5952_s0, %s3995_s13  ;;  %s4106_s28 = smov [#allocation20]  }
 0x326   : > { %s3999_s29 = sshll.u32 %s4106_s28, 4  ;;  %s4000_s29 = int_to_ptr.vmem [resolvable:$false] %s3999_s29 }
 0x327   : > { %p3997_p9 = pnand %p3996_p6, %p6253_p10  ;;  %s4001_s1 = scalar_lea.vmem %s4000_s29, 2048 }
 0x328   : > { %p4002_p2 = scmp.lt.s32.totalorder %s5952_s0, %s4000_s29  ;;  %p4003_p3 = scmp.lt.s32.totalorder %s4001_s1, %s3995_s13 }
 0x329   : > { %p3998_p12 = pneg %p3997_p9 }
 0x32a   : > { %p4004_p4 = por %p4003_p3, %p4002_p2 }
 0x32c   : > { %p4005_p7 = pnand %p4004_p4, %p3998_p12 }
 0x32e   : > { %4008 = shalt.err (!%p4005_p7)
}
 0x32f   : > { %s4009_s19 = scalar_lea.hbm %s5950_s23, 1024  ;;  %s4013_s10 = scalar_lea.hbm %s6252_s20, 2048 }
 0x330   : > { %p4010_p8 = scmp.ne.s32.totalorder %s5950_s23, %s4009_s19  ;;  %p4014_p5 = scmp.lt.u32.totalorder %s5950_s23, %s6252_s20 }
 0x331   : > { %p4015_p0 = scmp.lt.u32.totalorder %s4013_s10, %s4009_s19  ;;  %p4017_p6 = scmp.lt.u32.totalorder %s4009_s19, %s5950_s23 }
 0x332   : > { %p4011_p11 = pnand %p4010_p8, %p6253_p10 }
 0x333   : > { %p4016_p1 = por %p4015_p0, %p4014_p5 }
 0x334   : > { %p4012_p13 = pneg %p4011_p11 }
 0x335   : > { %p4018_p9 = por %p4017_p6, %p4016_p1 }
 0x337   : > { %p4019_p12 = pnand %p4018_p9, %p4012_p13 }
 0x339   : > { %4022 = shalt.err (!%p4019_p12)
}
 0x33a   : > { %3619 = dma.vmem_to_hbm [thread:$0]  (%p6253_p10), %s5952_s0, 1024, %s5950_s23, %s3105_s17, %s4104_s24, %s4104_s24, %s4105_s7  }
 0x33b PF: > { %s6254_s9 = sld [smem:[#allocation33_spill]]  ;;  %s6255_s12 = sld [smem:[#allocation30_spill]] }
 0x33c   : > { %s6256_s27 = sld [smem:[#allocation37_spill]] }
 0x341   : > { %p3675_p2 = scmp.ge.s32.totalorder %s6254_s9, 2  ;;  %s3151_s22 = sand.u32 1, %s6255_s12  }
 0x342   : > { %p6257_p3 = scmp.ne.s32.totalorder %s6256_s27, 0  ;;  %s3152_s16 = scalar_lea.sflag [#allocation5], %s3151_s22 }
 0x344   : > { %p3651_p4 = pnand %p3675_p2, %p6257_p3 }
 0x346   : > { %4064 = dma.done.wait (!%p3651_p4), %s3152_s16, 1024  }
 0x347   : > { %4066 = vsyncadd (!%p3651_p4), %s3152_s16, 4294966272  ;;  %s3161_s4 = scalar_lea.sflag [#allocation21], %s3151_s22 }
 0x348   : > { %4068 = dma.done.wait (!%p3651_p4), %s3161_s4, 1024  }
 0x349   : > { %4070 = vsyncadd (!%p3651_p4), %s3161_s4, 4294966272  ;;  %s6258_s28 = sld [smem:[#allocation34_spill]]  ;;  %s6259_s25 = sld [smem:[#allocation31_spill]] }
 0x34a   : > { %s6260_s26 = sld [smem:[#allocation32_spill]]  ;;  %s6261_s27 = sld [smem:[#allocation35_spill]] }
 0x34f   : > { %p33_p10 = scmp.ge.s32.totalorder %s6258_s28, 4  }
 0x351   :  { %35 = sbr.rel (!%p33_p10) target bundleno = 25 (0x19), region = 173 }
 0x358   :  { %3166 = vsyncpa [#allocation4], 1 }
 0x359   :  { %3168 = vsyncpa [#allocation4 + $0x1], 1 }
 0x35a   :  { %3169 = vsyncpa [#allocation9], 1 }
 0x35b   :  { %3170 = vsyncpa [#allocation12], 1 }
 0x35c   :  { %3171 = vsyncpa [#allocation15], 1 }
 0x35d   :  { %3172 = vsyncpa [#allocation18], 1 }
 0x35e   :  { %3173 = vsyncpa [#allocation5], 1 }
 0x35f   :  { %3175 = vsyncpa [#allocation5 + $0x1], 1 }
 0x360   :  { %3176 = vsyncpa [#allocation21], 1 }
 0x361   :  { %3178 = vsyncpa [#allocation21 + $0x1], 1 }
 0x362   :  { %3179 = vsyncpa [#allocation6], 1 }
 0x363   :  { %3181 = vsyncpa [#allocation6 + $0x1], 1 }

</bundles_post_ra>
